<compile_context>
chip_gen: v7x
topology: tpu7x:2x2x1
jax: 0.10.0
libtpu: 0.0.40
codegen_flags: <defaults>
</compile_context>

<pallas_src>
import functools

import jax
import jax.numpy as jnp
from jax import lax
from jax.experimental import pallas as pl
from jax.experimental.pallas import tpu as pltpu


# ----------------------------------------------------------------------------
# Pallas kernel: one grid step = one image; all three layers fused in VMEM.
# ----------------------------------------------------------------------------
def _fused_qat_yolo_kernel(
    p1_ref, w1_ref, sc1_ref, b1_ref,      # stem : im2col codes, weight codes, epilogue
    w2_ref, sc2_ref, b2_ref,              # body : 3x3 s1 p1 (single fused K=9*C1 matmul)
    w3t_ref, sc3_ref, b3_ref,             # head : 1x1, computed transposed
    o_ref,                                 # (C3, Mi) f32 raw head map (transposed)
    halo_ref,                              # VMEM scratch (Ho+2, Wo+2, C1) bf16
    *, Ho, Wo, C1, inv_s2, inv_s3):
    f32 = jnp.float32
    bf16 = jnp.bfloat16
    Mi = Ho * Wo

    # ---- layer 1 (stem, k3 s2 p1): codes precomputed on host -> one MXU matmul ----
    acc1 = jnp.dot(p1_ref[...], w1_ref[...], preferred_element_type=f32)      # (Mi, C1)
    z1 = acc1 * sc1_ref[...] + b1_ref[...]
    a1 = z1 * jax.nn.sigmoid(z1)                                              # SiLU (EUP)
    # Calibrated (fixed) activation scale -> int8 codes held exactly in bf16.
    a1c = jnp.clip(jnp.round(a1 * inv_s2), -127.0, 127.0).astype(bf16)        # (Mi, C1)

    # ---- layer 2 (body, k3 s1 p1): zero-halo scratch + 9 shifted slabs -> ONE dot ----
    # The scratch covers only one image's rows, so a single full-ref zero store is
    # cheap; masks/div-mod from the old flat-index scheme are gone (halo handles
    # borders, code 0 == value 0 for symmetric quantization, matching conv zero-pad).
    halo_ref[...] = jnp.zeros((Ho + 2, Wo + 2, C1), bf16)
    halo_ref[1:Ho + 1, 1:Wo + 1, :] = a1c.reshape(Ho, Wo, C1)
    taps = []
    for di in range(3):                  # static unroll: 9 halo-shifted views
        for dj in range(3):
            taps.append(halo_ref[di:di + Ho, dj:dj + Wo, :].reshape(Mi, C1))
    lhs2 = jnp.concatenate(taps, axis=1)                                      # (Mi, 9*C1)
    acc2 = jnp.dot(lhs2, w2_ref[...], preferred_element_type=f32)             # (Mi, C2)
    z2 = acc2 * sc2_ref[...] + b2_ref[...]
    a2 = z2 * jax.nn.sigmoid(z2)
    a2c = jnp.clip(jnp.round(a2 * inv_s3), -127.0, 127.0).astype(bf16)        # (Mi, C2)

    # ---- layer 3 (head, 1x1, no activation): transposed matmul -> (C3, Mi) ----------
    # Contracting rhs dim 1 (== pl.dot trans_b) keeps the result lane-dense (256 lanes)
    # so the output store is full-width vst instead of 16-lane masked stores.
    acc3t = lax.dot_general(w3t_ref[...], a2c,
                            dimension_numbers=(((1,), (1,)), ((), ())),
                            preferred_element_type=f32)                       # (C3, Mi)
    o_ref[...] = acc3t * sc3_ref[...] + b3_ref[...]


# ----------------------------------------------------------------------------
# Host-side helpers (tiny constant-sized work, folded into the jit around the call)
# ----------------------------------------------------------------------------
def _fold_bn(w, b, gamma, beta, mean, var, eps=1e-5):
    inv_std = gamma / jnp.sqrt(var + eps)
    return w * inv_std[:, None, None, None], (b - mean) * inv_std + beta


def _quant_weight_km(w, eps=1e-8):
    """Per-output-channel symmetric int8 fake-quant -> (kh*kw*Cin, Cout) bf16 codes
    plus per-channel scales as a (1, Cout) f32 row (codes |v|<=127 exact in bf16)."""
    Cout, Cin, kh, kw = w.shape
    amax = jnp.maximum(jnp.max(jnp.abs(w), axis=(1, 2, 3), keepdims=True), eps)
    scale = amax / 127.0
    codes = jnp.clip(jnp.round(w / scale), -127.0, 127.0)
    mat = jnp.transpose(codes, (2, 3, 1, 0)).reshape(kh * kw * Cin, Cout)
    return mat.astype(jnp.bfloat16), scale.reshape(1, Cout)


def _quant_weight_t(w, eps=1e-8):
    """1x1 head weight, transposed layout: (Cout, Cin) bf16 codes + (Cout, 1) scales."""
    Cout, Cin, kh, kw = w.shape
    amax = jnp.maximum(jnp.max(jnp.abs(w), axis=(1, 2, 3), keepdims=True), eps)
    scale = amax / 127.0
    codes = jnp.clip(jnp.round(w / scale), -127.0, 127.0)
    return codes.reshape(Cout, Cin).astype(jnp.bfloat16), scale.reshape(Cout, 1)


def _im2col_stride2(x_nhwc, kh=3, kw=3, stride=2, pad=1):
    # TODO(synk): at production resolutions, move this stride-2 im2col in-kernel
    # (DMA raw NHWC codes and build patch rows from shifted reads like layer 2).
    B, H, W, C = x_nhwc.shape
    Ho = (H + 2 * pad - kh) // stride + 1
    Wo = (W + 2 * pad - kw) // stride + 1
    xp = jnp.pad(x_nhwc, ((0, 0), (pad, pad), (pad, pad), (0, 0)))
    cols = [xp[:, i:i + stride * Ho:stride, j:j + stride * Wo:stride, :]
            for i in range(kh) for j in range(kw)]
    patches = jnp.concatenate(cols, axis=-1).reshape(B * Ho * Wo, kh * kw * C)
    return patches, Ho, Wo


def _conv_nhwc(x, w_oihw, stride, pad):
    return lax.conv_general_dilated(
        x, jnp.transpose(w_oihw, (2, 3, 1, 0)),
        window_strides=(stride, stride), padding=((pad, pad), (pad, pad)),
        dimension_numbers=("NHWC", "HWIO", "NHWC"),
        precision=lax.Precision.HIGHEST)


def calibrate_activation_scales(params, x_nchw):
    """Stand-in for the *fixed* per-tensor activation scales of a calibrated QAT
    checkpoint: a one-time pure-JAX float pass returning Python floats so they are
    baked into the kernel as constants (this is what unlocks batch/M tiling)."""
    # TODO(synk): with the real 'mase_calibrated_qat.pt' these are loaded, not computed.
    x = jnp.transpose(x_nchw, (0, 2, 3, 1)).astype(jnp.float32)
    w1, b1 = _fold_bn(params["w1"], params["b1"], params["g1"], params["be1"],
                      params["m1"], params["v1"])
    w2, b2 = _fold_bn(params["w2"], params["b2"], params["g2"], params["be2"],
                      params["m2"], params["v2"])
    z1 = _conv_nhwc(x, w1, 2, 1) + b1
    a1 = z1 * jax.nn.sigmoid(z1)
    z2 = _conv_nhwc(a1, w2, 1, 1) + b2
    a2 = z2 * jax.nn.sigmoid(z2)

    def s(t):
        return float(jnp.maximum(jnp.max(jnp.abs(t)), 1e-8) / 127.0)

    return {"s_in1": s(x), "s_in2": s(a1), "s_in3": s(a2)}


# ----------------------------------------------------------------------------
# Forward: WrappedQuantizedYOLO.forward(x) -> quantized_model(x)
# ----------------------------------------------------------------------------
def wrapped_quantized_yolo_forward(params, x_nchw, *, calib,
                                   augment=False, visualize=False, embed=None):
    x = jnp.transpose(x_nchw, (0, 2, 3, 1)).astype(jnp.float32)   # NCHW -> NHWC
    B = x.shape[0]

    w1, b1 = _fold_bn(params["w1"], params["b1"], params["g1"], params["be1"],
                      params["m1"], params["v1"])
    w2, b2 = _fold_bn(params["w2"], params["b2"], params["g2"], params["be2"],
                      params["m2"], params["v2"])
    w3, b3 = params["w3"], params["b3"]

    w1c, sw1 = _quant_weight_km(w1)          # (27, 16) bf16, (1, 16)
    w2c, sw2 = _quant_weight_km(w2)          # (144, 32) bf16, (1, 32)
    w3t, sw3 = _quant_weight_t(w3)           # (16, 32) bf16, (16, 1)
    C1, C2, C3 = w1c.shape[1], w2c.shape[1], w3t.shape[0]

    s_in1, s_in2, s_in3 = calib["s_in1"], calib["s_in2"], calib["s_in3"]

    # Host fake-quant of the stem input (f32 math, codes exact in bf16) + im2col.
    x_codes = jnp.clip(jnp.round(x * (1.0 / s_in1)), -127.0, 127.0)
    patches, Ho, Wo = _im2col_stride2(x_codes)                    # (B*Mi, 27) f32 codes
    K1 = patches.shape[1]
    K1p = ((K1 + 7) // 8) * 8                                     # 27 -> 32, exact zeros
    if K1p != K1:
        patches = jnp.pad(patches, ((0, 0), (0, K1p - K1)))
        w1c = jnp.pad(w1c, ((0, K1p - K1), (0, 0)))
    patches = patches.astype(jnp.bfloat16)
    Mi = Ho * Wo

    # Fold per-tensor activation scale into per-channel weight scale for the epilogue.
    sc1 = sw1 * s_in1                       # (1, C1)
    sc2 = sw2 * s_in2                       # (1, C2)
    sc3 = sw3 * s_in3                       # (C3, 1)  (transposed head)
    b1r = b1.reshape(1, C1)
    b2r = b2.reshape(1, C2)
    b3c = b3.reshape(C3, 1)

    kernel = functools.partial(_fused_qat_yolo_kernel, Ho=Ho, Wo=Wo, C1=C1,
                               inv_s2=1.0 / s_in2, inv_s3=1.0 / s_in3)

    out2d = pl.pallas_call(
        kernel,
        out_shape=jax.ShapeDtypeStruct((C3, B * Mi), jnp.float32),
        grid=(B,),
        in_specs=[
            pl.BlockSpec((Mi, K1p), lambda b: (b, 0)),      # per-image stem patches
            pl.BlockSpec((K1p, C1), lambda b: (0, 0)),      # w1 codes
            pl.BlockSpec((1, C1), lambda b: (0, 0)),        # sc1
            pl.BlockSpec((1, C1), lambda b: (0, 0)),        # b1
            pl.BlockSpec((9 * C1, C2), lambda b: (0, 0)),   # w2 codes (fused K=144)
            pl.BlockSpec((1, C2), lambda b: (0, 0)),        # sc2
            pl.BlockSpec((1, C2), lambda b: (0, 0)),        # b2
            pl.BlockSpec((C3, C2), lambda b: (0, 0)),       # w3 codes (transposed)
            pl.BlockSpec((C3, 1), lambda b: (0, 0)),        # sc3 column
            pl.BlockSpec((C3, 1), lambda b: (0, 0)),        # b3 column
        ],
        out_specs=pl.BlockSpec((C3, Mi), lambda b: (0, b)),  # lane-dense (16, 256) blocks
        scratch_shapes=[pltpu.VMEM((Ho + 2, Wo + 2, C1), jnp.bfloat16)],
        compiler_params=pltpu.CompilerParams(
            dimension_semantics=("parallel",),
            vmem_limit_bytes=32 * 1024 * 1024),
    )(patches, w1c, sc1, b1r, w2c, sc2, b2r, w3t, sc3, b3c)

    # (C3, B*Ho*Wo) -> NCHW; pure metadata reshuffle in the wrapper.
    return jnp.transpose(out2d.reshape(C3, B, Ho, Wo), (1, 0, 2, 3))


# ----------------------------------------------------------------------------
# Pure-JAX fake-quant reference (same integer-code math) for verification
# ----------------------------------------------------------------------------
def reference_fakequant_forward(params, calib, x_nchw):
    x = jnp.transpose(x_nchw, (0, 2, 3, 1)).astype(jnp.float32)
    w1, b1 = _fold_bn(params["w1"], params["b1"], params["g1"], params["be1"],
                      params["m1"], params["v1"])
    w2, b2 = _fold_bn(params["w2"], params["b2"], params["g2"], params["be2"],
                      params["m2"], params["v2"])
    w3, b3 = params["w3"], params["b3"]

    def qw(w, eps=1e-8):
        amax = jnp.maximum(jnp.max(jnp.abs(w), axis=(1, 2, 3), keepdims=True), eps)
        s = amax / 127.0
        return jnp.clip(jnp.round(w / s), -127.0, 127.0) * s

    def qa(a, s):
        return jnp.clip(jnp.round(a / s), -127.0, 127.0) * s

    z1 = _conv_nhwc(qa(x, calib["s_in1"]), qw(w1), 2, 1) + b1
    a1 = z1 * jax.nn.sigmoid(z1)
    z2 = _conv_nhwc(qa(a1, calib["s_in2"]), qw(w2), 1, 1) + b2
    a2 = z2 * jax.nn.sigmoid(z2)
    out = _conv_nhwc(qa(a2, calib["s_in3"]), qw(w3), 1, 0) + b3
    return jnp.transpose(out, (0, 3, 1, 2))


# ----------------------------------------------------------------------------
# Deterministic synthetic parameters (stand-in for the un-loadable checkpoint)
# ----------------------------------------------------------------------------
def init_params(key):
    def conv_w(k, cout, cin, kh, kw):
        fan_in = cin * kh * kw
        return jax.random.normal(k, (cout, cin, kh, kw), jnp.float32) * (2.0 / fan_in) ** 0.5

    keys = jax.random.split(key, 8)
    p = {}
    # stem: 3 -> 16, k3 s2
    p["w1"] = conv_w(keys[0], 16, 3, 3, 3)
    p["b1"] = jnp.zeros((16,), jnp.float32)
    p["g1"] = 1.0 + 0.1 * jax.random.normal(keys[1], (16,), jnp.float32)
    p["be1"] = 0.1 * jax.random.normal(keys[2], (16,), jnp.float32)
    p["m1"] = 0.05 * jax.random.normal(keys[3], (16,), jnp.float32)
    p["v1"] = jnp.abs(1.0 + 0.1 * jax.random.normal(keys[4], (16,), jnp.float32))
    # body: 16 -> 32, k3 s1
    p["w2"] = conv_w(keys[5], 32, 16, 3, 3)
    p["b2"] = jnp.zeros((32,), jnp.float32)
    p["g2"] = jnp.ones((32,), jnp.float32)
    p["be2"] = jnp.zeros((32,), jnp.float32)
    p["m2"] = jnp.zeros((32,), jnp.float32)
    p["v2"] = jnp.ones((32,), jnp.float32)
    # head: 32 -> 16, k1 s1 (raw detection map)
    p["w3"] = conv_w(keys[6], 16, 32, 1, 1)
    p["b3"] = 0.01 * jax.random.normal(keys[7], (16,), jnp.float32)
    return p


if __name__ == "__main__":
    key = jax.random.PRNGKey(0)
    k_param, k_x = jax.random.split(key)

    params = init_params(k_param)
    # small YOLO-style input: batch=2, 3-channel image, 32x32
    x = jax.random.normal(k_x, (2, 3, 32, 32), jnp.float32)

    # Fixed ("checkpoint") activation scales, computed once on the host.
    calib = calibrate_activation_scales(params, x)

    fwd = jax.jit(functools.partial(wrapped_quantized_yolo_forward, calib=calib))
    out = fwd(params, x)
    jax.block_until_ready(out)

    assert out.shape == (2, 16, 16, 16), out.shape
    assert bool(jnp.all(jnp.isfinite(out)))

    ref = reference_fakequant_forward(params, calib, x)
    max_err = float(jnp.max(jnp.abs(out - ref)))
    assert max_err < 1e-1, max_err

    print("KERNEL_OK")
</pallas_src>

<mosaic_0001>
module attributes {stable_mosaic.version = 11 : i64} {
  func.func @_fused_qat_yolo_kernel(%arg0: i32, %arg1: memref<256x32xbf16, #tpu.memory_space<vmem>>, %arg2: memref<32x16xbf16, #tpu.memory_space<vmem>>, %arg3: memref<1x16xf32, #tpu.memory_space<vmem>>, %arg4: memref<1x16xf32, #tpu.memory_space<vmem>>, %arg5: memref<144x32xbf16, #tpu.memory_space<vmem>>, %arg6: memref<1x32xf32, #tpu.memory_space<vmem>>, %arg7: memref<1x32xf32, #tpu.memory_space<vmem>>, %arg8: memref<16x32xbf16, #tpu.memory_space<vmem>>, %arg9: memref<16x1xf32, #tpu.memory_space<vmem>>, %arg10: memref<16x1xf32, #tpu.memory_space<vmem>>, %arg11: memref<16x256xf32, #tpu.memory_space<vmem>>, %arg12: memref<18x18x16xbf16, #tpu.memory_space<vmem>>) attributes {dimension_semantics = [#tpu.dimension_semantics<parallel>], iteration_bounds = array<i64: 2>, scalar_prefetch = 0 : i64, scratch_operands = 1 : i64, tpu.core_type = #tpu.core_type<tc>, window_params = [{transform_indices = @transform_0, window_bounds = array<i64: 256, 32>}, {pipeline_mode = #tpu.pipeline_mode<synchronous>, transform_indices = @transform_1, window_bounds = array<i64: 32, 16>}, {pipeline_mode = #tpu.pipeline_mode<synchronous>, transform_indices = @transform_2, window_bounds = array<i64: 1, 16>}, {pipeline_mode = #tpu.pipeline_mode<synchronous>, transform_indices = @transform_3, window_bounds = array<i64: 1, 16>}, {pipeline_mode = #tpu.pipeline_mode<synchronous>, transform_indices = @transform_4, window_bounds = array<i64: 144, 32>}, {pipeline_mode = #tpu.pipeline_mode<synchronous>, transform_indices = @transform_5, window_bounds = array<i64: 1, 32>}, {pipeline_mode = #tpu.pipeline_mode<synchronous>, transform_indices = @transform_6, window_bounds = array<i64: 1, 32>}, {pipeline_mode = #tpu.pipeline_mode<synchronous>, transform_indices = @transform_7, window_bounds = array<i64: 16, 32>}, {pipeline_mode = #tpu.pipeline_mode<synchronous>, transform_indices = @transform_8, window_bounds = array<i64: 16, 1>}, {pipeline_mode = #tpu.pipeline_mode<synchronous>, transform_indices = @transform_9, window_bounds = array<i64: 16, 1>}, {transform_indices = @transform_10, window_bounds = array<i64: 16, 256>}]} {
    %c0 = arith.constant 0 : index
    %c0_0 = arith.constant 0 : index
    %0 = vector.load %arg1[%c0, %c0_0] : memref<256x32xbf16, #tpu.memory_space<vmem>>, vector<256x32xbf16>
    %c0_1 = arith.constant 0 : index
    %c0_2 = arith.constant 0 : index
    %1 = vector.load %arg2[%c0_1, %c0_2] : memref<32x16xbf16, #tpu.memory_space<vmem>>, vector<32x16xbf16>
    %cst = arith.constant dense<0.000000e+00> : vector<256x16xf32>
    %2 = tpu.matmul %0, %1, %cst {dimension_numbers = #tpu.dot_dimension_numbers<[1], [0], [0], [1], [0, 0, 1, 1], [], []>} : vector<256x32xbf16>, vector<32x16xbf16>, vector<256x16xf32> -> vector<256x16xf32>
    %c0_3 = arith.constant 0 : index
    %c0_4 = arith.constant 0 : index
    %3 = vector.load %arg3[%c0_3, %c0_4] : memref<1x16xf32, #tpu.memory_space<vmem>>, vector<1x16xf32>
    %4 = vector.broadcast %3 : vector<1x16xf32> to vector<256x16xf32>
    %5 = arith.mulf %2, %4 : vector<256x16xf32>
    %c0_5 = arith.constant 0 : index
    %c0_6 = arith.constant 0 : index
    %6 = vector.load %arg4[%c0_5, %c0_6] : memref<1x16xf32, #tpu.memory_space<vmem>>, vector<1x16xf32>
    %7 = vector.broadcast %6 : vector<1x16xf32> to vector<256x16xf32>
    %8 = arith.addf %5, %7 : vector<256x16xf32>
    %9 = arith.negf %8 : vector<256x16xf32>
    %10 = math.exp %9 : vector<256x16xf32>
    %cst_7 = arith.constant 1.000000e+00 : f32
    %11 = vector.broadcast %cst_7 : f32 to vector<256x16xf32>
    %12 = arith.addf %11, %10 : vector<256x16xf32>
    %13 = arith.divf %11, %12 : vector<256x16xf32>
    %14 = arith.mulf %8, %13 : vector<256x16xf32>
    %cst_8 = arith.constant 19.3670464 : f32
    %15 = vector.broadcast %cst_8 : f32 to vector<256x16xf32>
    %16 = arith.mulf %14, %15 : vector<256x16xf32>
    %17 = math.roundeven %16 : vector<256x16xf32>
    %cst_9 = arith.constant -1.270000e+02 : f32
    %cst_10 = arith.constant 1.270000e+02 : f32
    %18 = vector.broadcast %cst_9 : f32 to vector<256x16xf32>
    %19 = arith.maximumf %18, %17 : vector<256x16xf32>
    %20 = vector.broadcast %cst_10 : f32 to vector<256x16xf32>
    %21 = arith.minimumf %20, %19 : vector<256x16xf32>
    %22 = arith.truncf %21 : vector<256x16xf32> to vector<256x16xbf16>
    %cst_11 = arith.constant 0.000000e+00 : bf16
    %23 = vector.broadcast %cst_11 : bf16 to vector<18x18x16xbf16>
    %c0_12 = arith.constant 0 : index
    %c0_13 = arith.constant 0 : index
    %c0_14 = arith.constant 0 : index
    %24 = vector.load %arg12[%c0_12, %c0_13, %c0_14] : memref<18x18x16xbf16, #tpu.memory_space<vmem>>, vector<18x18x16xbf16>
    tpu.vector_store %arg12[%c0_12, %c0_13, %c0_14], %23 {strides = array<i32>} : memref<18x18x16xbf16, #tpu.memory_space<vmem>>, vector<18x18x16xbf16>,
    %25 = vector.shape_cast %22 : vector<256x16xbf16> to vector<16x16x16xbf16>
    %c1 = arith.constant 1 : index
    %c1_15 = arith.constant 1 : index
    %c0_16 = arith.constant 0 : index
    %26 = vector.load %arg12[%c1, %c1_15, %c0_16] : memref<18x18x16xbf16, #tpu.memory_space<vmem>>, vector<16x16x16xbf16>
    tpu.vector_store %arg12[%c1, %c1_15, %c0_16], %25 {strides = array<i32>} : memref<18x18x16xbf16, #tpu.memory_space<vmem>>, vector<16x16x16xbf16>,
    %c0_17 = arith.constant 0 : index
    %c0_18 = arith.constant 0 : index
    %c0_19 = arith.constant 0 : index
    %27 = vector.load %arg12[%c0_17, %c0_18, %c0_19] : memref<18x18x16xbf16, #tpu.memory_space<vmem>>, vector<16x16x16xbf16>
    %28 = vector.shape_cast %27 : vector<16x16x16xbf16> to vector<256x16xbf16>
    %c0_20 = arith.constant 0 : index
    %c1_21 = arith.constant 1 : index
    %c0_22 = arith.constant 0 : index
    %29 = vector.load %arg12[%c0_20, %c1_21, %c0_22] : memref<18x18x16xbf16, #tpu.memory_space<vmem>>, vector<16x16x16xbf16>
    %30 = vector.shape_cast %29 : vector<16x16x16xbf16> to vector<256x16xbf16>
    %c0_23 = arith.constant 0 : index
    %c2 = arith.constant 2 : index
    %c0_24 = arith.constant 0 : index
    %31 = vector.load %arg12[%c0_23, %c2, %c0_24] : memref<18x18x16xbf16, #tpu.memory_space<vmem>>, vector<16x16x16xbf16>
    %32 = vector.shape_cast %31 : vector<16x16x16xbf16> to vector<256x16xbf16>
    %c1_25 = arith.constant 1 : index
    %c0_26 = arith.constant 0 : index
    %c0_27 = arith.constant 0 : index
    %33 = vector.load %arg12[%c1_25, %c0_26, %c0_27] : memref<18x18x16xbf16, #tpu.memory_space<vmem>>, vector<16x16x16xbf16>
    %34 = vector.shape_cast %33 : vector<16x16x16xbf16> to vector<256x16xbf16>
    %c1_28 = arith.constant 1 : index
    %c1_29 = arith.constant 1 : index
    %c0_30 = arith.constant 0 : index
    %35 = vector.load %arg12[%c1_28, %c1_29, %c0_30] : memref<18x18x16xbf16, #tpu.memory_space<vmem>>, vector<16x16x16xbf16>
    %36 = vector.shape_cast %35 : vector<16x16x16xbf16> to vector<256x16xbf16>
    %c1_31 = arith.constant 1 : index
    %c2_32 = arith.constant 2 : index
    %c0_33 = arith.constant 0 : index
    %37 = vector.load %arg12[%c1_31, %c2_32, %c0_33] : memref<18x18x16xbf16, #tpu.memory_space<vmem>>, vector<16x16x16xbf16>
    %38 = vector.shape_cast %37 : vector<16x16x16xbf16> to vector<256x16xbf16>
    %c2_34 = arith.constant 2 : index
    %c0_35 = arith.constant 0 : index
    %c0_36 = arith.constant 0 : index
    %39 = vector.load %arg12[%c2_34, %c0_35, %c0_36] : memref<18x18x16xbf16, #tpu.memory_space<vmem>>, vector<16x16x16xbf16>
    %40 = vector.shape_cast %39 : vector<16x16x16xbf16> to vector<256x16xbf16>
    %c2_37 = arith.constant 2 : index
    %c1_38 = arith.constant 1 : index
    %c0_39 = arith.constant 0 : index
    %41 = vector.load %arg12[%c2_37, %c1_38, %c0_39] : memref<18x18x16xbf16, #tpu.memory_space<vmem>>, vector<16x16x16xbf16>
    %42 = vector.shape_cast %41 : vector<16x16x16xbf16> to vector<256x16xbf16>
    %c2_40 = arith.constant 2 : index
    %c2_41 = arith.constant 2 : index
    %c0_42 = arith.constant 0 : index
    %43 = vector.load %arg12[%c2_40, %c2_41, %c0_42] : memref<18x18x16xbf16, #tpu.memory_space<vmem>>, vector<16x16x16xbf16>
    %44 = vector.shape_cast %43 : vector<16x16x16xbf16> to vector<256x16xbf16>
    %45 = tpu.concatenate %28, %30, %32, %34, %36, %38, %40, %42, %44 in 1 : vector<256x16xbf16>, vector<256x16xbf16>, vector<256x16xbf16>, vector<256x16xbf16>, vector<256x16xbf16>, vector<256x16xbf16>, vector<256x16xbf16>, vector<256x16xbf16>, vector<256x16xbf16> -> vector<256x144xbf16>
    %c0_43 = arith.constant 0 : index
    %c0_44 = arith.constant 0 : index
    %46 = vector.load %arg5[%c0_43, %c0_44] : memref<144x32xbf16, #tpu.memory_space<vmem>>, vector<144x32xbf16>
    %cst_45 = arith.constant dense<0.000000e+00> : vector<256x32xf32>
    %47 = tpu.matmul %45, %46, %cst_45 {dimension_numbers = #tpu.dot_dimension_numbers<[1], [0], [0], [1], [0, 0, 1, 1], [], []>} : vector<256x144xbf16>, vector<144x32xbf16>, vector<256x32xf32> -> vector<256x32xf32>
    %c0_46 = arith.constant 0 : index
    %c0_47 = arith.constant 0 : index
    %48 = vector.load %arg6[%c0_46, %c0_47] : memref<1x32xf32, #tpu.memory_space<vmem>>, vector<1x32xf32>
    %49 = vector.broadcast %48 : vector<1x32xf32> to vector<256x32xf32>
    %50 = arith.mulf %47, %49 : vector<256x32xf32>
    %c0_48 = arith.constant 0 : index
    %c0_49 = arith.constant 0 : index
    %51 = vector.load %arg7[%c0_48, %c0_49] : memref<1x32xf32, #tpu.memory_space<vmem>>, vector<1x32xf32>
    %52 = vector.broadcast %51 : vector<1x32xf32> to vector<256x32xf32>
    %53 = arith.addf %50, %52 : vector<256x32xf32>
    %54 = arith.negf %53 : vector<256x32xf32>
    %55 = math.exp %54 : vector<256x32xf32>
    %cst_50 = arith.constant 1.000000e+00 : f32
    %56 = vector.broadcast %cst_50 : f32 to vector<256x32xf32>
    %57 = arith.addf %56, %55 : vector<256x32xf32>
    %58 = arith.divf %56, %57 : vector<256x32xf32>
    %59 = arith.mulf %53, %58 : vector<256x32xf32>
    %cst_51 = arith.constant 25.4750843 : f32
    %60 = vector.broadcast %cst_51 : f32 to vector<256x32xf32>
    %61 = arith.mulf %59, %60 : vector<256x32xf32>
    %62 = math.roundeven %61 : vector<256x32xf32>
    %cst_52 = arith.constant -1.270000e+02 : f32
    %cst_53 = arith.constant 1.270000e+02 : f32
    %63 = vector.broadcast %cst_52 : f32 to vector<256x32xf32>
    %64 = arith.maximumf %63, %62 : vector<256x32xf32>
    %65 = vector.broadcast %cst_53 : f32 to vector<256x32xf32>
    %66 = arith.minimumf %65, %64 : vector<256x32xf32>
    %67 = arith.truncf %66 : vector<256x32xf32> to vector<256x32xbf16>
    %c0_54 = arith.constant 0 : index
    %c0_55 = arith.constant 0 : index
    %68 = vector.load %arg8[%c0_54, %c0_55] : memref<16x32xbf16, #tpu.memory_space<vmem>>, vector<16x32xbf16>
    %cst_56 = arith.constant dense<0.000000e+00> : vector<16x256xf32>
    %69 = tpu.matmul %68, %67, %cst_56 {dimension_numbers = #tpu.dot_dimension_numbers<[1], [1], [0], [0], [0, 0, 1, 0], [], []>} : vector<16x32xbf16>, vector<256x32xbf16>, vector<16x256xf32> -> vector<16x256xf32>
    %c0_57 = arith.constant 0 : index
    %c0_58 = arith.constant 0 : index
    %70 = vector.load %arg9[%c0_57, %c0_58] : memref<16x1xf32, #tpu.memory_space<vmem>>, vector<16x1xf32>
    %71 = vector.broadcast %70 : vector<16x1xf32> to vector<16x256xf32>
    %72 = arith.mulf %69, %71 : vector<16x256xf32>
    %c0_59 = arith.constant 0 : index
    %c0_60 = arith.constant 0 : index
    %73 = vector.load %arg10[%c0_59, %c0_60] : memref<16x1xf32, #tpu.memory_space<vmem>>, vector<16x1xf32>
    %74 = vector.broadcast %73 : vector<16x1xf32> to vector<16x256xf32>
    %75 = arith.addf %72, %74 : vector<16x256xf32>
    %c0_61 = arith.constant 0 : index
    %c0_62 = arith.constant 0 : index
    %76 = vector.load %arg11[%c0_61, %c0_62] : memref<16x256xf32, #tpu.memory_space<vmem>>, vector<16x256xf32>
    tpu.vector_store %arg11[%c0_61, %c0_62], %75 {strides = array<i32>} : memref<16x256xf32, #tpu.memory_space<vmem>>, vector<16x256xf32>,
    return
  }
  func.func @transform_0(%arg0: i32) -> (i32, i32) {
    %c0_i32 = arith.constant 0 : i32
    %c0_i32_0 = arith.constant 0 : i32
    return %arg0, %c0_i32 : i32, i32
  }
  func.func @transform_1(%arg0: i32) -> (i32, i32) {
    %c0_i32 = arith.constant 0 : i32
    %c0_i32_0 = arith.constant 0 : i32
    %c0_i32_1 = arith.constant 0 : i32
    return %c0_i32, %c0_i32_0 : i32, i32
  }
  func.func @transform_2(%arg0: i32) -> (i32, i32) {
    %c0_i32 = arith.constant 0 : i32
    %c0_i32_0 = arith.constant 0 : i32
    %c0_i32_1 = arith.constant 0 : i32
    return %c0_i32, %c0_i32_0 : i32, i32
  }
  func.func @transform_3(%arg0: i32) -> (i32, i32) {
    %c0_i32 = arith.constant 0 : i32
    %c0_i32_0 = arith.constant 0 : i32
    %c0_i32_1 = arith.constant 0 : i32
    return %c0_i32, %c0_i32_0 : i32, i32
  }
  func.func @transform_4(%arg0: i32) -> (i32, i32) {
    %c0_i32 = arith.constant 0 : i32
    %c0_i32_0 = arith.constant 0 : i32
    %c0_i32_1 = arith.constant 0 : i32
    return %c0_i32, %c0_i32_0 : i32, i32
  }
  func.func @transform_5(%arg0: i32) -> (i32, i32) {
    %c0_i32 = arith.constant 0 : i32
    %c0_i32_0 = arith.constant 0 : i32
    %c0_i32_1 = arith.constant 0 : i32
    return %c0_i32, %c0_i32_0 : i32, i32
  }
  func.func @transform_6(%arg0: i32) -> (i32, i32) {
    %c0_i32 = arith.constant 0 : i32
    %c0_i32_0 = arith.constant 0 : i32
    %c0_i32_1 = arith.constant 0 : i32
    return %c0_i32, %c0_i32_0 : i32, i32
  }
  func.func @transform_7(%arg0: i32) -> (i32, i32) {
    %c0_i32 = arith.constant 0 : i32
    %c0_i32_0 = arith.constant 0 : i32
    %c0_i32_1 = arith.constant 0 : i32
    return %c0_i32, %c0_i32_0 : i32, i32
  }
  func.func @transform_8(%arg0: i32) -> (i32, i32) {
    %c0_i32 = arith.constant 0 : i32
    %c0_i32_0 = arith.constant 0 : i32
    %c0_i32_1 = arith.constant 0 : i32
    return %c0_i32, %c0_i32_0 : i32, i32
  }
  func.func @transform_9(%arg0: i32) -> (i32, i32) {
    %c0_i32 = arith.constant 0 : i32
    %c0_i32_0 = arith.constant 0 : i32
    %c0_i32_1 = arith.constant 0 : i32
    return %c0_i32, %c0_i32_0 : i32, i32
  }
  func.func @transform_10(%arg0: i32) -> (i32, i32) {
    %c0_i32 = arith.constant 0 : i32
    %c0_i32_0 = arith.constant 0 : i32
    return %c0_i32, %arg0 : i32, i32
  }
}

</mosaic_0001>

<bundles_post_ra>
// kernel: wrapped_quantized_yolo_forward.1
= control target key start
LH: loop header
LB: loop body
LE: loop exit
PB: predicated region body
PF: predicated region fallthrough
CT: control target
= control target key end

     0   :  { %s6552_s13 = smov 0   ;;  %s6554_s14 = smov 0   ;;  %s9298_s0 = inlined_call_operand.vmem [shape: bf16[512,32], index: 0, kind: input, shape index: {}]   ;;  %s9299_s1 = inlined_call_operand.vmem [shape: bf16[32,16], index: 1, kind: input, shape index: {}]   ;;  %s9300_s2 = inlined_call_operand.vmem [shape: f32[1,16], index: 2, kind: input, shape index: {}]   ;;  %s9301_s3 = inlined_call_operand.vmem [shape: f32[1,16], index: 3, kind: input, shape index: {}]   ;;  %s9302_s4 = inlined_call_operand.vmem [shape: bf16[144,32], index: 4, kind: input, shape index: {}]   ;;  %s9303_s5 = inlined_call_operand.vmem [shape: f32[1,32], index: 5, kind: input, shape index: {}]   ;;  %s9304_s6 = inlined_call_operand.vmem [shape: f32[1,32], index: 6, kind: input, shape index: {}]   ;;  %s9305_s7 = inlined_call_operand.vmem [shape: bf16[16,32], index: 7, kind: input, shape index: {}]   ;;  %s9306_s8 = inlined_call_operand.vmem [shape: f32[16,1], index: 8, kind: input, shape index: {}]   ;;  %s9307_s9 = inlined_call_operand.vmem [shape: f32[16,1], index: 9, kind: input, shape index: {}]   ;;  %s9308_s10 = inlined_call_operand.vmem [shape: f32[16,512], index: 10, kind: output, shape index: {}]  }
   0x1   :  { %s6556_s15 = smov 0  }
   0x2 LB: > { %s6565_s16 = sadd.s32 4294967295, %s6487_s15   ;;  %s6567_s17 = sadd.s32 1, %s6487_s15   ;;  %s6487_s15 = sphi %s6556_s15, %s9436_s15   ;;  %s6483_s14 = sphi %s6554_s14, %s9435_s14   ;;  %s6479_s13 = sphi %s6552_s13, %s9434_s13  }
   0x3   : > { %s239_s18 = ssub.s32 %s6487_s15, %s6567_s17  ;;  %s242_s19 = sadd.s32 1, %s6483_s14 }
   0x4   : > { %p240_p0 = scmp.eq.s32.totalorder %s239_s18, 0  ;;  %p252_p1 = scmp.ne.s32.totalorder %s6483_s14, %s6479_s13 }
   0x5   : > { %p253_p2 = scmp.eq.s32.totalorder %s6565_s16, 1  ;;  %p5467_p3 = scmp.ge.s32.totalorder %s6487_s15, 1 }
   0x6   : > { %s6575_s20 = scalar_select %p240_p0, %s6483_s14, %s242_s19  }
   0x7   : > { %p6577_p4 = por %p253_p2, %p252_p1  ;;  %p313_p5 = scmp.lt.s32.totalorder %s6487_s15, 3 }
   0x9   : > { %p314_p6 = pnand %p5467_p3, %p313_p5 }
   0xb   : > { %317 = sbr.rel (%p314_p6) target bundleno = 1292 (0x50c), region = 60 }
  0x12   : > { %v6104_v0 = vld [vmem:[%s9299_s1] sm:$0xff]   ;;  %s5469_s24 = sshll.u32 %s6565_s16, 5  ;;  %v6105_v1 = vld [vmem:[%s9299_s1 + $0x8] sm:$0xff]   ;;  %vm486_vm0 = vcmask 261120   ;;  %vm1142_vm1 = vcmask 125952   ;;  %v6489_v18 = vmov 0  }
  0x13   : > { %p351_p7 = scmp.lt.s32.totalorder %s5469_s24, 63  ;;  %5962 = vmatprep.subr.bf16.mxu0 %v6104_v0  ;;  %1150 = vst.msk [vmem:[#allocation2 + $0x18] sm:$0xf] %vm1142_vm1, %v6489_v18  ;;  %1143 = vst.msk [vmem:[#allocation2] sm:$0xf] %vm1142_vm1, %v6489_v18  ;;  %4636 = vmatprep.subr.bf16.mxu1 %v6489_v18  ;;  %vm1145_vm2 = vcmask 122880  }
  0x14   : > { %5963 = vmatpush3.bf16.msra.mxu0 %v6104_v0  ;;  %1144 = vst.msk [vmem:[#allocation2 + $0x4] sm:$0xf] %vm1142_vm1, %v6489_v18  ;;  %1147 = vst.msk [vmem:[#allocation2 + $0xc] sm:$0xf] %vm1142_vm1, %v6489_v18  ;;  %6103 = vset.pattern.permute.xlu1 %v6489_v18  ;;  %vm2218_vm3 = vcmask 1042432   ;;  %vm2219_vm4 = vcmask 1046532  }
  0x15   : > { %s9438_s24 = smov (!%p351_p7, %s5469_s24), 63  ;;  %5964 = vmatprep.subr.bf16.mxu0 %v6105_v1  ;;  %1148 = vst.msk [vmem:[#allocation2 + $0x10] sm:$0xf] %vm1142_vm1, %v6489_v18  ;;  %1151 = vst.msk [vmem:[#allocation2 + $0x1c] sm:$0xf] %vm1142_vm1, %v6489_v18  ;;  %6102 = vset.pattern.permute.xlu0 %v6489_v18  ;;  %s6490_s11 = smov 32  }
  0x16   : > { %s5470_s27 = sshll.u32 %s9438_s24, 2  ;;  %1153 = vst.msk [vmem:[#allocation2 + $0x24] sm:$0xf] %vm1142_vm1, %v6489_v18  ;;  %1154 = vst.msk [vmem:[#allocation2 + $0x28] sm:$0xf] %vm1142_vm1, %v6489_v18  ;;  %s6491_s12 = smov 16  }
  0x17   : > { %s6591_s30 = scalar_lea.vmem %s9298_s0, %s5470_s27  ;;  %1156 = vst.msk [vmem:[#allocation2 + $0x30] sm:$0xf] %vm1142_vm1, %v6489_v18  ;;  %1157 = vst.msk [vmem:[#allocation2 + $0x34] sm:$0xf] %vm1142_vm1, %v6489_v18  ;;  %vm1767_vm6 = vsmask.f32 3328 }
  0x18   : > { %5965 = vmatpush3.bf16.msra.mxu0 %v6105_v1  ;;  %v6106_v2 = vld [vmem:[%s6591_s30] sm:$0xff]   ;;  %v6107_v3 = vld [vmem:[%s6591_s30 + $0x8] sm:$0xff]   ;;  %v6108_v4 = vld [vmem:[%s6591_s30 + $0x10] sm:$0xff]   ;;  %1159 = vst.msk [vmem:[#allocation2 + $0x3c] sm:$0xf] %vm1142_vm1, %v6489_v18  ;;  %s6492_s23 = smov 96  }
  0x19   : > { %5966 = vmatprep.mubr.msk.bf16.mxu0 %vm486_vm0, %v6106_v2  ;;  %v6109_v5 = vld [vmem:[%s6591_s30 + $0x18] sm:$0xff]   ;;  %v6110_v6 = vld [vmem:[%s6591_s30 + $0x20] sm:$0xff]   ;;  %v6111_v7 = vld [vmem:[%s6591_s30 + $0x28] sm:$0xff]   ;;  %1160 = vst.msk [vmem:[#allocation2 + $0x40] sm:$0xf] %vm1142_vm1, %v6489_v18  ;;  %vm4254_vm15 = vcmask 130048  }
  0x1a   : > { %v6112_v8 = vld [vmem:[%s6591_s30 + $0x30] sm:$0xff]   ;;  %v6113_v9 = vld [vmem:[%s6591_s30 + $0x38] sm:$0xff]   ;;  %v6114_v10 = vld [vmem:[%s6591_s30 + $0x40] sm:$0xff]   ;;  %1162 = vst.msk [vmem:[#allocation2 + $0x48] sm:$0xf] %vm1142_vm1, %v6489_v18  ;;  %s6493_s24 = smov 48  }
  0x1b   : > { %5967 = vmatmul.mubr.msk.bf16.vlgmr.msra.gmra.mrb[0].mxu0 %vm486_vm0, %v6107_v3  ;;  %v6115_v11 = vld [vmem:[%s6591_s30 + $0x48] sm:$0xff]   ;;  %v6116_v12 = vld [vmem:[%s6591_s30 + $0x50] sm:$0xff]   ;;  %v6117_v13 = vld [vmem:[%s6591_s30 + $0x58] sm:$0xff]   ;;  %1163 = vst.msk [vmem:[#allocation2 + $0x4c] sm:$0xf] %vm1142_vm1, %v6489_v18  ;;  %s6494_s25 = smov 80  }
  0x1c   : > { %5970 = vmatprep.mubr.msk.bf16.mxu0 %vm486_vm0, %v6108_v4  ;;  %v6118_v14 = vld [vmem:[%s6591_s30 + $0x60] sm:$0xff]   ;;  %v6119_v15 = vld [vmem:[%s6591_s30 + $0x68] sm:$0xff]   ;;  %v6120_v16 = vld [vmem:[%s6591_s30 + $0x70] sm:$0xff]   ;;  %1165 = vst.msk [vmem:[#allocation2 + $0x54] sm:$0xf] %vm1142_vm1, %v6489_v18  ;;  %s6495_s26 = smov 112  }
  0x1d   : > { %v6121_v17 = vld [vmem:[%s6591_s30 + $0x78] sm:$0xff]   ;;  %1166 = vst.msk [vmem:[#allocation2 + $0x58] sm:$0xf] %vm1142_vm1, %v6489_v18  ;;  %1168 = vst.msk [vmem:[#allocation2 + $0x60] sm:$0xf] %vm1142_vm1, %v6489_v18  ;;  %s6496_s27 = smov 64  }
  0x1e   : > { %1169 = vst.msk [vmem:[#allocation2 + $0x64] sm:$0xf] %vm1142_vm1, %v6489_v18  ;;  %1171 = vst.msk [vmem:[#allocation2 + $0x6c] sm:$0xf] %vm1142_vm1, %v6489_v18  ;;  %v1720_v19 = vld [vmem:[#allocation2 + $0x4] sm:$0xf] }
  0x1f   : > { %1172 = vst.msk [vmem:[#allocation2 + $0x70] sm:$0xf] %vm1142_vm1, %v6489_v18  ;;  %1174 = vst.msk [vmem:[#allocation2 + $0x78] sm:$0xf] %vm1142_vm1, %v6489_v18  ;;  %v1719_v20 = vld [vmem:[#allocation2] sm:$0xf] }
  0x20   : > { %1175 = vst.msk [vmem:[#allocation2 + $0x7c] sm:$0xf] %vm1142_vm1, %v6489_v18  ;;  %1177 = vst.msk [vmem:[#allocation2 + $0x84] sm:$0xf] %vm1142_vm1, %v6489_v18  ;;  %v2223_v21 = vrot.slane %v1720_v19, 5  ;;  %v1771_v22 = vshrl.u32 %v1719_v20, 16 }
  0x21   : > { %1178 = vst.msk [vmem:[#allocation2 + $0x88] sm:$0xf] %vm1142_vm1, %v6489_v18  ;;  %1180 = vst.msk [vmem:[#allocation2 + $0x90] sm:$0xf] %vm1142_vm1, %v6489_v18  ;;  %v1774_v23 = vshll.u32 %v1719_v20, 16  ;;  %v1780_v24 = vshll.u32 %v1720_v19, 16 }
  0x22   : > { %1181 = vst.msk [vmem:[#allocation2 + $0x94] sm:$0xf] %vm1142_vm1, %v6489_v18  ;;  %1183 = vst.msk [vmem:[#allocation2 + $0x9c] sm:$0xf] %vm1142_vm1, %v6489_v18  ;;  %v2154_v26 = vld [vmem:[#allocation2] sm:$0xe] }
  0x23   : > { %5971 = vmatmul.mubr.msk.bf16.gmra.mrb[4].mxu0 %vm486_vm0, %v6109_v5  ;;  %1184 = vst.msk [vmem:[#allocation2 + $0xa0] sm:$0xf] %vm1142_vm1, %v6489_v18  ;;  %1186 = vst.msk [vmem:[#allocation2 + $0xa8] sm:$0xf] %vm1142_vm1, %v6489_v18  ;;  %v1784_v27 = vshrl.u32 %v1720_v19, 16  ;;  %v5603_v28 = vrot.slane %v2154_v26, 9 }
  0x24   : > { %5974 = vmatprep.mubr.msk.bf16.mxu0 %vm486_vm0, %v6110_v6  ;;  %1187 = vst.msk [vmem:[#allocation2 + $0xac] sm:$0xf] %vm1142_vm1, %v6489_v18  ;;  %1189 = vst.msk [vmem:[#allocation2 + $0xb4] sm:$0xf] %vm1142_vm1, %v6489_v18  ;;  %v2225_v29 = vrot.slane %v2223_v21, 4  ;;  %v1773_v32 = vrot.slane %v1771_v22, 4 }
  0x25   : > { %1190 = vst.msk [vmem:[#allocation2 + $0xb8] sm:$0xf] %vm1142_vm1, %v6489_v18  ;;  %1192 = vst.msk [vmem:[#allocation2 + $0xc0] sm:$0xf] %vm1142_vm1, %v6489_v18  ;;  %v1776_v33 = vrot.slane %v1774_v23, 5  ;;  %v1782_v34 = vrot.slane %v1780_v24, 5 }
  0x26   : > { %1193 = vst.msk [vmem:[#allocation2 + $0xc4] sm:$0xf] %vm1142_vm1, %v6489_v18  ;;  %1195 = vst.msk [vmem:[#allocation2 + $0xcc] sm:$0xf] %vm1142_vm1, %v6489_v18  ;;  %v1786_v37 = vrot.slane %v1784_v27, 4 }
  0x27   : > { %1196 = vst.msk [vmem:[#allocation2 + $0xd0] sm:$0xf] %vm1142_vm1, %v6489_v18  ;;  %vm6736_vm5 = vmor %vm2218_vm3, %vm2219_vm4  ;;  %v1777_v39 = vor.u32 %v1776_v33, %v1773_v32  ;;  %vm1768_vm7 = vsmask.f32 7440  ;;  %v6757_v49 = vld [vmem:[%s9300_s2] ss:$0 sm:$0xff] }
  0x28   : > { %1152 = vst.msk [vmem:[#allocation2 + $0x20] sm:$0x1] %vm1145_vm2, %v6489_v18  ;;  %1146 = vst.msk [vmem:[#allocation2 + $0x8] sm:$0x1] %vm1145_vm2, %v6489_v18  ;;  %v2224_v36 = vsel %vm6736_vm5, %v5603_v28, %v2223_v21  ;;  %v1787_v41 = vor.u32 %v1786_v37, %v1782_v34  ;;  %v6762_v51 = vld [vmem:[%s9301_s3] ss:$0 sm:$0xff] }
  0x29   : > { %1149 = vst.msk [vmem:[#allocation2 + $0x14] sm:$0x1] %vm1145_vm2, %v6489_v18  ;;  %1155 = vst.msk [vmem:[#allocation2 + $0x2c] sm:$0x1] %vm1145_vm2, %v6489_v18  ;;  %v1778_v43 = vrot.slane %v1777_v39, 4  ;;  %vm4401_vm3 = vcmask 654336  }
  0x2a   : > { %1158 = vst.msk [vmem:[#allocation2 + $0x38] sm:$0x1] %vm1145_vm2, %v6489_v18  ;;  %1161 = vst.msk [vmem:[#allocation2 + $0x44] sm:$0x1] %vm1145_vm2, %v6489_v18  ;;  %v1788_v45 = vrot.slane %v1787_v41, 4  ;;  %vm4434_vm4 = vcmask 785408  }
  0x2b   : > { %5975 = vmatmul.mubr.msk.bf16.gmra.mrb[8].mxu0 %vm486_vm0, %v6111_v7  ;;  %1164 = vst.msk [vmem:[#allocation2 + $0x50] sm:$0x1] %vm1145_vm2, %v6489_v18  ;;  %1167 = vst.msk [vmem:[#allocation2 + $0x5c] sm:$0x1] %vm1145_vm2, %v6489_v18  ;;  %vm1603_vm9 = vsmask.f32 7938 }
  0x2c   : > { %5978 = vmatprep.mubr.msk.bf16.mxu0 %vm486_vm0, %v6112_v8  ;;  %1170 = vst.msk [vmem:[#allocation2 + $0x68] sm:$0x1] %vm1145_vm2, %v6489_v18  ;;  %1173 = vst.msk [vmem:[#allocation2 + $0x74] sm:$0x1] %vm1145_vm2, %v6489_v18  ;;  %vm1278_vm10 = vsmask.f32 256 }
  0x2d   : > { %1176 = vst.msk [vmem:[#allocation2 + $0x80] sm:$0x1] %vm1145_vm2, %v6489_v18  ;;  %1179 = vst.msk [vmem:[#allocation2 + $0x8c] sm:$0x1] %vm1145_vm2, %v6489_v18  ;;  %vm1279_vm11 = vsmask.f32 4368 }
  0x2e   : > { %1182 = vst.msk [vmem:[#allocation2 + $0x98] sm:$0x1] %vm1145_vm2, %v6489_v18  ;;  %1185 = vst.msk [vmem:[#allocation2 + $0xa4] sm:$0x1] %vm1145_vm2, %v6489_v18 }
  0x2f   : > { %1188 = vst.msk [vmem:[#allocation2 + $0xb0] sm:$0x1] %vm1145_vm2, %v6489_v18  ;;  %1191 = vst.msk [vmem:[#allocation2 + $0xbc] sm:$0x1] %vm1145_vm2, %v6489_v18  ;;  %v1751_v25 = vld [vmem:[#allocation2 + $0x8] sm:$0x1] }
  0x30   : > { %1194 = vst.msk [vmem:[#allocation2 + $0xc8] sm:$0x1] %vm1145_vm2, %v6489_v18  ;;  %1197 = vst.msk [vmem:[#allocation2 + $0xd4] sm:$0x1] %vm1145_vm2, %v6489_v18  ;;  %v2226_v31 = vrot.slane %v1751_v25, 5  ;;  %v1790_v35 = vshll.u32 %v1751_v25, 16 }
  0x31   : > { %vm6744_vm8 = vmor %vm1767_vm6, %vm1768_vm7  ;;  %vm4467_vm6 = vcmask 916480  }
  0x32   : > { %v2227_v38 = vsel %vm6736_vm5, %v2225_v29, %v2226_v31  ;;  %v1792_v44 = vrot.slane %v1790_v35, 5  ;;  %v1783_v46 = vsel %vm6744_vm8, %v1778_v43, %v1782_v34  ;;  %vm6873_vm12 = vmand %vm1142_vm1, %vm1603_vm9 }
  0x33   : > { %5979 = vmatmul.mubr.msk.bf16.gmra.mrb[12].mxu0 %vm486_vm0, %v6113_v9  ;;  %v5683_v40 = vcombine.low %v2224_v36, %v2227_v38  ;;  %vm6883_vm13 = vmor %vm1278_vm10, %vm1279_vm11 }
  0x34   : > { %5982 = vmatprep.mubr.msk.bf16.mxu0 %vm486_vm0, %v6114_v10  ;;  %v1793_v47 = vsel %vm6744_vm8, %v1788_v45, %v1792_v44  ;;  %vm6891_vm14 = vmand %vm1145_vm2, %vm1278_vm10  ;;  %vm4368_vm2 = vcmask 523264  }
  0x35   : > { %3742 = vrot.lane.b32.xlu0 %v5683_v40, %s6490_s11  ;;  %v5667_v48 = vcombine.low %v1783_v46, %v1793_v47 }
  0x39   : > { %3662 = vrot.lane.b32.xlu0 %v5667_v48, %s6491_s12 }
  0x3b   : > { %5983 = vmatmul.mubr.msk.bf16.gmra.mrb[16].mxu0 %vm486_vm0, %v6115_v11 }
  0x3c   : > { %5986 = vmatprep.mubr.msk.bf16.mxu0 %vm486_vm0, %v6116_v12 }
  0x43   : > { %5987 = vmatmul.mubr.msk.bf16.gmra.mrb[20].mxu0 %vm486_vm0, %v6117_v13 }
  0x44   : > { %5990 = vmatprep.mubr.msk.bf16.mxu0 %vm486_vm0, %v6118_v14 }
  0x4b   : > { %5991 = vmatmul.mubr.msk.bf16.gmra.mrb[24].mxu0 %vm486_vm0, %v6119_v15 }
  0x4c   : > { %5994 = vmatprep.mubr.msk.bf16.mxu0 %vm486_vm0, %v6120_v16 }
  0x53   : > { %5995 = vmatmul.mubr.msk.bf16.gmra.mrb[28].mxu0 %vm486_vm0, %v6121_v17 }
  0xee   : > { %v5968_v50 = vpop.f32.mrb[0].mxu0 }
  0xef   : > { %v705_v52 = vmul.f32 %v5968_v50, %v6757_v49  ;;  %v569_v53 = vpop.f32.mrb[1].mxu0 }
  0xf0   : > { %v703_v54 = vmul.f32 %v6757_v49, %v569_v53  ;;  %v5969_v55 = vpop.f32.mrb[2].mxu0 }
  0xf1   : > { %v6767_v56 = vadd.f32 %v6762_v51, %v705_v52  ;;  %v706_v57 = vmul.f32 %v5969_v55, %v6757_v49  ;;  %v572_v58 = vpop.f32.mrb[3].mxu0 }
  0xf2   : > { %v6771_v59 = vadd.f32 %v6762_v51, %v703_v54  ;;  %v704_v60 = vmul.f32 %v6757_v49, %v572_v58 }
  0xf3   : > { %v5509_v61 = vmul.f32 -1.442695, %v6767_v56  ;;  %v6776_v62 = vadd.f32 %v6762_v51, %v706_v57 }
  0xf4   : > { %v5507_v63 = vmul.f32 -1.442695, %v6771_v59  ;;  %v6780_v0 = vadd.f32 %v6762_v51, %v704_v60 }
  0xf5   : > { %6172 = vpow2.f32 %v5509_v61  ;;  %v5510_v1 = vmul.f32 -1.442695, %v6776_v62 }
  0xf6   : > { %6174 = vpow2.f32 %v5507_v63  ;;  %v5508_v2 = vmul.f32 -1.442695, %v6780_v0  ;;  %v5972_v3 = vpop.f32.mrb[4].mxu0 }
  0xf7   : > { %6176 = vpow2.f32 %v5510_v1  ;;  %v709_v4 = vmul.f32 %v5972_v3, %v6757_v49  ;;  %v585_v5 = vpop.f32.mrb[5].mxu0 }
  0xf8   : > { %6178 = vpow2.f32 %v5508_v2  ;;  %v707_v6 = vmul.f32 %v6757_v49, %v585_v5  ;;  %v5973_v7 = vpop.f32.mrb[6].mxu0 }
  0xf9   : > { %v6787_v8 = vadd.f32 %v6762_v51, %v709_v4  ;;  %v710_v9 = vmul.f32 %v5973_v7, %v6757_v49  ;;  %v588_v10 = vpop.f32.mrb[7].mxu0 }
  0xfa   : > { %v6791_v11 = vadd.f32 %v6762_v51, %v707_v6  ;;  %v708_v12 = vmul.f32 %v6757_v49, %v588_v10 }
  0xfb   : > { %v5513_v13 = vmul.f32 -1.442695, %v6787_v8  ;;  %v6796_v14 = vadd.f32 %v6762_v51, %v710_v9 }
  0xfc   : > { %v5511_v15 = vmul.f32 -1.442695, %v6791_v11  ;;  %v6800_v16 = vadd.f32 %v6762_v51, %v708_v12 }
  0xfd   : > { %6180 = vpow2.f32 %v5513_v13  ;;  %v5514_v17 = vmul.f32 -1.442695, %v6796_v14 }
  0xfe   : > { %6182 = vpow2.f32 %v5511_v15  ;;  %v5512_v19 = vmul.f32 -1.442695, %v6800_v16  ;;  %v5976_v20 = vpop.f32.mrb[8].mxu0 }
  0xff   : > { %v6173_v21 = vpop.eup %6172  ;;  %6184 = vpow2.f32 %v5514_v17  ;;  %v713_v22 = vmul.f32 %v5976_v20, %v6757_v49  ;;  %v601_v23 = vpop.f32.mrb[9].mxu0 }
 0x100   : > { %v6175_v24 = vpop.eup %6174  ;;  %v872_v25 = vadd.f32 1.0, %v6173_v21  ;;  %6186 = vpow2.f32 %v5512_v19  ;;  %v711_v26 = vmul.f32 %v6757_v49, %v601_v23  ;;  %v5977_v27 = vpop.f32.mrb[10].mxu0 }
 0x101   : > { %v6177_v28 = vpop.eup %6176  ;;  %v870_v29 = vadd.f32 1.0, %v6175_v24  ;;  %v6807_v31 = vadd.f32 %v6762_v51, %v713_v22  ;;  %v714_v32 = vmul.f32 %v5977_v27, %v6757_v49  ;;  %v604_v33 = vpop.f32.mrb[11].mxu0 }
 0x102   : > { %v6179_v34 = vpop.eup %6178  ;;  %6188 = vrcp.f32 %v872_v25  ;;  %v873_v35 = vadd.f32 1.0, %v6177_v28  ;;  %v6811_v36 = vadd.f32 %v6762_v51, %v711_v26  ;;  %v712_v37 = vmul.f32 %v6757_v49, %v604_v33 }
 0x103   : > { %6190 = vrcp.f32 %v870_v29  ;;  %v871_v38 = vadd.f32 1.0, %v6179_v34  ;;  %v5517_v39 = vmul.f32 -1.442695, %v6807_v31  ;;  %v6816_v40 = vadd.f32 %v6762_v51, %v714_v32 }
 0x104   : > { %6192 = vrcp.f32 %v873_v35  ;;  %v5515_v41 = vmul.f32 -1.442695, %v6811_v36  ;;  %v6820_v43 = vadd.f32 %v6762_v51, %v712_v37 }
 0x105   : > { %6194 = vrcp.f32 %v871_v38  ;;  %v5518_v44 = vmul.f32 -1.442695, %v6816_v40 }
 0x106   : > { %6196 = vpow2.f32 %v5517_v39  ;;  %v5516_v45 = vmul.f32 -1.442695, %v6820_v43  ;;  %v5980_v46 = vpop.f32.mrb[12].mxu0 }
 0x107   : > { %v6181_v47 = vpop.eup %6180  ;;  %6198 = vpow2.f32 %v5515_v41  ;;  %v717_v48 = vmul.f32 %v5980_v46, %v6757_v49  ;;  %v617_v50 = vpop.f32.mrb[13].mxu0 }
 0x108   : > { %v6183_v52 = vpop.eup %6182  ;;  %v876_v53 = vadd.f32 1.0, %v6181_v47  ;;  %6200 = vpow2.f32 %v5518_v44  ;;  %v715_v54 = vmul.f32 %v6757_v49, %v617_v50  ;;  %v5981_v55 = vpop.f32.mrb[14].mxu0 }
 0x109   : > { %v6185_v57 = vpop.eup %6184  ;;  %v874_v58 = vadd.f32 1.0, %v6183_v52  ;;  %6202 = vpow2.f32 %v5516_v45  ;;  %v6827_v60 = vadd.f32 %v6762_v51, %v717_v48  ;;  %v718_v61 = vmul.f32 %v5981_v55, %v6757_v49  ;;  %v620_v63 = vpop.f32.mrb[15].mxu0 }
 0x10a   : > { %v6187_v1 = vpop.eup %6186  ;;  %6204 = vrcp.f32 %v876_v53  ;;  %v877_v2 = vadd.f32 1.0, %v6185_v57  ;;  %v6831_v3 = vadd.f32 %v6762_v51, %v715_v54  ;;  %v716_v4 = vmul.f32 %v6757_v49, %v620_v63 }
 0x10b   : > { %6206 = vrcp.f32 %v874_v58  ;;  %v875_v5 = vadd.f32 1.0, %v6187_v1  ;;  %v5521_v6 = vmul.f32 -1.442695, %v6827_v60  ;;  %v6836_v7 = vadd.f32 %v6762_v51, %v718_v61 }
 0x10c   : > { %v6189_v9 = vpop.eup %6188  ;;  %v5519_v10 = vmul.f32 -1.442695, %v6831_v3  ;;  %v6840_v12 = vadd.f32 %v6762_v51, %v716_v4  ;;  %6208 = vrcp.f32 %v877_v2 }
 0x10d   : > { %v6191_v13 = vpop.eup %6190  ;;  %v968_v15 = vmul.f32 %v6189_v9, %v6767_v56  ;;  %v5522_v17 = vmul.f32 -1.442695, %v6836_v7  ;;  %6210 = vrcp.f32 %v875_v5 }
 0x10e   : > { %v6193_v19 = vpop.eup %6192  ;;  %v966_v20 = vmul.f32 %v6191_v13, %v6771_v59  ;;  %v5520_v21 = vmul.f32 -1.442695, %v6840_v12  ;;  %v5984_v22 = vpop.f32.mrb[16].mxu0  ;;  %6212 = vpow2.f32 %v5521_v6 }
 0x10f   : > { %v6195_v23 = vpop.eup %6194  ;;  %v1000_v24 = vmul.f32 19.367046, %v968_v15  ;;  %v969_v25 = vmul.f32 %v6193_v19, %v6776_v62  ;;  %v6847_v26 = vpop.f32.mrb[17].mxu0  ;;  %6214 = vpow2.f32 %v5519_v10  ;;  %v6851_v59 = vmul.f32 %v5984_v22, %v6757_v49 }
 0x110   : > { %v6197_v27 = vpop.eup %6196  ;;  %v998_v56 = vmul.f32 19.367046, %v966_v20  ;;  %v967_v28 = vmul.f32 %v6195_v23, %v6780_v0  ;;  %v6853_v29 = vpop.f32.mrb[18].mxu0  ;;  %6216 = vpow2.f32 %v5522_v17 }
 0x111   : > { %v6199_v32 = vpop.eup %6198  ;;  %v6008_v33 = vround.rtne.f32 %v1000_v24  ;;  %v1001_v34 = vmul.f32 19.367046, %v969_v25  ;;  %v880_v35 = vadd.f32 1.0, %v6197_v27  ;;  %v6855_v62 = vpop.f32.mrb[19].mxu0  ;;  %6218 = vpow2.f32 %v5520_v21 }
 0x112   : > { %v6201_v37 = vpop.eup %6200  ;;  %v6006_v38 = vround.rtne.f32 %v998_v56  ;;  %v999_v39 = vmul.f32 19.367046, %v967_v28  ;;  %v878_v41 = vadd.f32 1.0, %v6199_v32  ;;  %v1614_v56 = vld [vmem:[#allocation2 + $0x18] sm:$0xf] }
 0x113   : > { %v6203_v44 = vpop.eup %6202  ;;  %v5541_v0 = vclamps-f32 %v6008_v33, 127.0  ;;  %v6009_v45 = vround.rtne.f32 %v1001_v34  ;;  %6220 = vrcp.f32 %v880_v35  ;;  %v881_v46 = vadd.f32 1.0, %v6201_v37 }
 0x114   : > { %v6205_v47 = vpop.eup %6204  ;;  %v5539_v48 = vclamps-f32 %v6006_v38, 127.0  ;;  %v6007_v50 = vround.rtne.f32 %v999_v39  ;;  %6222 = vrcp.f32 %v878_v41  ;;  %v879_v52 = vadd.f32 1.0, %v6203_v44  ;;  %v1605_v41 = vld [vmem:[#allocation2 + $0xc] sm:$0xf] }
 0x115   : > { %v6207_v53 = vpop.eup %6206  ;;  %v5895_v54 = vpack.c.bf16 %v5541_v0, %v5541_v0  ;;  %v5542_v55 = vclamps-f32 %v6009_v45, 127.0  ;;  %v972_v57 = vmul.f32 %v6205_v47, %v6787_v8  ;;  %6224 = vrcp.f32 %v881_v46 }
 0x116   : > { %v5893_v58 = vpack.c.bf16 %v5539_v48, %v5539_v48  ;;  %v5540_v61 = vclamps-f32 %v6007_v50, 127.0  ;;  %v970_v63 = vmul.f32 %v6207_v53, %v6791_v11  ;;  %6226 = vrcp.f32 %v879_v52  ;;  %v6859_v1 = vpop.f32.mrb[20].mxu0  ;;  %v6861_v2 = vpop.eup %6208  ;;  %v1618_v52 = vld [vmem:[#allocation2 + $0x20] sm:$0x1] }
 0x117   : > { %v1299_v4 = vshrl.u32 %v5895_v54, 16  ;;  %v1302_v5 = vshll.u32 %v5895_v54, 16  ;;  %v5896_v6 = vpack.c.bf16 %v5542_v55, %v5542_v55  ;;  %v1004_v9 = vmul.f32 19.367046, %v972_v57  ;;  %v6863_v10 = vpop.f32.mrb[21].mxu0  ;;  %v6211_v13 = vpop.eup %6210 }
 0x118   : > { %v1282_v15 = vshrl.u32 %v5893_v58, 16  ;;  %v1285_v17 = vshll.u32 %v5893_v58, 16  ;;  %v5894_v8 = vpack.c.bf16 %v5540_v61, %v5540_v61  ;;  %v1002_v19 = vmul.f32 19.367046, %v970_v63  ;;  %v6865_v20 = vpop.f32.mrb[22].mxu0  ;;  %v6867_v21 = vpop.eup %6212 }
 0x119   : > { %v1301_v11 = vrot.slane %v1299_v4, 7  ;;  %v1307_v22 = vshrl.u32 %v5896_v6, 16  ;;  %v1310_v23 = vshll.u32 %v5896_v6, 16  ;;  %v6012_v24 = vround.rtne.f32 %v1004_v9  ;;  %v6869_v25 = vpop.eup %6214  ;;  %v6877_v35 = vpop.f32.mrb[23].mxu0  ;;  %v1611_v63 = vld [vmem:[#allocation2 + $0x14] sm:$0x1] }
 0x11a   : > { %v1284_v28 = vrot.slane %v1282_v15, 7  ;;  %v1290_v32 = vshrl.u32 %v5894_v8, 16  ;;  %v1293_v33 = vshll.u32 %v5894_v8, 16  ;;  %v6010_v34 = vround.rtne.f32 %v1002_v19  ;;  %v6879_v37 = vpop.eup %6216 }
 0x11b   : > { %v1304_v38 = vor.u32 %v1302_v5, %v1301_v11  ;;  %v1305_v39 = vrot.slane %v1301_v11, 4  ;;  %v1309_v0 = vrot.slane %v1307_v22, 7  ;;  %v5545_v45 = vclamps-f32 %v6012_v24, 127.0  ;;  %v6887_v46 = vpop.eup %6218 }
 0x11c   : > { %v1287_v47 = vor.u32 %v1285_v17, %v1284_v28  ;;  %v1288_v48 = vrot.slane %v1284_v28, 4  ;;  %v1292_v53 = vrot.slane %v1290_v32, 7  ;;  %v5543_v54 = vclamps-f32 %v6010_v34, 127.0 }
 0x11d   : > { %v6221_v55 = vpop.eup %6220  ;;  %v1615_v57 = vsel %vm6873_vm12, %v1304_v38, %v1614_v56  ;;  %v1312_v58 = vor.u32 %v1310_v23, %v1309_v0  ;;  %v1314_v61 = vrot.slane %v1309_v0, 4  ;;  %v5899_v4 = vpack.c.bf16 %v5545_v45, %v5545_v45  ;;  %v1628_v0 = vld [vmem:[#allocation2 + $0x30] sm:$0xf] }
 0x11e   : > { %v6223_v5 = vpop.eup %6222  ;;  %1616 = vst [vmem:[#allocation2 + $0x18] sm:$0xf] %v1615_v57  ;;  %v1606_v6 = vsel %vm6873_vm12, %v1287_v47, %v1605_v41  ;;  %v1295_v9 = vor.u32 %v1293_v33, %v1292_v53  ;;  %v1297_v15 = vrot.slane %v1292_v53, 4  ;;  %v5897_v17 = vpack.c.bf16 %v5543_v54, %v5543_v54  ;;  %v1621_v47 = vld [vmem:[#allocation2 + $0x24] sm:$0xf] }
 0x11f   : > { %v6225_v8 = vpop.eup %6224  ;;  %1607 = vst [vmem:[#allocation2 + $0xc] sm:$0xf] %v1606_v6  ;;  %v1313_v19 = vsel %vm6883_vm13, %v1305_v39, %v1312_v58  ;;  %v1619_v11 = vsel %vm6891_vm14, %v1314_v61, %v1618_v52  ;;  %v1333_v22 = vshrl.u32 %v5899_v4, 16  ;;  %v1336_v23 = vshll.u32 %v5899_v4, 16 }
 0x120   : > { %v6227_v24 = vpop.eup %6226  ;;  %1617 = vst.msk [vmem:[#allocation2 + $0x1c] sm:$0xf] %vm1142_vm1, %v1313_v19  ;;  %1620 = vst [vmem:[#allocation2 + $0x20] sm:$0x1] %v1619_v11  ;;  %v1296_v56 = vsel %vm6883_vm13, %v1288_v48, %v1295_v9  ;;  %v1612_v28 = vsel %vm6891_vm14, %v1297_v15, %v1611_v63  ;;  %v1316_v32 = vshrl.u32 %v5897_v17, 16  ;;  %v1319_v33 = vshll.u32 %v5897_v17, 16 }
 0x121   : > { %1608 = vst.msk [vmem:[#allocation2 + $0x10] sm:$0xf] %vm1142_vm1, %v1296_v56  ;;  %1613 = vst [vmem:[#allocation2 + $0x14] sm:$0x1] %v1612_v28  ;;  %v6909_v34 = vrot.slane %v1333_v22, 7  ;;  %v973_v38 = vmul.f32 %v6861_v2, %v6796_v14  ;;  %v971_v39 = vmul.f32 %v6211_v13, %v6800_v16  ;;  %v976_v41 = vmul.f32 %v6221_v55, %v6807_v31 }
 0x122   : > { %v6915_v45 = vrot.slane %v1316_v32, 7  ;;  %v974_v48 = vmul.f32 %v6223_v5, %v6811_v36  ;;  %v977_v52 = vmul.f32 %v6225_v8, %v6816_v40  ;;  %v975_v53 = vmul.f32 %v6227_v24, %v6820_v43 }
 0x123   : > { %v1338_v54 = vor.u32 %v1336_v23, %v6909_v34  ;;  %v1339_v57 = vrot.slane %v6909_v34, 4  ;;  %v1005_v58 = vmul.f32 19.367046, %v973_v38  ;;  %v1003_v14 = vmul.f32 19.367046, %v971_v39 }
 0x124   : > { %v1321_v16 = vor.u32 %v1319_v33, %v6915_v45  ;;  %v1322_v31 = vrot.slane %v6915_v45, 4  ;;  %v1008_v2 = vmul.f32 19.367046, %v976_v41  ;;  %v1006_v13 = vmul.f32 19.367046, %v974_v48 }
 0x125   : > { %v1629_v55 = vsel %vm6873_vm12, %v1338_v54, %v1628_v0  ;;  %v6013_v36 = vround.rtne.f32 %v1005_v58  ;;  %v6011_v61 = vround.rtne.f32 %v1003_v14  ;;  %v1009_v40 = vmul.f32 19.367046, %v977_v52  ;;  %v1625_v14 = vld [vmem:[#allocation2 + $0x2c] sm:$0x1] }
 0x126   : > { %1630 = vst [vmem:[#allocation2 + $0x30] sm:$0xf] %v1629_v55  ;;  %v1622_v43 = vsel %vm6873_vm12, %v1321_v16, %v1621_v47  ;;  %v6016_v63 = vround.rtne.f32 %v1008_v2  ;;  %v6014_v4 = vround.rtne.f32 %v1006_v13  ;;  %v1007_v5 = vmul.f32 19.367046, %v975_v53  ;;  %v1632_v53 = vld [vmem:[#allocation2 + $0x38] sm:$0x1] }
 0x127   : > { %1623 = vst [vmem:[#allocation2 + $0x24] sm:$0xf] %v1622_v43  ;;  %v5546_v6 = vclamps-f32 %v6013_v36, 127.0  ;;  %v5544_v9 = vclamps-f32 %v6011_v61, 127.0  ;;  %v6017_v15 = vround.rtne.f32 %v1009_v40  ;;  %v884_v17 = vadd.f32 1.0, %v6867_v21 }
 0x128   : > { %v5549_v8 = vclamps-f32 %v6016_v63, 127.0  ;;  %v5547_v19 = vclamps-f32 %v6014_v4, 127.0  ;;  %v6015_v11 = vround.rtne.f32 %v1007_v5  ;;  %v882_v22 = vadd.f32 1.0, %v6869_v25  ;;  %v1642_v63 = vld [vmem:[#allocation2 + $0x48] sm:$0xf] }
 0x129   : > { %v5900_v23 = vpack.c.bf16 %v5546_v6, %v5546_v6  ;;  %v5898_v24 = vpack.c.bf16 %v5544_v9, %v5544_v9  ;;  %v5550_v56 = vclamps-f32 %v6017_v15, 127.0  ;;  %6228 = vrcp.f32 %v884_v17  ;;  %v1635_v4 = vld [vmem:[#allocation2 + $0x3c] sm:$0xf]  ;;  %v2942_v17 = vld [vmem:[#allocation2 + $0x18] sm:$0xf] }
 0x12a   : > { %v5903_v28 = vpack.c.bf16 %v5549_v8, %v5549_v8  ;;  %v5901_v32 = vpack.c.bf16 %v5547_v19, %v5547_v19  ;;  %v5548_v33 = vclamps-f32 %v6015_v11, 127.0  ;;  %6230 = vrcp.f32 %v882_v22 }
 0x12b   : > { %v1341_v38 = vshrl.u32 %v5900_v23, 16  ;;  %v1344_v39 = vshll.u32 %v5900_v23, 16  ;;  %v1324_v41 = vshrl.u32 %v5898_v24, 16  ;;  %v1327_v0 = vshll.u32 %v5898_v24, 16  ;;  %v6952_v23 = vld [vmem:[#allocation2 + $0x1c] sm:$0xf] }
 0x12c   : > { %v1367_v45 = vshrl.u32 %v5903_v28, 16  ;;  %v1370_v47 = vshll.u32 %v5903_v28, 16  ;;  %v1350_v21 = vshrl.u32 %v5901_v32, 16  ;;  %v1353_v48 = vshll.u32 %v5901_v32, 16  ;;  %v6954_v32 = vpop.f32.mrb[24].mxu0 }
 0x12d   : > { %v1343_v52 = vrot.slane %v1341_v38, 7  ;;  %v1326_v54 = vrot.slane %v1324_v41, 7  ;;  %v5904_v25 = vpack.c.bf16 %v5550_v56, %v5550_v56  ;;  %v5902_v58 = vpack.c.bf16 %v5548_v33, %v5548_v33 }
 0x12e   : > { %v1369_v16 = vrot.slane %v1367_v45, 7  ;;  %v6930_v2 = vrot.slane %v1350_v21, 7  ;;  %v885_v13 = vadd.f32 1.0, %v6879_v37  ;;  %v883_v55 = vadd.f32 1.0, %v6887_v46 }
 0x12f   : > { %v1346_v36 = vor.u32 %v1344_v39, %v1343_v52  ;;  %v1348_v61 = vrot.slane %v1343_v52, 4  ;;  %v1329_v40 = vor.u32 %v1327_v0, %v1326_v54  ;;  %v1331_v43 = vrot.slane %v1326_v54, 4  ;;  %v1646_v0 = vld [vmem:[#allocation2 + $0x50] sm:$0x1]  ;;  %v1639_v54 = vld [vmem:[#allocation2 + $0x44] sm:$0x1] }
 0x130   : > { %v1372_v5 = vor.u32 %v1370_v47, %v1369_v16  ;;  %v1373_v6 = vrot.slane %v1369_v16, 4  ;;  %v1355_v9 = vor.u32 %v1353_v48, %v6930_v2  ;;  %v1356_v15 = vrot.slane %v6930_v2, 4 }
 0x131   : > { %v1347_v37 = vsel %vm6883_vm13, %v1339_v57, %v1346_v36  ;;  %v1633_v46 = vsel %vm6891_vm14, %v1348_v61, %v1632_v53  ;;  %v1330_v8 = vsel %vm6883_vm13, %v1322_v31, %v1329_v40  ;;  %v1626_v19 = vsel %vm6891_vm14, %v1331_v43, %v1625_v14  ;;  %v6968_v61 = vld [vmem:[#allocation2 + $0x1c] sm:$0xf] }
 0x132   : > { %1631 = vst.msk [vmem:[#allocation2 + $0x34] sm:$0xf] %vm1142_vm1, %v1347_v37  ;;  %1634 = vst [vmem:[#allocation2 + $0x38] sm:$0x1] %v1633_v46  ;;  %v1643_v34 = vsel %vm6873_vm12, %v1372_v5, %v1642_v63  ;;  %v1636_v57 = vsel %vm6873_vm12, %v1355_v9, %v1635_v4  ;;  %v1375_v11 = vshrl.u32 %v5904_v25, 16  ;;  %v1378_v22 = vshll.u32 %v5904_v25, 16 }
 0x133   : > { %1624 = vst.msk [vmem:[#allocation2 + $0x28] sm:$0xf] %vm1142_vm1, %v1330_v8  ;;  %1627 = vst [vmem:[#allocation2 + $0x2c] sm:$0x1] %v1626_v19  ;;  %v6229_v31 = vpop.eup %6228  ;;  %v1358_v24 = vshrl.u32 %v5902_v58, 16  ;;  %v1361_v56 = vshll.u32 %v5902_v58, 16  ;;  %6232 = vrcp.f32 %v885_v13  ;;  %v5747_v48 = vcombine.low %v2942_v17, %v6952_v23 }
 0x134   : > { %1644 = vst [vmem:[#allocation2 + $0x48] sm:$0xf] %v1643_v34  ;;  %1637 = vst [vmem:[#allocation2 + $0x3c] sm:$0xf] %v1636_v57  ;;  %v2991_v28 = vshrl.u32 %v2942_v17, 16  ;;  %v6231_v33 = vpop.eup %6230  ;;  %v1377_v38 = vrot.slane %v1375_v11, 7  ;;  %v980_v39 = vmul.f32 %v6229_v31, %v6827_v60  ;;  %6234 = vrcp.f32 %v883_v55 }
 0x135   : > { %v2994_v41 = vshll.u32 %v2942_v17, 16  ;;  %v1360_v45 = vrot.slane %v1358_v24, 7  ;;  %v978_v47 = vmul.f32 %v6231_v33, %v6831_v3  ;;  %4094 = vrot.lane.b32.xlu1 %v5747_v48, %s6492_s23  ;;  %v6962_v60 = vadd.f32 %v6762_v51, %v6851_v59  ;;  %v6976_v4 = vld [vmem:[#allocation2 + $0x18] sm:$0xf]  ;;  %v6990_v31 = vld [vmem:[#allocation2 + $0x20] sm:$0x1] }
 0x136   : > { %v2993_v21 = vrot.slane %v2991_v28, 4  ;;  %v1380_v52 = vor.u32 %v1378_v22, %v1377_v38  ;;  %v1382_v53 = vrot.slane %v1377_v38, 4  ;;  %v1012_v25 = vmul.f32 19.367046, %v980_v39  ;;  %v3374_v19 = vld [vmem:[#allocation2 + $0x18] sm:$0xe] }
 0x137   : > { %v2996_v58 = vrot.slane %v2994_v41, 5  ;;  %v1363_v14 = vor.u32 %v1361_v56, %v1360_v45  ;;  %v1365_v16 = vrot.slane %v1360_v45, 4  ;;  %v1010_v2 = vmul.f32 19.367046, %v978_v47  ;;  %v6994_v38 = vld [vmem:[#allocation2 + $0x10] sm:$0xf] }
 0x138   : > { %v1381_v3 = vsel %vm6883_vm13, %v1373_v6, %v1380_v52  ;;  %v1647_v13 = vsel %vm6891_vm14, %v1382_v53, %v1646_v0  ;;  %v6020_v55 = vround.rtne.f32 %v1012_v25  ;;  %v3000_v6 = vshll.u32 %v6952_v23, 16  ;;  %v1656_v39 = vld [vmem:[#allocation2 + $0x60] sm:$0xf] }
 0x139   : > { %v2997_v36 = vor.u32 %v2996_v58, %v2993_v21  ;;  %1645 = vst.msk [vmem:[#allocation2 + $0x4c] sm:$0xf] %vm1142_vm1, %v1381_v3  ;;  %1648 = vst [vmem:[#allocation2 + $0x50] sm:$0x1] %v1647_v13  ;;  %v1364_v40 = vsel %vm6883_vm13, %v1356_v15, %v1363_v14  ;;  %v1640_v59 = vsel %vm6891_vm14, %v1365_v16, %v1639_v54  ;;  %v6018_v43 = vround.rtne.f32 %v1010_v2  ;;  %v2765_v21 = vld [vmem:[#allocation2 + $0xc] sm:$0xe] }
 0x13a   : > { %1638 = vst.msk [vmem:[#allocation2 + $0x40] sm:$0xf] %vm1142_vm1, %v1364_v40  ;;  %1641 = vst [vmem:[#allocation2 + $0x44] sm:$0x1] %v1640_v59  ;;  %v5553_v63 = vclamps-f32 %v6020_v55, 127.0  ;;  %v5700_v9 = vcombine.low %v6976_v4, %v6968_v61  ;;  %v719_v15 = vmul.f32 %v6757_v49, %v6847_v26  ;;  %v3004_v46 = vshrl.u32 %v6952_v23, 16 }
 0x13b   : > { %v5551_v5 = vclamps-f32 %v6018_v43, 127.0  ;;  %v6983_v37 = vrot.slane %v2997_v36, 4  ;;  %v5525_v8 = vmul.f32 -1.442695, %v6962_v60  ;;  %v2406_v11 = vshrl.u32 %v6976_v4, 16 }
 0x13c   : > { %v5907_v17 = vpack.c.bf16 %v5553_v63, %v5553_v63  ;;  %v2409_v22 = vshll.u32 %v6976_v4, 16  ;;  %3840 = vrot.lane.b32.xlu1 %v5700_v9, %s6493_s24  ;;  %v3440_v26 = vrot.slane %v6952_v23, 5  ;;  %v5635_v47 = vrot.slane %v3374_v19, 9  ;;  %v1649_v2 = vld [vmem:[#allocation2 + $0x54] sm:$0xf] }
 0x13d   : > { %v6233_v34 = vpop.eup %6232  ;;  %v5905_v57 = vpack.c.bf16 %v5551_v5, %v5551_v5  ;;  %6236 = vpow2.f32 %v5525_v8  ;;  %v3443_v54 = vrot.slane %v6990_v31, 5  ;;  %v2831_v14 = vrot.slane %v6994_v38, 5  ;;  %v7010_v55 = vld [vmem:[#allocation2 + $0x14] sm:$0x1] }
 0x13e   : > { %v6235_v24 = vpop.eup %6234  ;;  %v1401_v56 = vshrl.u32 %v5907_v17, 16  ;;  %v1404_v28 = vshll.u32 %v5907_v17, 16  ;;  %v981_v33 = vmul.f32 %v6233_v34, %v6836_v7  ;;  %v3442_v53 = vrot.slane %v3440_v26, 4 }
 0x13f   : > { %v1384_v41 = vshrl.u32 %v5905_v57, 16  ;;  %v1387_v0 = vshll.u32 %v5905_v57, 16  ;;  %v979_v45 = vmul.f32 %v6235_v24, %v6840_v12  ;;  %v7002_v7 = vrot.slane %v3004_v46, 4 }
 0x140   : > { %v6997_v48 = vrot.slane %v1401_v56, 7  ;;  %v1013_v52 = vmul.f32 19.367046, %v981_v33  ;;  %v3441_v12 = vsel %vm6736_vm5, %v5635_v47, %v3440_v26  ;;  %v3444_v13 = vsel %vm6736_vm5, %v3442_v53, %v3443_v54 }
 0x141   : > { %v7000_v25 = vrot.slane %v1384_v41, 7  ;;  %v1011_v58 = vmul.f32 19.367046, %v979_v45  ;;  %v2419_v59 = vshrl.u32 %v6968_v61, 16  ;;  %v5779_v43 = vcombine.low %v3441_v12, %v3444_v13  ;;  %v1660_v13 = vld [vmem:[#allocation2 + $0x68] sm:$0x1] }
 0x142   : > { %v1406_v16 = vor.u32 %v1404_v28, %v6997_v48  ;;  %v6021_v3 = vround.rtne.f32 %v1013_v52  ;;  %v5619_v9 = vrot.slane %v2765_v21, 9  ;;  %v2833_v17 = vrot.slane %v2831_v14, 4  ;;  %v7029_v28 = vld [vmem:[#allocation2 + $0xc] sm:$0xf]  ;;  %v7039_v52 = vld [vmem:[#allocation2 + $0x10] sm:$0xf] }
 0x143   : > { %v1389_v36 = vor.u32 %v1387_v0, %v7000_v25  ;;  %v6019_v40 = vround.rtne.f32 %v1011_v58  ;;  %5804 = vmatprep.mubr.msk.bf16.mxu1 %vm4254_vm15, %v5779_v43  ;;  %v2834_v19 = vrot.slane %v7010_v55, 5  ;;  %v7021_v34 = vadd.f32 %v6762_v51, %v719_v15  ;;  %v2155_v58 = vld [vmem:[#allocation2 + $0xc] sm:$0xe]  ;;  %v7049_v43 = vld [vmem:[#allocation2 + $0x14] sm:$0x1] }
 0x144   : > { %v1657_v63 = vsel %vm6873_vm12, %v1406_v16, %v1656_v39  ;;  %v5554_v5 = vclamps-f32 %v6021_v3, 127.0  ;;  %v7023_v26 = vrot.slane %v2406_v11, 4  ;;  %v2832_v24 = vsel %vm6736_vm5, %v5619_v9, %v2831_v14 }
 0x145   : > { %1658 = vst [vmem:[#allocation2 + $0x60] sm:$0xf] %v1657_v63  ;;  %v1650_v46 = vsel %vm6873_vm12, %v1389_v36, %v1649_v2  ;;  %v5552_v8 = vclamps-f32 %v6019_v40, 127.0  ;;  %v722_v56 = vmul.f32 %v6853_v29, %v6757_v49  ;;  %v2835_v39 = vsel %vm6736_vm5, %v2833_v17, %v2834_v19 }
 0x146   : > { %1651 = vst [vmem:[#allocation2 + $0x54] sm:$0xf] %v1650_v46  ;;  %v5908_v57 = vpack.c.bf16 %v5554_v5, %v5554_v5  ;;  %v5523_v41 = vmul.f32 -1.442695, %v7021_v34  ;;  %v5699_v15 = vcombine.low %v7029_v28, %v6994_v38  ;;  %v5731_v47 = vcombine.low %v2832_v24, %v2835_v39  ;;  %v1653_v5 = vld [vmem:[#allocation2 + $0x5c] sm:$0x1] }
 0x147   : > { %v5906_v33 = vpack.c.bf16 %v5552_v8, %v5552_v8  ;;  %v6237_v0 = vpop.eup %6236  ;;  %v7037_v21 = vadd.f32 %v6762_v51, %v722_v56  ;;  %v1407_v14 = vrot.slane %v6997_v48, 4  ;;  %v3010_v2 = vshll.u32 %v6990_v31, 16  ;;  %v2766_v24 = vld [vmem:[#allocation2 + $0x18] sm:$0xe] }
 0x148   : > { %v1409_v11 = vshrl.u32 %v5908_v57, 16  ;;  %v1412_v45 = vshll.u32 %v5908_v57, 16  ;;  %v888_v54 = vadd.f32 1.0, %v6237_v0  ;;  %6238 = vpow2.f32 %v5523_v41  ;;  %3838 = vrot.lane.b32.xlu1 %v5699_v15, %s6493_s24  ;;  %3998 = vrot.lane.b32.xlu0 %v5731_v47, %s6494_s25  ;;  %v7060_v57 = vld [vmem:[#allocation2 + $0x20] sm:$0x1] }
 0x149   : > { %v1392_v29 = vshrl.u32 %v5906_v33, 16  ;;  %v1395_v53 = vshll.u32 %v5906_v33, 16  ;;  %v5526_v3 = vmul.f32 -1.442695, %v7037_v21  ;;  %v1390_v12 = vrot.slane %v7000_v25, 4 }
 0x14a   : > { %v1411_v16 = vrot.slane %v1409_v11, 7  ;;  %6240 = vrcp.f32 %v888_v54  ;;  %v720_v40 = vmul.f32 %v6757_v49, %v6855_v62  ;;  %v2230_v31 = vrot.slane %v7039_v52, 5  ;;  %v2156_v41 = vld [vmem:[#allocation2 + $0x18] sm:$0xe]  ;;  %v7078_v47 = vld [vmem:[#allocation2 + $0x1c] sm:$0xf] }
 0x14b   : > { %v1394_v36 = vrot.slane %v1392_v29, 7  ;;  %6242 = vpow2.f32 %v5526_v3  ;;  %v5604_v25 = vrot.slane %v2155_v58, 9  ;;  %v2233_v19 = vrot.slane %v7049_v43, 5 }
 0x14c   : > { %v1414_v63 = vor.u32 %v1412_v45, %v1411_v16  ;;  %v1416_v48 = vrot.slane %v1411_v16, 4  ;;  %v7053_v46 = vadd.f32 %v6762_v51, %v720_v40  ;;  %v2232_v62 = vrot.slane %v2230_v31, 4 }
 0x14d   : > { %v1397_v9 = vor.u32 %v1395_v53, %v1394_v36  ;;  %v1399_v17 = vrot.slane %v1394_v36, 4  ;;  %v2411_v33 = vrot.slane %v2409_v22, 5  ;;  %v2231_v15 = vsel %vm6736_vm5, %v5604_v25, %v2230_v31 }
 0x14e   : > { %v1415_v8 = vsel %vm6883_vm13, %v1407_v14, %v1414_v63  ;;  %v1661_v49 = vsel %vm6891_vm14, %v1416_v48, %v1660_v13  ;;  %v5524_v39 = vmul.f32 -1.442695, %v7053_v46  ;;  %v2234_v0 = vsel %vm6736_vm5, %v2232_v62, %v2233_v19  ;;  %v7082_v14 = vld [vmem:[#allocation2 + $0x20] sm:$0x1] }
 0x14f   : > { %1659 = vst.msk [vmem:[#allocation2 + $0x64] sm:$0xf] %vm1142_vm1, %v1415_v8  ;;  %1662 = vst [vmem:[#allocation2 + $0x68] sm:$0x1] %v1661_v49  ;;  %v1398_v51 = vsel %vm6883_vm13, %v1390_v12, %v1397_v9  ;;  %v1654_v56 = vsel %vm6891_vm14, %v1399_v17, %v1653_v5  ;;  %v2838_v11 = vrot.slane %v6968_v61, 5  ;;  %v3002_v45 = vrot.slane %v3000_v6, 5 }
 0x150   : > { %1652 = vst.msk [vmem:[#allocation2 + $0x58] sm:$0xf] %vm1142_vm1, %v1398_v51  ;;  %1655 = vst [vmem:[#allocation2 + $0x5c] sm:$0x1] %v1654_v56  ;;  %6244 = vpow2.f32 %v5524_v39  ;;  %v5684_v4 = vcombine.low %v2231_v15, %v2234_v0  ;;  %v5620_v22 = vrot.slane %v2766_v24, 9  ;;  %v2841_v29 = vrot.slane %v7060_v57, 5 }
 0x151   : > { %v2840_v53 = vrot.slane %v2838_v11, 4  ;;  %v3007_v54 = vor.u32 %v7002_v7, %v3002_v45  ;;  %v3012_v58 = vrot.slane %v3010_v2, 5  ;;  %v5605_v16 = vrot.slane %v2156_v41, 9  ;;  %v2946_v51 = vld [vmem:[#allocation2 + $0x30] sm:$0xf]  ;;  %v7109_v39 = vpop.f32.mrb[25].mxu0 }
 0x152   : > { %v6239_v3 = vpop.eup %6238  ;;  %3744 = vrot.lane.b32.xlu0 %v5684_v4, %s6490_s11  ;;  %v2839_v23 = vsel %vm6736_vm5, %v5620_v22, %v2838_v11  ;;  %v2237_v6 = vrot.slane %v7078_v47, 5  ;;  %v2412_v12 = vor.u32 %v2411_v33, %v7023_v26  ;;  %v2415_v13 = vshll.u32 %v6968_v61, 16  ;;  %v7112_v11 = vld [vmem:[#allocation2 + $0x34] sm:$0xf] }
 0x153   : > { %v886_v36 = vadd.f32 1.0, %v6239_v3  ;;  %v2842_v7 = vsel %vm6736_vm5, %v2840_v53, %v2841_v29  ;;  %v3008_v2 = vrot.slane %v3007_v54, 4  ;;  %v2421_v40 = vrot.slane %v2419_v59, 4  ;;  %v7115_v29 = vpop.f32.mrb[26].mxu0 }
 0x154   : > { %v6241_v63 = vpop.eup %6240  ;;  %v5732_v48 = vcombine.low %v2839_v23, %v2842_v7  ;;  %v3003_v5 = vsel %vm6744_vm8, %v6983_v37, %v3002_v45  ;;  %v2239_v31 = vrot.slane %v2237_v6, 4  ;;  %v2240_v9 = vrot.slane %v7082_v14, 5  ;;  %v7123_v3 = vpop.f32.mrb[27].mxu0 }
 0x155   : > { %v6243_v26 = vpop.eup %6242  ;;  %v984_v17 = vmul.f32 %v6241_v63, %v6962_v60  ;;  %6246 = vrcp.f32 %v886_v36  ;;  %v3013_v25 = vsel %vm6744_vm8, %v3008_v2, %v3012_v58  ;;  %v2417_v8 = vrot.slane %v2415_v13, 5  ;;  %v7126_v2 = vld [vmem:[#allocation2 + $0x28] sm:$0xf] }
 0x156   : > { %v889_v49 = vadd.f32 1.0, %v6243_v26  ;;  %4000 = vrot.lane.b32.xlu1 %v5732_v48, %s6494_s25  ;;  %v5763_v61 = vcombine.low %v3003_v5, %v3013_v25  ;;  %v2241_v59 = vsel %vm6736_vm5, %v2239_v31, %v2240_v9  ;;  %v2425_v37 = vshll.u32 %v7060_v57, 16  ;;  %v7138_v25 = vld [vmem:[#allocation2 + $0x30] sm:$0xf] }
 0x157   : > { %v1016_v62 = vmul.f32 19.367046, %v984_v17  ;;  %v2238_v19 = vsel %vm6736_vm5, %v5605_v16, %v2237_v6  ;;  %v2413_v24 = vrot.slane %v2412_v12, 4  ;;  %v2422_v60 = vor.u32 %v2421_v40, %v2417_v8  ;;  %v1723_v12 = vld [vmem:[#allocation2 + $0x18] sm:$0xf] }
 0x158   : > { %6248 = vrcp.f32 %v889_v49  ;;  %v2382_v56 = vshrl.u32 %v7029_v28, 16  ;;  %4174 = vrot.lane.b32.xlu0 %v5763_v61, %s6495_s26  ;;  %v5685_v33 = vcombine.low %v2238_v19, %v2241_v59  ;;  %v2385_v15 = vshll.u32 %v7029_v28, 16  ;;  %v7121_v28 = vld [vmem:[#allocation2 + $0x24] sm:$0xf]  ;;  %v7128_v40 = vld [vmem:[#allocation2 + $0x34] sm:$0xf] }
 0x159   : > { %v6024_v41 = vround.rtne.f32 %v1016_v62  ;;  %v2423_v57 = vrot.slane %v2422_v60, 4  ;;  %v2427_v0 = vrot.slane %v2425_v37, 5  ;;  %v3039_v4 = vshrl.u32 %v2946_v51, 16 }
 0x15a   : > { %v6245_v45 = vpop.eup %6244  ;;  %3746 = vrot.lane.b32.xlu1 %v5685_v33, %s6490_s11  ;;  %v3042_v22 = vshll.u32 %v2946_v51, 16  ;;  %v2418_v58 = vsel %vm6744_vm8, %v2413_v24, %v2417_v8  ;;  %v5749_v6 = vcombine.low %v2946_v51, %v7112_v11  ;;  %v2384_v36 = vrot.slane %v2382_v56, 4  ;;  %v1670_v24 = vld [vmem:[#allocation2 + $0x78] sm:$0xf] }
 0x15b   : > { %v5557_v53 = vclamps-f32 %v6024_v41, 127.0  ;;  %v887_v54 = vadd.f32 1.0, %v6245_v45  ;;  %v2428_v16 = vsel %vm6744_vm8, %v2423_v57, %v2427_v0  ;;  %v2387_v7 = vrot.slane %v2385_v15, 5 }
 0x15c   : > { %v5716_v23 = vcombine.low %v2418_v58, %v2428_v16  ;;  %v7131_v63 = vrot.slane %v3039_v4, 4  ;;  %v7133_v48 = vrot.slane %v3042_v22, 5  ;;  %v3052_v5 = vshrl.u32 %v7112_v11, 16 }
 0x15d   : > { %v5911_v13 = vpack.c.bf16 %v5557_v53, %v5557_v53  ;;  %6250 = vrcp.f32 %v887_v54  ;;  %v3015_v31 = vshrl.u32 %v7121_v28, 16  ;;  %v1819_v8 = vshrl.u32 %v1723_v12, 16 }
 0x15e   : > { %3920 = vrot.lane.b32.xlu0 %v5716_v23, %s6496_s27  ;;  %4098 = vrot.lane.b32.xlu1 %v5749_v6, %s6492_s23  ;;  %v1822_v49 = vshll.u32 %v1723_v12, 16  ;;  %v5748_v59 = vcombine.low %v7121_v28, %v7126_v2  ;;  %v5702_v37 = vcombine.low %v7138_v25, %v7128_v40  ;;  %v1828_v62 = vshll.u32 %v7078_v47, 16 }
 0x15f   : > { %v6247_v9 = vpop.eup %6246  ;;  %v1435_v26 = vshrl.u32 %v5911_v13, 16  ;;  %v1438_v17 = vshll.u32 %v5911_v13, 16  ;;  %v1821_v60 = vrot.slane %v1819_v8, 4  ;;  %v1832_v56 = vshrl.u32 %v7078_v47, 16 }
 0x160   : > { %v982_v61 = vmul.f32 %v6247_v9, %v7021_v34  ;;  %v1824_v51 = vrot.slane %v1822_v49, 5  ;;  %v1830_v34 = vrot.slane %v1828_v62, 5  ;;  %v1838_v57 = vshll.u32 %v7082_v14, 16 }
 0x161   : > { %v7146_v19 = vrot.slane %v1435_v26, 7  ;;  %v2388_v22 = vor.u32 %v2387_v7, %v2384_v36  ;;  %v7155_v54 = vrot.slane %v3015_v31, 4  ;;  %v3018_v47 = vshll.u32 %v7121_v28, 16  ;;  %v7163_v7 = vpop.f32.mrb[28].mxu0 }
 0x162   : > { %v6249_v33 = vpop.eup %6248  ;;  %v1014_v41 = vmul.f32 19.367046, %v982_v61  ;;  %4096 = vrot.lane.b32.xlu0 %v5748_v59, %s6492_s23  ;;  %3844 = vrot.lane.b32.xlu1 %v5702_v37, %s6493_s24  ;;  %v1825_v4 = vor.u32 %v1824_v51, %v1821_v60  ;;  %v1834_v58 = vrot.slane %v1832_v56, 4  ;;  %v2391_v12 = vshll.u32 %v6994_v38, 16 }
 0x163   : > { %v1440_v0 = vor.u32 %v1438_v17, %v7146_v19  ;;  %v985_v45 = vmul.f32 %v6249_v33, %v7037_v21  ;;  %v2454_v13 = vshrl.u32 %v7138_v25, 16  ;;  %v2395_v36 = vshrl.u32 %v6994_v38, 16 }
 0x164   : > { %v6022_v53 = vround.rtne.f32 %v1014_v41  ;;  %v1826_v6 = vrot.slane %v1825_v4, 4  ;;  %v1835_v21 = vor.u32 %v1834_v58, %v1830_v34  ;;  %v1840_v26 = vrot.slane %v1838_v57, 5  ;;  %v7174_v4 = vld [vmem:[#allocation2 + $0x28] sm:$0xf] }
 0x165   : > { %v1671_v16 = vsel %vm6873_vm12, %v1440_v0, %v1670_v24  ;;  %v1017_v23 = vmul.f32 19.367046, %v985_v45  ;;  %v2389_v17 = vrot.slane %v2388_v22, 4  ;;  %v2393_v8 = vrot.slane %v2391_v12, 5  ;;  %v1721_v22 = vld [vmem:[#allocation2 + $0xc] sm:$0xf] }
 0x166   : > { %1672 = vst [vmem:[#allocation2 + $0x78] sm:$0xf] %v1671_v16  ;;  %v5555_v14 = vclamps-f32 %v6022_v53, 127.0  ;;  %v1836_v59 = vrot.slane %v1835_v21, 4  ;;  %v2397_v37 = vrot.slane %v2395_v36, 4  ;;  %v2457_v24 = vshll.u32 %v7138_v25, 16 }
 0x167   : > { %v6251_v31 = vpop.eup %6250  ;;  %v6025_v9 = vround.rtne.f32 %v1017_v23  ;;  %v1831_v60 = vsel %vm6744_vm8, %v1826_v6, %v1830_v34  ;;  %v2401_v38 = vshll.u32 %v7010_v55, 16  ;;  %v7172_v0 = vrot.slane %v2454_v13, 4  ;;  %v1663_v34 = vld [vmem:[#allocation2 + $0x6c] sm:$0xf]  ;;  %v7182_v13 = vld [vmem:[#allocation2 + $0x24] sm:$0xf] }
 0x168   : > { %v5909_v49 = vpack.c.bf16 %v5555_v14, %v5555_v14  ;;  %v983_v61 = vmul.f32 %v6251_v31, %v7053_v46  ;;  %v1841_v41 = vsel %vm6744_vm8, %v1836_v59, %v1840_v26  ;;  %v2398_v45 = vor.u32 %v2397_v37, %v2393_v8 }
 0x169   : > { %v5558_v62 = vclamps-f32 %v6025_v9, 127.0  ;;  %v5669_v46 = vcombine.low %v1831_v60, %v1841_v41  ;;  %v1441_v53 = vrot.slane %v7146_v19, 4  ;;  %v2394_v16 = vsel %vm6744_vm8, %v2389_v17, %v2393_v8 }
 0x16a   : > { %v1418_v51 = vshrl.u32 %v5909_v49, 16  ;;  %v1421_v56 = vshll.u32 %v5909_v49, 16  ;;  %v1015_v33 = vmul.f32 19.367046, %v983_v61  ;;  %v2399_v12 = vrot.slane %v2398_v45, 4 }
 0x16b   : > { %v5912_v57 = vpack.c.bf16 %v5558_v62, %v5558_v62  ;;  %3666 = vrot.lane.b32.xlu0 %v5669_v46, %s6491_s12  ;;  %v2403_v14 = vrot.slane %v2401_v38, 5  ;;  %v5701_v19 = vcombine.low %v7182_v13, %v7174_v4  ;;  %v1795_v31 = vshrl.u32 %v1721_v22, 16  ;;  %v1674_v61 = vld [vmem:[#allocation2 + $0x80] sm:$0x1]  ;;  %v2767_v45 = vld [vmem:[#allocation2 + $0x24] sm:$0xe] }
 0x16c   : > { %v7177_v58 = vrot.slane %v1418_v51, 7  ;;  %v6023_v55 = vround.rtne.f32 %v1015_v33  ;;  %v1798_v17 = vshll.u32 %v1721_v22, 16  ;;  %v1804_v8 = vshll.u32 %v7039_v52, 16 }
 0x16d   : > { %v1443_v23 = vshrl.u32 %v5912_v57, 16  ;;  %v1446_v6 = vshll.u32 %v5912_v57, 16  ;;  %v2404_v26 = vsel %vm6744_vm8, %v2399_v12, %v2403_v14  ;;  %v1797_v62 = vrot.slane %v1795_v31, 4  ;;  %v7209_v12 = vld [vmem:[#allocation2 + $0x2c] sm:$0x1] }
 0x16e   : > { %v1423_v21 = vor.u32 %v1421_v56, %v7177_v58  ;;  %v5556_v36 = vclamps-f32 %v6023_v55, 127.0  ;;  %v5715_v37 = vcombine.low %v2394_v16, %v2404_v26  ;;  %v1800_v51 = vrot.slane %v1798_v17, 5  ;;  %v7203_v16 = vld [vmem:[%s9300_s2] ss:$0 sm:$0xff]  ;;  %v1667_v14 = vld [vmem:[#allocation2 + $0x74] sm:$0x1] }
 0x16f   : > { %v1445_v9 = vrot.slane %v1443_v23, 7  ;;  %3842 = vrot.lane.b32.xlu0 %v5701_v19, %s6493_s24  ;;  %v1806_v56 = vrot.slane %v1804_v8, 5  ;;  %v1808_v57 = vshrl.u32 %v7039_v52, 16  ;;  %v1814_v46 = vshll.u32 %v7049_v43, 16 }
 0x170   : > { %v1664_v49 = vsel %vm6873_vm12, %v1423_v21, %v1663_v34  ;;  %v5910_v59 = vpack.c.bf16 %v5556_v36, %v5556_v36  ;;  %3918 = vrot.lane.b32.xlu1 %v5715_v37, %s6496_s27  ;;  %v1801_v55 = vor.u32 %v1800_v51, %v1797_v62  ;;  %v725_v23 = vmul.f32 %v7203_v16, %v6859_v1  ;;  %v7214_v36 = vld [vmem:[%s9301_s3] ss:$0 sm:$0xff]  ;;  %v2768_v51 = vld [vmem:[#allocation2 + $0x30] sm:$0xe] }
 0x171   : > { %1665 = vst [vmem:[#allocation2 + $0x6c] sm:$0xf] %v1664_v49  ;;  %v1448_v60 = vor.u32 %v1446_v6, %v1445_v9  ;;  %v1450_v38 = vrot.slane %v1445_v9, 4  ;;  %v1424_v52 = vrot.slane %v7177_v58, 4  ;;  %v1810_v6 = vrot.slane %v1808_v57, 4 }
 0x172   : > { %v1426_v33 = vshrl.u32 %v5910_v59, 16  ;;  %v1429_v41 = vshll.u32 %v5910_v59, 16  ;;  %v1802_v21 = vrot.slane %v1801_v55, 4  ;;  %v7217_v19 = vadd.f32 %v7214_v36, %v725_v23  ;;  %v2157_v57 = vld [vmem:[#allocation2 + $0x24] sm:$0xe] }
 0x173   : > { %v1449_v22 = vsel %vm6883_vm13, %v1441_v53, %v1448_v60  ;;  %v1675_v34 = vsel %vm6891_vm14, %v1450_v38, %v1674_v61  ;;  %v1816_v53 = vrot.slane %v1814_v46, 5  ;;  %v5621_v1 = vrot.slane %v2767_v45, 9  ;;  %v7246_v55 = vld [vmem:[#allocation2 + $0x28] sm:$0xf] }
 0x174   : > { %1673 = vst.msk [vmem:[#allocation2 + $0x7c] sm:$0xf] %vm1142_vm1, %v1449_v22  ;;  %1676 = vst [vmem:[#allocation2 + $0x80] sm:$0x1] %v1675_v34  ;;  %v1428_v43 = vrot.slane %v1426_v33, 7  ;;  %v2845_v58 = vrot.slane %v7174_v4, 5  ;;  %v1811_v26 = vor.u32 %v1810_v6, %v1806_v56  ;;  %v723_v17 = vmul.f32 %v7203_v16, %v6863_v10 }
 0x175   : > { %v1807_v8 = vsel %vm6744_vm8, %v1802_v21, %v1806_v56  ;;  %v5529_v49 = vmul.f32 -1.442695, %v7217_v19  ;;  %v2848_v59 = vrot.slane %v7209_v12, 5  ;;  %v726_v33 = vmul.f32 %v7203_v16, %v6865_v20  ;;  %v7253_v6 = vld [vmem:[#allocation2 + $0x2c] sm:$0x1] }
 0x176   : > { %v1431_v31 = vor.u32 %v1429_v41, %v1428_v43  ;;  %v1433_v9 = vrot.slane %v1428_v43, 4  ;;  %v2847_v61 = vrot.slane %v2845_v58, 4  ;;  %v1812_v60 = vrot.slane %v1811_v26, 4  ;;  %v7240_v41 = vld [vmem:[#allocation2 + $0x38] sm:$0x1] }
 0x177   : > { %v7231_v38 = vadd.f32 %v7214_v36, %v723_v17  ;;  %6252 = vpow2.f32 %v5529_v49  ;;  %v2846_v10 = vsel %vm6736_vm5, %v5621_v1, %v2845_v58  ;;  %v2852_v34 = vrot.slane %v7128_v40, 5  ;;  %v2158_v58 = vld [vmem:[#allocation2 + $0x30] sm:$0xe] }
 0x178   : > { %v1432_v37 = vsel %vm6883_vm13, %v1424_v52, %v1431_v31  ;;  %v1668_v62 = vsel %vm6891_vm14, %v1433_v9, %v1667_v14  ;;  %v2849_v56 = vsel %vm6736_vm5, %v2847_v61, %v2848_v59  ;;  %v1817_v46 = vsel %vm6744_vm8, %v1812_v60, %v1816_v53  ;;  %v7255_v14 = vld [vmem:[#allocation2 + $0x34] sm:$0xf] }
 0x179   : > { %1666 = vst.msk [vmem:[#allocation2 + $0x70] sm:$0xf] %vm1142_vm1, %v1432_v37  ;;  %1669 = vst [vmem:[#allocation2 + $0x74] sm:$0x1] %v1668_v62  ;;  %v5733_v45 = vcombine.low %v2846_v10, %v2849_v56  ;;  %v5527_v22 = vmul.f32 -1.442695, %v7231_v38  ;;  %v5668_v23 = vcombine.low %v1807_v8, %v1817_v46  ;;  %v7249_v52 = vadd.f32 %v7214_v36, %v726_v33 }
 0x17a   : > { %v5622_v43 = vrot.slane %v2768_v51, 9  ;;  %v724_v20 = vmul.f32 %v7203_v16, %v6877_v35  ;;  %v7259_v53 = vrot.slane %v2457_v24, 5  ;;  %v2854_v21 = vrot.slane %v2852_v34, 4  ;;  %v7271_v24 = vld [vmem:[#allocation2 + $0x38] sm:$0x1] }
 0x17b   : > { %4002 = vrot.lane.b32.xlu0 %v5733_v45, %s6494_s25  ;;  %6254 = vpow2.f32 %v5527_v22  ;;  %v2855_v1 = vrot.slane %v7240_v41, 5  ;;  %3664 = vrot.lane.b32.xlu1 %v5668_v23, %s6491_s12  ;;  %v5530_v31 = vmul.f32 -1.442695, %v7249_v52  ;;  %v2244_v25 = vrot.slane %v7246_v55, 5  ;;  %v7278_v62 = vld [vmem:[#allocation2 + $0x38] sm:$0x1] }
 0x17c   : > { %v2853_v35 = vsel %vm6736_vm5, %v5622_v43, %v2852_v34  ;;  %v7268_v9 = vadd.f32 %v7214_v36, %v724_v20  ;;  %v5606_v17 = vrot.slane %v2157_v57, 9  ;;  %v2247_v8 = vrot.slane %v7253_v6, 5 }
 0x17d   : > { %v2856_v26 = vsel %vm6736_vm5, %v2854_v21, %v2855_v1  ;;  %v2251_v49 = vrot.slane %v7255_v14, 5  ;;  %6256 = vpow2.f32 %v5530_v31  ;;  %v5607_v37 = vrot.slane %v2158_v58, 9  ;;  %v7297_v1 = vld [vmem:[#allocation2 + $0x4c] sm:$0xf] }
 0x17e   : > { %v5734_v61 = vcombine.low %v2853_v35, %v2856_v26  ;;  %v5528_v59 = vmul.f32 -1.442695, %v7268_v9  ;;  %v2246_v60 = vrot.slane %v2244_v25, 4  ;;  %v2254_v10 = vrot.slane %v7271_v24, 5  ;;  %9339 = vst [vmem:[#allocation4_spill] sm:$0xff] %v7297_v1 }
 0x17f   : > { %v2253_v51 = vrot.slane %v2251_v49, 4  ;;  %v3045_v56 = vor.u32 %v7133_v48, %v7131_v63  ;;  %v2245_v33 = vsel %vm6736_vm5, %v5606_v17, %v2244_v25  ;;  %v3048_v57 = vshll.u32 %v7112_v11, 16 }
 0x180   : > { %4004 = vrot.lane.b32.xlu1 %v5734_v61, %s6494_s25  ;;  %6258 = vpow2.f32 %v5528_v59  ;;  %v3054_v46 = vrot.slane %v3052_v5, 4  ;;  %v2248_v45 = vsel %vm6736_vm5, %v2246_v60, %v2247_v8  ;;  %v2252_v22 = vsel %vm6736_vm5, %v5607_v37, %v2251_v49  ;;  %v2950_v49 = vld [vmem:[#allocation2 + $0x48] sm:$0xf] }
 0x181   : > { %v2255_v63 = vsel %vm6736_vm5, %v2253_v51, %v2254_v10  ;;  %v3058_v48 = vshll.u32 %v7278_v62, 16  ;;  %v6253_v34 = vpop.eup %6252  ;;  %v2467_v23 = vshrl.u32 %v7128_v40, 16  ;;  %v5686_v43 = vcombine.low %v2245_v33, %v2248_v45 }
 0x182   : > { %v5687_v20 = vcombine.low %v2252_v22, %v2255_v63  ;;  %v3050_v21 = vrot.slane %v3048_v57, 5  ;;  %v3028_v5 = vshrl.u32 %v7126_v2, 16  ;;  %v2430_v58 = vshrl.u32 %v7182_v13, 16 }
 0x183   : > { %v892_v31 = vadd.f32 1.0, %v6253_v34  ;;  %v3046_v35 = vrot.slane %v3045_v56, 4  ;;  %v7303_v25 = vrot.slane %v3018_v47, 5  ;;  %v2433_v17 = vshll.u32 %v7182_v13, 16  ;;  %3748 = vrot.lane.b32.xlu0 %v5686_v43, %s6490_s11 }
 0x184   : > { %3750 = vrot.lane.b32.xlu1 %v5687_v20, %s6490_s11  ;;  %v3055_v8 = vor.u32 %v3054_v46, %v3050_v21  ;;  %v3060_v59 = vrot.slane %v3058_v48, 5  ;;  %v5751_v37 = vcombine.low %v2950_v49, %v7297_v1  ;;  %v2460_v28 = vor.u32 %v7259_v53, %v7172_v0  ;;  %v7317_v46 = vld [vmem:[#allocation2 + $0x4c] sm:$0xf] }
 0x185   : > { %v6255_v61 = vpop.eup %6254  ;;  %6260 = vrcp.f32 %v892_v31  ;;  %v2463_v51 = vshll.u32 %v7128_v40, 16  ;;  %v2469_v10 = vrot.slane %v2467_v23, 4  ;;  %v7313_v13 = vrot.slane %v2430_v58, 4  ;;  %v7324_v23 = vld [vmem:[#allocation2 + $0x48] sm:$0xf] }
 0x186   : > { %v890_v47 = vadd.f32 1.0, %v6255_v61  ;;  %v3056_v60 = vrot.slane %v3055_v8, 4  ;;  %v3051_v56 = vsel %vm6744_vm8, %v3046_v35, %v3050_v21  ;;  %v3087_v33 = vshrl.u32 %v2950_v49, 16  ;;  %v1727_v35 = vld [vmem:[#allocation2 + $0x30] sm:$0xf]  ;;  %v7331_v8 = vpop.f32.mrb[29].mxu0 }
 0x187   : > { %v3090_v57 = vshll.u32 %v2950_v49, 16  ;;  %v6257_v45 = vpop.eup %6256  ;;  %v2465_v0 = vrot.slane %v2463_v51, 5  ;;  %v2473_v40 = vshll.u32 %v7240_v41, 16  ;;  %v2443_v53 = vshrl.u32 %v7174_v4, 16 }
 0x188   : > { %6262 = vrcp.f32 %v890_v47  ;;  %v3061_v22 = vsel %vm6744_vm8, %v3056_v60, %v3060_v59  ;;  %4102 = vrot.lane.b32.xlu1 %v5751_v37, %s6492_s23  ;;  %v893_v63 = vadd.f32 1.0, %v6257_v45  ;;  %v2461_v34 = vrot.slane %v2460_v28, 4  ;;  %v7336_v59 = vld [vmem:[#allocation2 + $0x2c] sm:$0x1]  ;;  %v7343_v60 = vpop.f32.mrb[30].mxu0 }
 0x189   : > { %v5765_v48 = vcombine.low %v3051_v56, %v3061_v22  ;;  %v7326_v20 = vrot.slane %v2433_v17, 5  ;;  %v2470_v58 = vor.u32 %v2469_v10, %v2465_v0  ;;  %v5704_v31 = vcombine.low %v7324_v23, %v7317_v46  ;;  %v7348_v56 = vld [vmem:[#allocation2 + $0x40] sm:$0xf] }
 0x18a   : > { %v6259_v43 = vpop.eup %6258  ;;  %6264 = vrcp.f32 %v893_v63  ;;  %v7338_v17 = vrot.slane %v3087_v33, 4  ;;  %v7340_v37 = vrot.slane %v3090_v57, 5  ;;  %v2475_v47 = vrot.slane %v2473_v40, 5  ;;  %9340 = vst [vmem:[#allocation5_spill] sm:$0xff] %v7348_v56  ;;  %v7356_v63 = vpop.f32.mrb[31].mxu0 }
 0x18b   : > { %v891_v41 = vadd.f32 1.0, %v6259_v43  ;;  %4178 = vrot.lane.b32.xlu0 %v5765_v48, %s6495_s26  ;;  %v2471_v28 = vrot.slane %v2470_v58, 4  ;;  %v2466_v51 = vsel %vm6744_vm8, %v2461_v34, %v2465_v0  ;;  %v2502_v10 = vshrl.u32 %v7324_v23, 16  ;;  %v7359_v34 = vld [vmem:[#allocation2 + $0x3c] sm:$0xf] }
 0x18c   : > { %3848 = vrot.lane.b32.xlu1 %v5704_v31, %s6493_s24  ;;  %v3021_v33 = vor.u32 %v7303_v25, %v7155_v54  ;;  %v3024_v45 = vshll.u32 %v7126_v2, 16  ;;  %v3030_v22 = vrot.slane %v3028_v5, 4  ;;  %v3034_v40 = vshll.u32 %v7336_v59, 16 }
 0x18d   : > { %6266 = vrcp.f32 %v891_v41  ;;  %v2476_v57 = vsel %vm6744_vm8, %v2471_v28, %v2475_v47  ;;  %v1867_v31 = vshrl.u32 %v1727_v35, 16  ;;  %v5750_v25 = vcombine.low %v7359_v34, %v7348_v56 }
 0x18e   : > { %v5718_v43 = vcombine.low %v2466_v51, %v2476_v57  ;;  %v3022_v58 = vrot.slane %v3021_v33, 4  ;;  %v3026_v41 = vrot.slane %v3024_v45, 5  ;;  %v1870_v28 = vshll.u32 %v1727_v35, 16 }
 0x18f   : > { %v6261_v48 = vpop.eup %6260  ;;  %v1869_v5 = vrot.slane %v1867_v31, 4  ;;  %v1876_v47 = vshll.u32 %v7255_v14, 16  ;;  %v1880_v51 = vshrl.u32 %v7255_v14, 16  ;;  %v1886_v57 = vshll.u32 %v7271_v24, 16 }
 0x190   : > { %v988_v54 = vmul.f32 %v6261_v48, %v7217_v19  ;;  %3924 = vrot.lane.b32.xlu0 %v5718_v43, %s6496_s27  ;;  %v3031_v33 = vor.u32 %v3030_v22, %v3026_v41  ;;  %v3036_v15 = vrot.slane %v3034_v40, 5  ;;  %v1872_v26 = vrot.slane %v1870_v28, 5  ;;  %v6139_v43 = vld [vmem:[%s9302_s4] sm:$0xff]   ;;  %v6141_v40 = vld [vmem:[%s9302_s4 + $0x8] sm:$0xff]  }
 0x191   : > { %v3027_v45 = vsel %vm6744_vm8, %v3022_v58, %v3026_v41  ;;  %v1878_v35 = vrot.slane %v1876_v47, 5  ;;  %v1882_v48 = vrot.slane %v1880_v51, 4  ;;  %v1888_v24 = vrot.slane %v1886_v57, 5  ;;  %4637 = vmatpush1.bf16.msra.mxu1 %v6139_v43 }
 0x192   : > { %v6263_v61 = vpop.eup %6262  ;;  %v1020_v21 = vmul.f32 19.367046, %v988_v54  ;;  %v3032_v14 = vrot.slane %v3031_v33, 4  ;;  %v1873_v49 = vor.u32 %v1872_v26, %v1869_v5  ;;  %4638 = vmatprep.subr.bf16.mxu1 %v6489_v18  ;;  %v2449_v33 = vshll.u32 %v7209_v12, 16 }
 0x193   : > { %v986_v19 = vmul.f32 %v6263_v61, %v7231_v38  ;;  %v1883_v22 = vor.u32 %v1882_v48, %v1878_v35  ;;  %v2436_v38 = vor.u32 %v7326_v20, %v7313_v13  ;;  %v2439_v61 = vshll.u32 %v7174_v4, 16  ;;  %v6142_v4 = vld [vmem:[%s9302_s4 + $0x10] sm:$0xff]  }
 0x194   : > { %v6028_v31 = vround.rtne.f32 %v1020_v21  ;;  %v6265_v0 = vpop.eup %6264  ;;  %4100 = vrot.lane.b32.xlu0 %v5750_v25, %s6492_s23  ;;  %v3037_v26 = vsel %vm6744_vm8, %v3032_v14, %v3036_v15  ;;  %v1874_v41 = vrot.slane %v1873_v49, 4  ;;  %v2445_v20 = vrot.slane %v2443_v53, 4 }
 0x195   : > { %v1018_v54 = vmul.f32 19.367046, %v986_v19  ;;  %v989_v21 = vmul.f32 %v6265_v0, %v7249_v52  ;;  %v5764_v5 = vcombine.low %v3027_v45, %v3037_v26  ;;  %v1884_v13 = vrot.slane %v1883_v22, 4  ;;  %4639 = vmatpush1.bf16.msra.mxu1 %v6141_v40  ;;  %v1684_v22 = vld [vmem:[#allocation2 + $0x90] sm:$0xf] }
 0x196   : > { %v5561_v58 = vclamps-f32 %v6028_v31, 127.0  ;;  %v1879_v52 = vsel %vm6744_vm8, %v1874_v41, %v1878_v35  ;;  %v2441_v49 = vrot.slane %v2439_v61, 5  ;;  %4640 = vmatprep.subr.bf16.mxu1 %v6489_v18  ;;  %v2437_v43 = vrot.slane %v2436_v38, 4 }
 0x197   : > { %v6267_v25 = vpop.eup %6266  ;;  %v6026_v28 = vround.rtne.f32 %v1018_v54  ;;  %v1021_v51 = vmul.f32 19.367046, %v989_v21  ;;  %4176 = vrot.lane.b32.xlu1 %v5764_v5, %s6495_s26  ;;  %v1889_v15 = vsel %vm6744_vm8, %v1884_v13, %v1888_v24  ;;  %v7400_v12 = vrot.slane %v2502_v10, 4  ;;  %v6143_v10 = vld [vmem:[%s9302_s4 + $0x18] sm:$0xff]  }
 0x198   : > { %v5915_v47 = vpack.c.bf16 %v5561_v58, %v5561_v58  ;;  %v987_v57 = vmul.f32 %v6267_v25, %v7268_v9  ;;  %v5671_v48 = vcombine.low %v1879_v52, %v1889_v15  ;;  %v2446_v31 = vor.u32 %v2445_v20, %v2441_v49 }
 0x199   : > { %v5559_v0 = vclamps-f32 %v6026_v28, 127.0  ;;  %v6029_v9 = vround.rtne.f32 %v1021_v51  ;;  %v2451_v21 = vrot.slane %v2449_v33, 5  ;;  %4641 = vmatpush1.bf16.msra.mxu1 %v6142_v4  ;;  %v9341_v38 = vshll.u32 %v7324_v23, 16  ;;  %v7416_v51 = vld [vmem:[#allocation2 + $0x40] sm:$0xf] }
 0x19a   : > { %v1469_v53 = vshrl.u32 %v5915_v47, 16  ;;  %v1472_v19 = vshll.u32 %v5915_v47, 16  ;;  %v1019_v45 = vmul.f32 19.367046, %v987_v57  ;;  %3670 = vrot.lane.b32.xlu0 %v5671_v48, %s6491_s12  ;;  %v2447_v58 = vrot.slane %v2446_v31, 4  ;;  %4642 = vmatprep.subr.bf16.mxu1 %v6489_v18 }
 0x19b   : > { %v5913_v35 = vpack.c.bf16 %v5559_v0, %v5559_v0  ;;  %v5562_v24 = vclamps-f32 %v6029_v9, 127.0  ;;  %v7405_v28 = vrot.slane %v9341_v38, 5  ;;  %v2515_v13 = vshrl.u32 %v7317_v46, 16  ;;  %v1677_v57 = vld [vmem:[#allocation2 + $0x84] sm:$0xf] }
 0x19c   : > { %v1471_v14 = vrot.slane %v1469_v53, 7  ;;  %v6027_v54 = vround.rtne.f32 %v1019_v45  ;;  %v2442_v20 = vsel %vm6744_vm8, %v2437_v43, %v2441_v49  ;;  %v2452_v47 = vsel %vm6744_vm8, %v2447_v58, %v2451_v21  ;;  %v1725_v33 = vld [vmem:[#allocation2 + $0x24] sm:$0xf]  ;;  %v7421_v49 = vld [vmem:[#allocation2 + $0x3c] sm:$0xf] }
 0x19d   : > { %v1452_v61 = vshrl.u32 %v5913_v35, 16  ;;  %v1455_v40 = vshll.u32 %v5913_v35, 16  ;;  %v5916_v41 = vpack.c.bf16 %v5562_v24, %v5562_v24  ;;  %v5717_v9 = vcombine.low %v2442_v20, %v2452_v47  ;;  %4643 = vmatpush1.bf16.msra.mxu1 %v6143_v10  ;;  %v1688_v24 = vld [vmem:[#allocation2 + $0x98] sm:$0x1] }
 0x19e   : > { %v1474_v26 = vor.u32 %v1472_v19, %v1471_v14  ;;  %v5560_v25 = vclamps-f32 %v6027_v54, 127.0  ;;  %v1475_v4 = vrot.slane %v1471_v14, 4  ;;  %v3063_v19 = vshrl.u32 %v7359_v34, 16  ;;  %4644 = vmatprep.subr.bf16.mxu1 %v6489_v18 }
 0x19f   : > { %v1454_v5 = vrot.slane %v1452_v61, 7  ;;  %v1477_v52 = vshrl.u32 %v5916_v41, 16  ;;  %v1480_v0 = vshll.u32 %v5916_v41, 16  ;;  %v5703_v43 = vcombine.low %v7421_v49, %v7416_v51  ;;  %3922 = vrot.lane.b32.xlu1 %v5717_v9, %s6496_s27  ;;  %v1681_v41 = vld [vmem:[#allocation2 + $0x8c] sm:$0x1] }
 0x1a0   : > { %v1685_v23 = vsel %vm6873_vm12, %v1474_v26, %v1684_v22  ;;  %v5914_v15 = vpack.c.bf16 %v5560_v25, %v5560_v25  ;;  %v1843_v54 = vshrl.u32 %v1725_v33, 16  ;;  %v1846_v22 = vshll.u32 %v1725_v33, 16  ;;  %v6144_v26 = vld [vmem:[%s9302_s4 + $0x20] sm:$0xff]  }
 0x1a1   : > { %1686 = vst [vmem:[#allocation2 + $0x90] sm:$0xf] %v1685_v23  ;;  %v1457_v53 = vor.u32 %v1455_v40, %v1454_v5  ;;  %v1479_v45 = vrot.slane %v1477_v52, 7  ;;  %v1458_v31 = vrot.slane %v1454_v5, 4  ;;  %3846 = vrot.lane.b32.xlu0 %v5703_v43, %s6493_s24  ;;  %v1852_v21 = vshll.u32 %v7246_v55, 16  ;;  %4645 = vmatpush1.bf16.msra.mxu1 %v6144_v26 }
 0x1a2   : > { %v1460_v35 = vshrl.u32 %v5914_v15, 16  ;;  %v1463_v48 = vshll.u32 %v5914_v15, 16  ;;  %v1845_v25 = vrot.slane %v1843_v54, 4  ;;  %v1848_v38 = vrot.slane %v1846_v22, 5  ;;  %v2769_v52 = vld [vmem:[#allocation2 + $0x3c] sm:$0xe]  ;;  %4646 = vmatprep.subr.bf16.mxu1 %v6489_v18 }
 0x1a3   : > { %v1678_v14 = vsel %vm6873_vm12, %v1457_v53, %v1677_v57  ;;  %v1482_v61 = vor.u32 %v1480_v0, %v1479_v45  ;;  %v1484_v40 = vrot.slane %v1479_v45, 4  ;;  %v1856_v10 = vshrl.u32 %v7246_v55, 16  ;;  %v7442_v53 = vld [vmem:[#allocation2 + $0x44] sm:$0x1] }
 0x1a4   : > { %1679 = vst [vmem:[#allocation2 + $0x84] sm:$0xf] %v1678_v14  ;;  %v1462_v58 = vrot.slane %v1460_v35, 7  ;;  %v1862_v5 = vshll.u32 %v7253_v6, 16  ;;  %v3066_v0 = vshll.u32 %v7359_v34, 16  ;;  %v1849_v15 = vor.u32 %v1848_v38, %v1845_v25 }
 0x1a5   : > { %v1483_v20 = vsel %vm6883_vm13, %v1475_v4, %v1482_v61  ;;  %v1689_v47 = vsel %vm6891_vm14, %v1484_v40, %v1688_v24  ;;  %v1854_v33 = vrot.slane %v1852_v21, 5  ;;  %v1858_v55 = vrot.slane %v1856_v10, 4  ;;  %v2770_v35 = vld [vmem:[#allocation2 + $0x48] sm:$0xe]  ;;  %v7473_v10 = vld [vmem:[#allocation2 + $0x50] sm:$0x1] }
 0x1a6   : > { %v1465_v23 = vor.u32 %v1463_v48, %v1462_v58  ;;  %v1467_v57 = vrot.slane %v1462_v58, 4  ;;  %1687 = vst.msk [vmem:[#allocation2 + $0x94] sm:$0xf] %vm1142_vm1, %v1483_v20  ;;  %1690 = vst [vmem:[#allocation2 + $0x98] sm:$0x1] %v1689_v47  ;;  %v1864_v9 = vrot.slane %v1862_v5, 5  ;;  %v729_v45 = vmul.f32 %v7203_v16, %v6954_v32 }
 0x1a7   : > { %v1850_v48 = vrot.slane %v1849_v15, 4  ;;  %v1859_v43 = vor.u32 %v1858_v55, %v1854_v33  ;;  %v5623_v14 = vrot.slane %v2769_v52, 9  ;;  %v2859_v24 = vrot.slane %v7416_v51, 5  ;;  %v6149_v52 = vld [vmem:[%s9302_s4 + $0x30] sm:$0xff]  }
 0x1a8   : > { %v1466_v6 = vsel %vm6883_vm13, %v1458_v31, %v1465_v23  ;;  %v1682_v4 = vsel %vm6891_vm14, %v1467_v57, %v1681_v41  ;;  %v6146_v31 = vld [vmem:[%s9302_s4 + $0x28] sm:$0xff]   ;;  %v7457_v54 = vadd.f32 %v7214_v36, %v729_v45  ;;  %v2862_v22 = vrot.slane %v7442_v53, 5  ;;  %v7485_v23 = vld [vmem:[#allocation2 + $0x40] sm:$0xf]  ;;  %v2159_v57 = vld [vmem:[#allocation2 + $0x3c] sm:$0xe] }
 0x1a9   : > { %1680 = vst.msk [vmem:[#allocation2 + $0x88] sm:$0xf] %vm1142_vm1, %v1466_v6  ;;  %1683 = vst [vmem:[#allocation2 + $0x8c] sm:$0x1] %v1682_v4  ;;  %v727_v32 = vmul.f32 %v7203_v16, %v7109_v39  ;;  %v730_v61 = vmul.f32 %v7203_v16, %v7115_v29  ;;  %v1855_v40 = vsel %vm6744_vm8, %v1850_v48, %v1854_v33  ;;  %v1860_v58 = vrot.slane %v1859_v43, 4 }
 0x1aa   : > { %v2861_v21 = vrot.slane %v2859_v24, 4  ;;  %v5624_v26 = vrot.slane %v2770_v35, 9  ;;  %4647 = vmatpush1.bf16.msra.mxu1 %v6146_v31  ;;  %v5533_v41 = vmul.f32 -1.442695, %v7457_v54  ;;  %v2866_v39 = vrot.slane %v7317_v46, 5 }
 0x1ab   : > { %v7468_v25 = vadd.f32 %v7214_v36, %v727_v32  ;;  %v7471_v38 = vadd.f32 %v7214_v36, %v730_v61  ;;  %4648 = vmatprep.subr.bf16.mxu1 %v6489_v18  ;;  %v1865_v29 = vsel %vm6744_vm8, %v1860_v58, %v1864_v9  ;;  %v2860_v5 = vsel %vm6736_vm5, %v5623_v14, %v2859_v24  ;;  %v7491_v6 = vld [vmem:[#allocation2 + $0x44] sm:$0x1]  ;;  %v7493_v4 = vld [vmem:[#allocation2 + $0x4c] sm:$0xf]  ;;  %v2160_v35 = vld [vmem:[#allocation2 + $0x48] sm:$0xe] }
 0x1ac   : > { %v2863_v20 = vsel %vm6736_vm5, %v2861_v21, %v2862_v22  ;;  %v728_v47 = vmul.f32 %v7203_v16, %v7123_v3  ;;  %v5670_v15 = vcombine.low %v1855_v40, %v1865_v29  ;;  %6268 = vpow2.f32 %v5533_v41  ;;  %v7509_v22 = vld [vmem:[#allocation2 + $0x50] sm:$0x1]  ;;  %v6150_v29 = vld [vmem:[%s9302_s4 + $0x38] sm:$0xff]  }
 0x1ad   : > { %v5735_v33 = vcombine.low %v2860_v5, %v2863_v20  ;;  %v5531_v55 = vmul.f32 -1.442695, %v7468_v25  ;;  %v5534_v9 = vmul.f32 -1.442695, %v7471_v38  ;;  %v2868_v45 = vrot.slane %v2866_v39, 4 }
 0x1ae   : > { %v2869_v3 = vrot.slane %v7473_v10, 5  ;;  %v7498_v16 = vadd.f32 %v7214_v36, %v728_v47  ;;  %4649 = vmatpush1.bf16.msra.mxu1 %v6149_v52  ;;  %3668 = vrot.lane.b32.xlu1 %v5670_v15, %s6491_s12  ;;  %v2867_v48 = vsel %vm6736_vm5, %v5624_v26, %v2866_v39  ;;  %v5608_v43 = vrot.slane %v2159_v57, 9  ;;  %v7513_v21 = vld [vmem:[#allocation2 + $0x50] sm:$0x1] }
 0x1af   : > { %4006 = vrot.lane.b32.xlu0 %v5735_v33, %s6494_s25  ;;  %6270 = vpow2.f32 %v5531_v55  ;;  %v2258_v14 = vrot.slane %v7485_v23, 5  ;;  %v2261_v31 = vrot.slane %v7491_v6, 5  ;;  %4650 = vmatprep.subr.bf16.mxu1 %v6489_v18  ;;  %v5609_v40 = vrot.slane %v2160_v35, 9  ;;  %9342 = vst [vmem:[#allocation6_spill] sm:$0xff] %v7513_v21  ;;  %v2954_v55 = vld [vmem:[#allocation2 + $0x60] sm:$0xf] }
 0x1b0   : > { %6272 = vpow2.f32 %v5534_v9  ;;  %v2870_v24 = vsel %vm6736_vm5, %v2868_v45, %v2869_v3  ;;  %v5532_v36 = vmul.f32 -1.442695, %v7498_v16  ;;  %v2265_v58 = vrot.slane %v7493_v4, 5 }
 0x1b1   : > { %v5736_v32 = vcombine.low %v2867_v48, %v2870_v24  ;;  %v2260_v61 = vrot.slane %v2258_v14, 4  ;;  %v2259_v26 = vsel %vm6736_vm5, %v5608_v43, %v2258_v14  ;;  %v3093_v41 = vor.u32 %v7340_v37, %v7338_v17 }
 0x1b2   : > { %6274 = vpow2.f32 %v5532_v36  ;;  %v3096_v39 = vshll.u32 %v7297_v1, 16  ;;  %v2267_v20 = vrot.slane %v2265_v58, 4  ;;  %v2268_v47 = vrot.slane %v7509_v22, 5  ;;  %4651 = vmatpush1.bf16.msra.mxu1 %v6150_v29  ;;  %v6152_v36 = vld [vmem:[%s9302_s4 + $0x40] sm:$0xff]  }
 0x1b3   : > { %4008 = vrot.lane.b32.xlu1 %v5736_v32, %s6494_s25  ;;  %v2262_v5 = vsel %vm6736_vm5, %v2260_v61, %v2261_v31  ;;  %v9343_v57 = vshrl.u32 %v7297_v1, 16  ;;  %v3076_v15 = vshrl.u32 %v7348_v56, 16  ;;  %v3106_v33 = vshll.u32 %v7513_v21, 16  ;;  %4652 = vmatprep.subr.bf16.mxu1 %v6489_v18 }
 0x1b4   : > { %v5688_v17 = vcombine.low %v2259_v26, %v2262_v5  ;;  %v3098_v37 = vrot.slane %v3096_v39, 5  ;;  %v2266_v45 = vsel %vm6736_vm5, %v5609_v40, %v2265_v58  ;;  %v2269_v3 = vsel %vm6736_vm5, %v2267_v20, %v2268_v47  ;;  %v7557_v39 = vld [vmem:[#allocation2 + $0x64] sm:$0xf] }
 0x1b5   : > { %v3102_v52 = vrot.slane %v9343_v57, 4  ;;  %v3094_v35 = vrot.slane %v3093_v41, 4  ;;  %v7539_v48 = vrot.slane %v3063_v19, 4  ;;  %v7543_v43 = vrot.slane %v3066_v0, 5  ;;  %9344 = vst [vmem:[#allocation7_spill] sm:$0xff] %v7557_v39 }
 0x1b6   : > { %3752 = vrot.lane.b32.xlu0 %v5688_v17, %s6490_s11  ;;  %v5689_v14 = vcombine.low %v2266_v45, %v2269_v3  ;;  %v6269_v31 = vpop.eup %6268  ;;  %v2478_v18 = vshrl.u32 %v7421_v49, 16  ;;  %v2481_v19 = vshll.u32 %v7421_v49, 16  ;;  %v3135_v61 = vshrl.u32 %v2954_v55, 16  ;;  %4653 = vmatpush1.bf16.msra.mxu1 %v6152_v36 }
 0x1b7   : > { %v3103_v24 = vor.u32 %v3102_v52, %v3098_v37  ;;  %v896_v40 = vadd.f32 1.0, %v6269_v31  ;;  %v3108_v0 = vrot.slane %v3106_v33, 5  ;;  %v2508_v58 = vor.u32 %v7405_v28, %v7400_v12 }
 0x1b8   : > { %3754 = vrot.lane.b32.xlu1 %v5689_v14, %s6490_s11  ;;  %v3099_v41 = vsel %vm6744_vm8, %v3094_v35, %v3098_v37  ;;  %v3138_v29 = vshll.u32 %v2954_v55, 16  ;;  %v2511_v5 = vshll.u32 %v7317_v46, 16  ;;  %v2517_v49 = vrot.slane %v2515_v13, 4  ;;  %v7573_v14 = vld [vmem:[#allocation2 + $0x60] sm:$0xf] }
 0x1b9   : > { %v3104_v34 = vrot.slane %v3103_v24, 4  ;;  %v6271_v26 = vpop.eup %6270  ;;  %6276 = vrcp.f32 %v896_v40  ;;  %v5753_v12 = vcombine.low %v2954_v55, %v7557_v39  ;;  %v2521_v37 = vshll.u32 %v7473_v10, 16  ;;  %v7575_v24 = vld [vmem:[#allocation2 + $0x64] sm:$0xf] }
 0x1ba   : > { %v6273_v20 = vpop.eup %6272  ;;  %v894_v47 = vadd.f32 1.0, %v6271_v26  ;;  %v2513_v17 = vrot.slane %v2511_v5, 5  ;;  %v7566_v45 = vrot.slane %v2478_v18, 4  ;;  %v7568_v3 = vrot.slane %v2481_v19, 5  ;;  %v7584_v19 = vld [vmem:[#allocation2 + $0x44] sm:$0x1] }
 0x1bb   : > { %v3109_v57 = vsel %vm6744_vm8, %v3104_v34, %v3108_v0  ;;  %v897_v28 = vadd.f32 1.0, %v6273_v20  ;;  %v2509_v46 = vrot.slane %v2508_v58, 4  ;;  %v2491_v13 = vshrl.u32 %v7416_v51, 16  ;;  %9345 = vst [vmem:[#allocation8_spill] sm:$0xff] %v7584_v19  ;;  %v1731_v58 = vld [vmem:[#allocation2 + $0x48] sm:$0xf] }
 0x1bc   : > { %v5767_v52 = vcombine.low %v3099_v41, %v3109_v57  ;;  %v6275_v33 = vpop.eup %6274  ;;  %6278 = vrcp.f32 %v894_v47  ;;  %4106 = vrot.lane.b32.xlu1 %v5753_v12, %s6492_s23  ;;  %v2518_v55 = vor.u32 %v2517_v49, %v2513_v17  ;;  %v7578_v36 = vrot.slane %v3135_v61, 4  ;;  %v7596_v49 = vld [vmem:[#allocation2 + $0x54] sm:$0xf] }
 0x1bd   : > { %6280 = vrcp.f32 %v897_v28  ;;  %v895_v35 = vadd.f32 1.0, %v6275_v33  ;;  %v7580_v31 = vrot.slane %v3138_v29, 5  ;;  %v5706_v18 = vcombine.low %v7573_v14, %v7575_v24 }
 0x1be   : > { %4182 = vrot.lane.b32.xlu0 %v5767_v52, %s6495_s26  ;;  %v3148_v40 = vshrl.u32 %v7557_v39, 16  ;;  %v2519_v34 = vrot.slane %v2518_v55, 4  ;;  %v2523_v0 = vrot.slane %v2521_v37, 5  ;;  %v2514_v41 = vsel %vm6744_vm8, %v2509_v46, %v2513_v17  ;;  %v7603_v52 = vld [vmem:[#allocation2 + $0x58] sm:$0xf] }
 0x1bf   : > { %6282 = vrcp.f32 %v895_v35  ;;  %v2550_v61 = vshrl.u32 %v7573_v14, 16  ;;  %v3069_v29 = vor.u32 %v7543_v43, %v7539_v48  ;;  %v3072_v20 = vshll.u32 %v7348_v56, 16  ;;  %9346 = vst [vmem:[#allocation9_spill] sm:$0xff] %v7603_v52 }
 0x1c0   : > { %3852 = vrot.lane.b32.xlu1 %v5706_v18, %s6493_s24  ;;  %v2524_v5 = vsel %vm6744_vm8, %v2519_v34, %v2523_v0  ;;  %v3078_v47 = vrot.slane %v3076_v15, 4  ;;  %v3082_v57 = vshll.u32 %v7584_v19, 16  ;;  %v2553_v28 = vshll.u32 %v7573_v14, 16 }
 0x1c1   : > { %v5720_v12 = vcombine.low %v2514_v41, %v2524_v5  ;;  %v3070_v17 = vrot.slane %v3069_v29, 4  ;;  %v1915_v37 = vshrl.u32 %v1731_v58, 16  ;;  %v5752_v48 = vcombine.low %v7596_v49, %v7603_v52 }
 0x1c2   : > { %v3074_v43 = vrot.slane %v3072_v20, 5  ;;  %v1918_v33 = vshll.u32 %v1731_v58, 16  ;;  %v1924_v46 = vshll.u32 %v7493_v4, 16  ;;  %v3084_v15 = vrot.slane %v3082_v57, 5 }
 0x1c3   : > { %v6277_v35 = vpop.eup %6276  ;;  %3928 = vrot.lane.b32.xlu0 %v5720_v12, %s6496_s27  ;;  %v1917_v55 = vrot.slane %v1915_v37, 4  ;;  %v1928_v18 = vshrl.u32 %v7493_v4, 16  ;;  %v1934_v34 = vshll.u32 %v7509_v22, 16  ;;  %v2484_v5 = vor.u32 %v7568_v3, %v7566_v45 }
 0x1c4   : > { %v992_v0 = vmul.f32 %v6277_v35, %v7457_v54  ;;  %v3079_v41 = vor.u32 %v3078_v47, %v3074_v43  ;;  %v1920_v29 = vrot.slane %v1918_v33, 5  ;;  %v3075_v58 = vsel %vm6744_vm8, %v3070_v17, %v3074_v43 }
 0x1c5   : > { %v1926_v26 = vrot.slane %v1924_v46, 5  ;;  %v1930_v10 = vrot.slane %v1928_v18, 4  ;;  %v1936_v12 = vrot.slane %v1934_v34, 5  ;;  %v2487_v45 = vshll.u32 %v7416_v51, 16 }
 0x1c6   : > { %v6279_v20 = vpop.eup %6278  ;;  %v1024_v37 = vmul.f32 19.367046, %v992_v0  ;;  %v3080_v9 = vrot.slane %v3079_v41, 4  ;;  %v1921_v22 = vor.u32 %v1920_v29, %v1917_v55  ;;  %v2493_v3 = vrot.slane %v2491_v13, 4 }
 0x1c7   : > { %v6281_v57 = vpop.eup %6280  ;;  %v990_v4 = vmul.f32 %v6279_v20, %v7468_v25  ;;  %4104 = vrot.lane.b32.xlu0 %v5752_v48, %s6492_s23  ;;  %v1931_v47 = vor.u32 %v1930_v10, %v1926_v26  ;;  %v2489_v48 = vrot.slane %v2487_v45, 5  ;;  %v2485_v20 = vrot.slane %v2484_v5, 4 }
 0x1c8   : > { %v993_v54 = vmul.f32 %v6281_v57, %v7471_v38  ;;  %v6032_v35 = vround.rtne.f32 %v1024_v37  ;;  %v3085_v43 = vsel %vm6744_vm8, %v3080_v9, %v3084_v15  ;;  %v1922_v46 = vrot.slane %v1921_v22, 4 }
 0x1c9   : > { %v6283_v33 = vpop.eup %6282  ;;  %v1022_v17 = vmul.f32 19.367046, %v990_v4  ;;  %v5766_v34 = vcombine.low %v3075_v58, %v3085_v43  ;;  %v1932_v55 = vrot.slane %v1931_v47, 4  ;;  %v2497_v9 = vshll.u32 %v7442_v53, 16 }
 0x1ca   : > { %v1025_v18 = vmul.f32 19.367046, %v993_v54  ;;  %v991_v25 = vmul.f32 %v6283_v33, %v7498_v16  ;;  %v5565_v0 = vclamps-f32 %v6032_v35, 127.0  ;;  %v1927_v10 = vsel %vm6744_vm8, %v1922_v46, %v1926_v26 }
 0x1cb   : > { %v6030_v38 = vround.rtne.f32 %v1022_v17  ;;  %4180 = vrot.lane.b32.xlu1 %v5766_v34, %s6495_s26  ;;  %v1937_v41 = vsel %vm6744_vm8, %v1932_v55, %v1936_v12  ;;  %v7631_v37 = vrot.slane %v2550_v61, 4  ;;  %v2494_v26 = vor.u32 %v2493_v3, %v2489_v48  ;;  %v1698_v61 = vld [vmem:[#allocation2 + $0xa8] sm:$0xf]  ;;  %v1691_v55 = vld [vmem:[#allocation2 + $0x9c] sm:$0xf] }
 0x1cc   : > { %v6033_v51 = vround.rtne.f32 %v1025_v18  ;;  %v1023_v13 = vmul.f32 19.367046, %v991_v25  ;;  %v5919_v15 = vpack.c.bf16 %v5565_v0, %v5565_v0  ;;  %v5673_v16 = vcombine.low %v1927_v10, %v1937_v41  ;;  %v1729_v18 = vld [vmem:[#allocation2 + $0x3c] sm:$0xf]  ;;  %v7641_v10 = vld [vmem:[#allocation2 + $0x54] sm:$0xf] }
 0x1cd   : > { %v5563_v29 = vclamps-f32 %v6030_v38, 127.0  ;;  %v7633_v47 = vrot.slane %v2553_v28, 5  ;;  %v2495_v45 = vrot.slane %v2494_v26, 4  ;;  %v2499_v33 = vrot.slane %v2497_v9, 5  ;;  %v7643_v9 = vld [vmem:[#allocation2 + $0x58] sm:$0xf] }
 0x1ce   : > { %v5566_v58 = vclamps-f32 %v6033_v51, 127.0  ;;  %v6031_v57 = vround.rtne.f32 %v1023_v13  ;;  %v1503_v4 = vshrl.u32 %v5919_v15, 16  ;;  %v1506_v22 = vshll.u32 %v5919_v15, 16  ;;  %3674 = vrot.lane.b32.xlu0 %v5673_v16, %s6491_s12  ;;  %v1702_v16 = vld [vmem:[#allocation2 + $0xb0] sm:$0x1] }
 0x1cf   : > { %v5917_v54 = vpack.c.bf16 %v5563_v29, %v5563_v29  ;;  %v2490_v14 = vsel %vm6744_vm8, %v2485_v20, %v2489_v48  ;;  %v2500_v28 = vsel %vm6744_vm8, %v2495_v45, %v2499_v33  ;;  %v3111_v0 = vshrl.u32 %v7596_v49, 16 }
 0x1d0   : > { %v5920_v12 = vpack.c.bf16 %v5566_v58, %v5566_v58  ;;  %v5564_v53 = vclamps-f32 %v6031_v57, 127.0  ;;  %v1505_v35 = vrot.slane %v1503_v4, 7  ;;  %v5719_v38 = vcombine.low %v2490_v14, %v2500_v28 }
 0x1d1   : > { %v1486_v5 = vshrl.u32 %v5917_v54, 16  ;;  %v1489_v17 = vshll.u32 %v5917_v54, 16  ;;  %v3114_v20 = vshll.u32 %v7596_v49, 16  ;;  %v5705_v58 = vcombine.low %v7641_v10, %v7643_v9 }
 0x1d2   : > { %v1511_v43 = vshrl.u32 %v5920_v12, 16  ;;  %v1514_v3 = vshll.u32 %v5920_v12, 16  ;;  %v5918_v46 = vpack.c.bf16 %v5564_v53, %v5564_v53  ;;  %v1508_v25 = vor.u32 %v1506_v22, %v1505_v35  ;;  %3926 = vrot.lane.b32.xlu1 %v5719_v38, %s6496_s27  ;;  %v1695_v12 = vld [vmem:[#allocation2 + $0xa4] sm:$0x1] }
 0x1d3   : > { %v1488_v34 = vrot.slane %v1486_v5, 7  ;;  %v1509_v51 = vrot.slane %v1505_v35, 4  ;;  %3850 = vrot.lane.b32.xlu0 %v5705_v58, %s6493_s24  ;;  %v1891_v53 = vshrl.u32 %v1729_v18, 16  ;;  %v1894_v45 = vshll.u32 %v1729_v18, 16  ;;  %v7655_v35 = vpop.permute.xlu0 %3742 }
 0x1d4   : > { %v1513_v13 = vrot.slane %v1511_v43, 7  ;;  %v1494_v41 = vshrl.u32 %v5918_v46, 16  ;;  %v1497_v48 = vshll.u32 %v5918_v46, 16  ;;  %v1699_v15 = vsel %vm6873_vm12, %v1508_v25, %v1698_v61  ;;  %v2771_v43 = vld [vmem:[#allocation2 + $0x54] sm:$0xe] }
 0x1d5   : > { %v1491_v29 = vor.u32 %v1489_v17, %v1488_v34  ;;  %1700 = vst [vmem:[#allocation2 + $0xa8] sm:$0xf] %v1699_v15  ;;  %v1492_v57 = vrot.slane %v1488_v34, 4  ;;  %v1900_v33 = vshll.u32 %v7485_v23, 16  ;;  %v1896_v46 = vrot.slane %v1894_v45, 5 }
 0x1d6   : > { %v1516_v26 = vor.u32 %v1514_v3, %v1513_v13  ;;  %v1518_v4 = vrot.slane %v1513_v13, 4  ;;  %v1496_v22 = vrot.slane %v1494_v41, 7  ;;  %v1893_v3 = vrot.slane %v1891_v53, 4  ;;  %v7663_v25 = vld [vmem:[#allocation2 + $0x5c] sm:$0x1] }
 0x1d7   : > { %v1692_v54 = vsel %vm6873_vm12, %v1491_v29, %v1691_v55  ;;  %v1902_v28 = vrot.slane %v1900_v33, 5  ;;  %v1904_v18 = vshrl.u32 %v7485_v23, 16  ;;  %v1910_v38 = vshll.u32 %v7491_v6, 16  ;;  %v2772_v29 = vld [vmem:[#allocation2 + $0x60] sm:$0xe]  ;;  %v7687_v53 = vpop.permute.xlu0 %3662 }
 0x1d8   : > { %1693 = vst [vmem:[#allocation2 + $0x9c] sm:$0xf] %v1692_v54  ;;  %v1517_v5 = vsel %vm6883_vm13, %v1509_v51, %v1516_v26  ;;  %v1703_v17 = vsel %vm6891_vm14, %v1518_v4, %v1702_v16  ;;  %v1499_v14 = vor.u32 %v1497_v48, %v1496_v22  ;;  %v1501_v61 = vrot.slane %v1496_v22, 4  ;;  %v6430_v51 = vld [vmem:[%s9300_s2] ss:$0 sm:$0xff]  ;;  %v7676_v16 = vpop.permute.xlu1 %4094 }
 0x1d9   : > { %1701 = vst.msk [vmem:[#allocation2 + $0xac] sm:$0xf] %vm1142_vm1, %v1517_v5  ;;  %1704 = vst [vmem:[#allocation2 + $0xb0] sm:$0x1] %v1703_v17  ;;  %v733_v13 = vmul.f32 %v6430_v51, %v7163_v7  ;;  %v1897_v23 = vor.u32 %v1896_v46, %v1893_v3  ;;  %v1906_v41 = vrot.slane %v1904_v18, 4  ;;  %v5625_v48 = vrot.slane %v2771_v43, 9 }
 0x1da   : > { %v1500_v34 = vsel %vm6883_vm13, %v1492_v57, %v1499_v14  ;;  %v1696_v55 = vsel %vm6891_vm14, %v1501_v61, %v1695_v12  ;;  %v2873_v15 = vrot.slane %v7643_v9, 5  ;;  %v1912_v58 = vrot.slane %v1910_v38, 5  ;;  %v6431_v6 = vld [vmem:[%s9301_s3] ss:$0 sm:$0xff]  ;;  %v7693_v17 = vld [vmem:[#allocation2 + $0x68] sm:$0x1] }
 0x1db   : > { %1694 = vst.msk [vmem:[#allocation2 + $0xa0] sm:$0xf] %vm1142_vm1, %v1500_v34  ;;  %1697 = vst [vmem:[#allocation2 + $0xa4] sm:$0x1] %v1696_v55  ;;  %v7681_v57 = vadd.f32 %v6431_v6, %v733_v13  ;;  %v2876_v7 = vrot.slane %v7663_v25, 5  ;;  %v731_v26 = vmul.f32 %v6430_v51, %v7331_v8  ;;  %v1898_v4 = vrot.slane %v1897_v23, 4 }
 0x1dc   : > { %v1907_v22 = vor.u32 %v1906_v41, %v1902_v28  ;;  %v2874_v54 = vsel %vm6736_vm5, %v5625_v48, %v2873_v15  ;;  %v2875_v12 = vrot.slane %v2873_v15, 4  ;;  %v734_v5 = vmul.f32 %v6430_v51, %v7343_v60  ;;  %v7703_v55 = vld [vmem:[#allocation2 + $0x5c] sm:$0x1]  ;;  %v2161_v60 = vld [vmem:[#allocation2 + $0x54] sm:$0xe]  ;;  %v7710_v48 = vpop.permute.xlu1 %3840  ;;  %v7712_v15 = vpop.permute.xlu0 %3998 }
 0x1dd   : > { %v5537_v45 = vmul.f32 -1.442695, %v7681_v57  ;;  %v7690_v33 = vadd.f32 %v6431_v6, %v731_v26  ;;  %v5626_v14 = vrot.slane %v2772_v29, 9  ;;  %v1903_v8 = vsel %vm6744_vm8, %v1898_v4, %v1902_v28  ;;  %v2162_v41 = vld [vmem:[#allocation2 + $0x60] sm:$0xe] }
 0x1de   : > { %v1908_v61 = vrot.slane %v1907_v22, 4  ;;  %v2877_v43 = vsel %vm6736_vm5, %v2875_v12, %v2876_v7  ;;  %v2880_v3 = vrot.slane %v7575_v24, 5  ;;  %v7701_v34 = vadd.f32 %v6431_v6, %v734_v5  ;;  %v7719_v4 = vld [vmem:[#allocation2 + $0x68] sm:$0x1] }
 0x1df   : > { %6284 = vpow2.f32 %v5537_v45  ;;  %v5737_v46 = vcombine.low %v2874_v54, %v2877_v43  ;;  %v5535_v18 = vmul.f32 -1.442695, %v7690_v33  ;;  %v2883_v23 = vrot.slane %v7693_v17, 5 }
 0x1e0   : > { %v1913_v38 = vsel %vm6744_vm8, %v1908_v61, %v1912_v58  ;;  %v2881_v28 = vsel %vm6736_vm5, %v5626_v14, %v2880_v3  ;;  %v2882_v13 = vrot.slane %v2880_v3, 4  ;;  %v5538_v7 = vmul.f32 -1.442695, %v7701_v34  ;;  %v7717_v58 = vld [vmem:[#allocation2 + $0x58] sm:$0xf] }
 0x1e1   : > { %v5672_v29 = vcombine.low %v1903_v8, %v1913_v38  ;;  %4010 = vrot.lane.b32.xlu0 %v5737_v46, %s6494_s25  ;;  %6286 = vpow2.f32 %v5535_v18  ;;  %v732_v26 = vmul.f32 %v6430_v51, %v7356_v63  ;;  %v5610_v54 = vrot.slane %v2161_v60, 9  ;;  %v7728_v8 = vld [vmem:[#allocation2 + $0x64] sm:$0xf]  ;;  %v7730_v51 = vld [vmem:[#allocation2 + $0x68] sm:$0x1] }
 0x1e2   : > { %v2884_v22 = vsel %vm6736_vm5, %v2882_v13, %v2883_v23  ;;  %v2272_v12 = vrot.slane %v7717_v58, 5  ;;  %v2275_v45 = vrot.slane %v7703_v55, 5  ;;  %6288 = vpow2.f32 %v5538_v7  ;;  %9347 = vst [vmem:[#allocation10_spill] sm:$0xff] %v7730_v51  ;;  %v7749_v7 = vpop.permute.xlu0 %3744 }
 0x1e3   : > { %3672 = vrot.lane.b32.xlu1 %v5672_v29, %s6491_s12  ;;  %v5738_v5 = vcombine.low %v2881_v28, %v2884_v22  ;;  %v7726_v14 = vadd.f32 %v6431_v6, %v732_v26  ;;  %v5611_v63 = vrot.slane %v2162_v41, 9  ;;  %v2279_v3 = vrot.slane %v7728_v8, 5  ;;  %v7747_v29 = vpop.permute.xlu1 %3838 }
 0x1e4   : > { %v2273_v61 = vsel %vm6736_vm5, %v5610_v54, %v2272_v12  ;;  %v2274_v43 = vrot.slane %v2272_v12, 4  ;;  %v2282_v46 = vrot.slane %v7719_v4, 5  ;;  %v3141_v60 = vor.u32 %v7580_v31, %v7578_v36 }
 0x1e5   : > { %v5536_v18 = vmul.f32 -1.442695, %v7726_v14  ;;  %v3144_v6 = vshll.u32 %v7557_v39, 16  ;;  %v3150_v38 = vrot.slane %v3148_v40, 4  ;;  %v2280_v13 = vsel %vm6736_vm5, %v5611_v63, %v2279_v3  ;;  %v2958_v40 = vld [vmem:[#allocation2 + $0x78] sm:$0xf] }
 0x1e6   : > { %v2276_v28 = vsel %vm6736_vm5, %v2274_v43, %v2275_v45  ;;  %v2281_v23 = vrot.slane %v2279_v3, 4  ;;  %v3154_v41 = vshll.u32 %v7730_v51, 16  ;;  %v3142_v31 = vrot.slane %v3141_v60, 4 }
 0x1e7   : > { %4012 = vrot.lane.b32.xlu1 %v5738_v5, %s6494_s25  ;;  %6290 = vpow2.f32 %v5536_v18  ;;  %v5690_v36 = vcombine.low %v2273_v61, %v2276_v28  ;;  %v3146_v26 = vrot.slane %v3144_v6, 5  ;;  %v2563_v22 = vshrl.u32 %v7575_v24, 16 }
 0x1e8   : > { %v7755_v54 = vrot.slane %v3111_v0, 4  ;;  %v3124_v12 = vshrl.u32 %v7603_v52, 16  ;;  %v2283_v45 = vsel %vm6736_vm5, %v2281_v23, %v2282_v46  ;;  %v7762_v5 = vrot.slane %v3114_v20, 5 }
 0x1e9   : > { %v6285_v63 = vpop.eup %6284  ;;  %3756 = vrot.lane.b32.xlu0 %v5690_v36, %s6490_s11  ;;  %v5691_v61 = vcombine.low %v2280_v13, %v2283_v45  ;;  %v3151_v43 = vor.u32 %v3150_v38, %v3146_v26  ;;  %v3156_v3 = vrot.slane %v3154_v41, 5  ;;  %v2526_v18 = vshrl.u32 %v7641_v10, 16  ;;  %v7772_v13 = vld [vmem:[#allocation2 + $0x7c] sm:$0xf]  ;;  %v7775_v36 = vpop.permute.xlu1 %4000 }
 0x1ea   : > { %v2529_v0 = vshll.u32 %v7641_v10, 16  ;;  %v900_v60 = vadd.f32 1.0, %v6285_v63  ;;  %v3183_v6 = vshrl.u32 %v2958_v40, 16  ;;  %v3147_v46 = vsel %vm6744_vm8, %v3142_v31, %v3146_v26  ;;  %9348 = vst [vmem:[#allocation11_spill] sm:$0xff] %v7772_v13  ;;  %v7777_v45 = vpop.permute.xlu0 %4174 }
 0x1eb   : > { %v6287_v28 = vpop.eup %6286  ;;  %3758 = vrot.lane.b32.xlu1 %v5691_v61, %s6490_s11  ;;  %v3152_v49 = vrot.slane %v3151_v43, 4  ;;  %v3186_v20 = vshll.u32 %v2958_v40, 16  ;;  %v2556_v23 = vor.u32 %v7633_v47, %v7631_v37  ;;  %v2559_v41 = vshll.u32 %v7575_v24, 16 }
 0x1ec   : > { %6292 = vrcp.f32 %v900_v60  ;;  %v898_v38 = vadd.f32 1.0, %v6287_v28  ;;  %v2565_v10 = vrot.slane %v2563_v22, 4  ;;  %v6289_v63 = vpop.eup %6288  ;;  %v5755_v26 = vcombine.low %v2958_v40, %v7772_v13 }
 0x1ed   : > { %v3157_v31 = vsel %vm6744_vm8, %v3152_v49, %v3156_v3  ;;  %v2557_v61 = vrot.slane %v2556_v23, 4  ;;  %v2569_v37 = vshll.u32 %v7693_v17, 16  ;;  %v901_v47 = vadd.f32 1.0, %v6289_v63  ;;  %v7792_v49 = vld [vmem:[#allocation2 + $0x78] sm:$0xf] }
 0x1ee   : > { %6294 = vrcp.f32 %v898_v38  ;;  %v5769_v43 = vcombine.low %v3147_v46, %v3157_v31  ;;  %v2561_v60 = vrot.slane %v2559_v41, 5  ;;  %v7785_v28 = vrot.slane %v2526_v18, 4  ;;  %v7794_v46 = vld [vmem:[#allocation2 + $0x7c] sm:$0xf] }
 0x1ef   : > { %v7787_v32 = vrot.slane %v2529_v0, 5  ;;  %4110 = vrot.lane.b32.xlu1 %v5755_v26, %s6492_s23  ;;  %6296 = vrcp.f32 %v901_v47  ;;  %v2571_v40 = vrot.slane %v2569_v37, 5  ;;  %v7797_v18 = vrot.slane %v3183_v6, 4  ;;  %v7802_v63 = vld [vmem:[#allocation2 + $0x5c] sm:$0x1]  ;;  %v7808_v47 = vpop.permute.xlu1 %3746 }
 0x1f0   : > { %4186 = vrot.lane.b32.xlu0 %v5769_v43, %s6495_s26  ;;  %v2566_v17 = vor.u32 %v2565_v10, %v2561_v60  ;;  %v5708_v41 = vcombine.low %v7792_v49, %v7794_v46  ;;  %9349 = vst [vmem:[#allocation12_spill] sm:$0xff] %v7802_v63  ;;  %v7804_v26 = vrot.slane %v3186_v20, 5  ;;  %v2562_v10 = vsel %vm6744_vm8, %v2557_v61, %v2561_v60  ;;  %v7810_v43 = vpop.permute.xlu0 %3920  ;;  %v7820_v60 = vld [vmem:[#allocation2 + $0x6c] sm:$0xf] }
 0x1f1   : > { %v6291_v23 = vpop.eup %6290  ;;  %v2598_v38 = vshrl.u32 %v7792_v49, 16  ;;  %v3117_v24 = vor.u32 %v7762_v5, %v7755_v54  ;;  %v3120_v20 = vshll.u32 %v7603_v52, 16  ;;  %v3126_v6 = vrot.slane %v3124_v12, 4 }
 0x1f2   : > { %v899_v31 = vadd.f32 1.0, %v6291_v23  ;;  %v2567_v37 = vrot.slane %v2566_v17, 4  ;;  %v1735_v23 = vld [vmem:[#allocation2 + $0x60] sm:$0xf]  ;;  %v7822_v17 = vld [vmem:[#allocation2 + $0x70] sm:$0xf] }
 0x1f3   : > { %3856 = vrot.lane.b32.xlu1 %v5708_v41, %s6493_s24  ;;  %9350 = vst [vmem:[#allocation13_spill] sm:$0xff] %v7822_v17  ;;  %v3130_v22 = vshll.u32 %v7802_v63, 16  ;;  %v5754_v54 = vcombine.low %v7820_v60, %v7822_v17  ;;  %v3118_v5 = vrot.slane %v3117_v24, 4  ;;  %v3122_v0 = vrot.slane %v3120_v20, 5  ;;  %v7836_v1 = vpop.permute.xlu1 %4098 }
 0x1f4   : > { %6298 = vrcp.f32 %v899_v31  ;;  %v2572_v61 = vsel %vm6744_vm8, %v2567_v37, %v2571_v40  ;;  %v1963_v51 = vshrl.u32 %v1735_v23, 16  ;;  %v1966_v39 = vshll.u32 %v1735_v23, 16  ;;  %9351 = vst [vmem:[#allocation14_spill] sm:$0xff] %v7836_v1  ;;  %v7838_v23 = vpop.permute.xlu0 %4096 }
 0x1f5   : > { %v5722_v41 = vcombine.low %v2562_v10, %v2572_v61  ;;  %v3132_v31 = vrot.slane %v3130_v22, 5  ;;  %v1972_v40 = vshll.u32 %v7728_v8, 16  ;;  %v3123_v12 = vsel %vm6744_vm8, %v3118_v5, %v3122_v0 }
 0x1f6   : > { %v6293_v3 = vpop.eup %6292  ;;  %v3127_v52 = vor.u32 %v3126_v6, %v3122_v0  ;;  %v1976_v10 = vshrl.u32 %v7728_v8, 16  ;;  %v1965_v21 = vrot.slane %v1963_v51, 4  ;;  %v1968_v24 = vrot.slane %v1966_v39, 5 }
 0x1f7   : > { %v996_v37 = vmul.f32 %v6293_v3, %v7681_v57  ;;  %3932 = vrot.lane.b32.xlu0 %v5722_v41, %s6496_s27  ;;  %v1974_v20 = vrot.slane %v1972_v40, 5  ;;  %v1982_v22 = vshll.u32 %v7719_v4, 16  ;;  %v7841_v5 = vrot.slane %v2598_v38, 4 }
 0x1f8   : > { %v6295_v61 = vpop.eup %6294  ;;  %v3128_v3 = vrot.slane %v3127_v52, 4  ;;  %v1978_v41 = vrot.slane %v1976_v10, 4  ;;  %v2601_v8 = vshll.u32 %v7792_v49, 16  ;;  %v1969_v0 = vor.u32 %v1968_v24, %v1965_v21  ;;  %v7857_v24 = vpop.permute.xlu1 %3844 }
 0x1f9   : > { %v1028_v19 = vmul.f32 19.367046, %v996_v37  ;;  %v994_v57 = vmul.f32 %v6295_v61, %v7690_v33  ;;  %v6297_v56 = vpop.eup %6296  ;;  %v1984_v51 = vrot.slane %v1982_v22, 5  ;;  %v2532_v38 = vor.u32 %v7787_v32, %v7785_v28  ;;  %9353 = vst [vmem:[#allocation15_spill] sm:$0xff] %v7857_v24  ;;  %v7859_v32 = vpop.permute.xlu0 %3666  ;;  %v7910_v24 = vld [vmem:[#allocation2 + $0x80] sm:$0x1] }
 0x1fa   : > { %v997_v4 = vmul.f32 %v6297_v56, %v7701_v34  ;;  %v3133_v40 = vsel %vm6744_vm8, %v3128_v3, %v3132_v31  ;;  %v1970_v33 = vrot.slane %v1969_v0, 4  ;;  %v1979_v52 = vor.u32 %v1978_v41, %v1974_v20 }
 0x1fb   : > { %v6036_v39 = vround.rtne.f32 %v1028_v19  ;;  %v1026_v6 = vmul.f32 19.367046, %v994_v57  ;;  %4108 = vrot.lane.b32.xlu0 %v5754_v54, %s6492_s23  ;;  %v5768_v37 = vcombine.low %v3123_v12, %v3133_v40  ;;  %v2535_v54 = vshll.u32 %v7643_v9, 16 }
 0x1fc   : > { %v1029_v49 = vmul.f32 19.367046, %v997_v4  ;;  %v1975_v56 = vsel %vm6744_vm8, %v1970_v33, %v1974_v20  ;;  %v1980_v34 = vrot.slane %v1979_v52, 4  ;;  %v9352_v31 = vshrl.u32 %v7643_v9, 16 }
 0x1fd   : > { %v5569_v10 = vclamps-f32 %v6036_v39, 127.0  ;;  %v6034_v61 = vround.rtne.f32 %v1026_v6  ;;  %4184 = vrot.lane.b32.xlu1 %v5768_v37, %s6495_s26  ;;  %v2533_v0 = vrot.slane %v2532_v38, 4  ;;  %v2537_v20 = vrot.slane %v2535_v54, 5  ;;  %v7871_v54 = vpop.permute.xlu0 %3842 }
 0x1fe   : > { %v6299_v19 = vpop.eup %6298  ;;  %v2541_v12 = vrot.slane %v9352_v31, 4  ;;  %v6037_v57 = vround.rtne.f32 %v1029_v49  ;;  %v1985_v41 = vsel %vm6744_vm8, %v1980_v34, %v1984_v51  ;;  %v2545_v39 = vshll.u32 %v7663_v25, 16  ;;  %v7869_v34 = vpop.permute.xlu1 %3918 }
 0x1ff   : > { %v5923_v28 = vpack.c.bf16 %v5569_v10, %v5569_v10  ;;  %v5567_v22 = vclamps-f32 %v6034_v61, 127.0  ;;  %v995_v3 = vmul.f32 %v6299_v19, %v7726_v14  ;;  %v7865_v33 = vrot.slane %v2601_v8, 5  ;;  %v1712_v19 = vld [vmem:[#allocation2 + $0xc0] sm:$0xf] }
 0x200   : > { %v5570_v40 = vclamps-f32 %v6037_v57, 127.0  ;;  %v5675_v52 = vcombine.low %v1975_v56, %v1985_v41  ;;  %v2542_v10 = vor.u32 %v2541_v12, %v2537_v20  ;;  %v2547_v38 = vrot.slane %v2545_v39, 5  ;;  %v1705_v57 = vld [vmem:[#allocation2 + $0xb4] sm:$0xf] }
 0x201   : > { %v1537_v6 = vshrl.u32 %v5923_v28, 16  ;;  %v1540_v4 = vshll.u32 %v5923_v28, 16  ;;  %v5921_v9 = vpack.c.bf16 %v5567_v22, %v5567_v22  ;;  %v1027_v37 = vmul.f32 19.367046, %v995_v3  ;;  %v1733_v22 = vld [vmem:[#allocation2 + $0x54] sm:$0xf] }
 0x202   : > { %v5924_v14 = vpack.c.bf16 %v5570_v40, %v5570_v40  ;;  %3678 = vrot.lane.b32.xlu0 %v5675_v52, %s6491_s12  ;;  %v2543_v25 = vrot.slane %v2542_v10, 4  ;;  %v2538_v12 = vsel %vm6744_vm8, %v2533_v0, %v2537_v20  ;;  %v7883_v52 = vld [vmem:[#allocation2 + $0x6c] sm:$0xf]  ;;  %v7885_v10 = vld [vmem:[#allocation2 + $0x70] sm:$0xf]  ;;  %v2894_v44 = vrot.slane %v7794_v46, 5 }
 0x203   : > { %v1539_v61 = vrot.slane %v1537_v6, 7  ;;  %v1520_v49 = vshrl.u32 %v5921_v9, 16  ;;  %v1523_v31 = vshll.u32 %v5921_v9, 16  ;;  %v6035_v21 = vround.rtne.f32 %v1027_v37  ;;  %v1716_v0 = vld [vmem:[#allocation2 + $0xc8] sm:$0x1] }
 0x204   : > { %v1545_v56 = vshrl.u32 %v5924_v14, 16  ;;  %v1548_v3 = vshll.u32 %v5924_v14, 16  ;;  %v2548_v39 = vsel %vm6744_vm8, %v2543_v25, %v2547_v38  ;;  %v5707_v14 = vcombine.low %v7883_v52, %v7885_v10 }
 0x205   : > { %v1542_v8 = vor.u32 %v1540_v4, %v1539_v61  ;;  %v7873_v28 = vrot.slane %v1520_v49, 7  ;;  %v5568_v41 = vclamps-f32 %v6035_v21, 127.0  ;;  %v1543_v9 = vrot.slane %v1539_v61, 4 }
 0x206   : > { %v1547_v37 = vrot.slane %v1545_v56, 7  ;;  %v5721_v49 = vcombine.low %v2538_v12, %v2548_v39  ;;  %3854 = vrot.lane.b32.xlu0 %v5707_v14, %s6493_s24  ;;  %v1939_v56 = vshrl.u32 %v1733_v22, 16  ;;  %v2773_v12 = vld [vmem:[#allocation2 + $0x6c] sm:$0xe]  ;;  %v7895_v39 = vpop.permute.xlu1 %3664  ;;  %v7907_v14 = vld [vmem:[#allocation2 + $0x74] sm:$0x1] }
 0x207   : > { %v1713_v40 = vsel %vm6873_vm12, %v1542_v8, %v1712_v19  ;;  %v1525_v4 = vor.u32 %v1523_v31, %v7873_v28  ;;  %v5922_v20 = vpack.c.bf16 %v5568_v41, %v5568_v41  ;;  %v1526_v61 = vrot.slane %v7873_v28, 4 }
 0x208   : > { %1714 = vst [vmem:[#allocation2 + $0xc0] sm:$0xf] %v1713_v40  ;;  %v1550_v31 = vor.u32 %v1548_v3, %v1547_v37  ;;  %v1552_v25 = vrot.slane %v1547_v37, 4  ;;  %3930 = vrot.lane.b32.xlu1 %v5721_v49, %s6496_s27  ;;  %v1942_v41 = vshll.u32 %v1733_v22, 16  ;;  %v7897_v40 = vpop.permute.xlu0 %4002  ;;  %v1948_v3 = vshll.u32 %v7717_v58, 16 }
 0x209   : > { %v1706_v19 = vsel %vm6873_vm12, %v1525_v4, %v1705_v57  ;;  %v1528_v38 = vshrl.u32 %v5922_v20, 16  ;;  %v1531_v8 = vshll.u32 %v5922_v20, 16  ;;  %9354 = vst [vmem:[#allocation16_spill] sm:$0xff] %v7897_v40  ;;  %v1709_v57 = vld [vmem:[#allocation2 + $0xbc] sm:$0x1]  ;;  %v1952_v4 = vshrl.u32 %v7717_v58, 16 }
 0x20a   : > { %1707 = vst [vmem:[#allocation2 + $0xb4] sm:$0xf] %v1706_v19  ;;  %v1551_v27 = vsel %vm6883_vm13, %v1543_v9, %v1550_v31  ;;  %v1717_v28 = vsel %vm6891_vm14, %v1552_v25, %v1716_v0  ;;  %v1941_v37 = vrot.slane %v1939_v56, 4  ;;  %v1944_v20 = vrot.slane %v1942_v41, 5  ;;  %v2774_v25 = vld [vmem:[#allocation2 + $0x78] sm:$0xe] }
 0x20b   : > { %1715 = vst.msk [vmem:[#allocation2 + $0xc4] sm:$0xf] %vm1142_vm1, %v1551_v27  ;;  %1718 = vst [vmem:[#allocation2 + $0xc8] sm:$0x1] %v1717_v28  ;;  %v1530_v22 = vrot.slane %v1528_v38, 7  ;;  %v1958_v49 = vshll.u32 %v7703_v55, 16 }
 0x20c   : > { %v1950_v19 = vrot.slane %v1948_v3, 5  ;;  %v1954_v9 = vrot.slane %v1952_v4, 4  ;;  %v5627_v31 = vrot.slane %v2773_v12, 9  ;;  %v2887_v0 = vrot.slane %v7885_v10, 5  ;;  %v7919_v3 = vld [vmem:[#allocation2 + $0x74] sm:$0x1]  ;;  %v7921_v4 = vpop.permute.xlu1 %4004 }
 0x20d   : > { %v1533_v21 = vor.u32 %v1531_v8, %v1530_v22  ;;  %v1535_v6 = vrot.slane %v1530_v22, 4  ;;  %v1945_v51 = vor.u32 %v1944_v20, %v1941_v37  ;;  %v1960_v58 = vrot.slane %v1958_v49, 5  ;;  %9355 = vst [vmem:[#allocation17_spill] sm:$0xff] %v7921_v4  ;;  %v7923_v22 = vpop.permute.xlu0 %3748 }
 0x20e   : > { %v1955_v27 = vor.u32 %v1954_v9, %v1950_v19  ;;  %v2888_v38 = vsel %vm6736_vm5, %v5627_v31, %v2887_v0  ;;  %v2889_v56 = vrot.slane %v2887_v0, 4  ;;  %v2890_v55 = vrot.slane %v7907_v14, 5  ;;  %9356 = vst [vmem:[#allocation18_spill] sm:$0xff] %v7923_v22  ;;  %v7937_v9 = vld [vmem:[#allocation2 + $0x80] sm:$0x1] }
 0x20f   : > { %v1534_v41 = vsel %vm6883_vm13, %v1526_v61, %v1533_v21  ;;  %v1710_v12 = vsel %vm6891_vm14, %v1535_v6, %v1709_v57  ;;  %v1946_v28 = vrot.slane %v1945_v51, 4  ;;  %v5628_v8 = vrot.slane %v2774_v25, 9  ;;  %v2163_v6 = vld [vmem:[#allocation2 + $0x6c] sm:$0xe]  ;;  %v2164_v31 = vld [vmem:[#allocation2 + $0x78] sm:$0xe] }
 0x210   : > { %1708 = vst.msk [vmem:[#allocation2 + $0xb8] sm:$0xf] %vm1142_vm1, %v1534_v41  ;;  %1711 = vst [vmem:[#allocation2 + $0xbc] sm:$0x1] %v1710_v12  ;;  %v1956_v37 = vrot.slane %v1955_v27, 4  ;;  %v2891_v20 = vsel %vm6736_vm5, %v2889_v56, %v2890_v55  ;;  %v2897_v50 = vrot.slane %v7910_v24, 5 }
 0x211   : > { %v9357_v51 = vshrl.u32 %v7820_v60, 16  ;;  %v1951_v57 = vsel %vm6744_vm8, %v1946_v28, %v1950_v19  ;;  %v5739_v49 = vcombine.low %v2888_v38, %v2891_v20  ;;  %v6432_v0 = vld [vmem:[#allocation2 + $0x4] sm:$0xf]  ;;  %v6433_v25 = vld [vmem:[#allocation2] sm:$0xf]  ;;  %v2895_v55 = vsel %vm6736_vm5, %v5628_v8, %v2894_v44 }
 0x212   : > { %v5651_v27 = vcombine.low %v6433_v25, %v6432_v0  ;;  %v1961_v56 = vsel %vm6744_vm8, %v1956_v37, %v1960_v58  ;;  %v2896_v41 = vrot.slane %v2894_v44, 4  ;;  %v7943_v12 = vld [vmem:[#allocation2 + $0x70] sm:$0xf]  ;;  %v5612_v19 = vrot.slane %v2163_v6, 9  ;;  %v7948_v20 = vld [vmem:[#allocation2 + $0x7c] sm:$0xf] }
 0x213   : > { %v7932_v21 = vrot.slane %v9357_v51, 4  ;;  %v5674_v51 = vcombine.low %v1951_v57, %v1961_v56  ;;  %4014 = vrot.lane.b32.xlu0 %v5739_v49, %s6494_s25  ;;  %v2286_v38 = vrot.slane %v7943_v12, 5  ;;  %v2289_v28 = vrot.slane %v7919_v3, 5  ;;  %v7954_v44 = vld [vmem:[#allocation2 + $0x80] sm:$0x1]  ;;  %v7962_v56 = vpop.permute.xlu1 %3750 }
 0x214   : > { %v2898_v0 = vsel %vm6736_vm5, %v2896_v41, %v2897_v50  ;;  %v5613_v58 = vrot.slane %v2164_v31, 9  ;;  %v2293_v37 = vrot.slane %v7948_v20, 5  ;;  %v2296_v8 = vrot.slane %v7937_v9, 5  ;;  %9358 = vst [vmem:[#allocation19_spill] sm:$0xff] %v7954_v44  ;;  %9359 = vst [vmem:[#allocation20_spill] sm:$0xff] %v7962_v56  ;;  %v7964_v50 = vpop.permute.xlu0 %4178 }
 0x215   : > { %v2574_v57 = vshrl.u32 %v7883_v52, 16  ;;  %3676 = vrot.lane.b32.xlu1 %v5674_v51, %s6491_s12  ;;  %v2287_v6 = vsel %vm6736_vm5, %v5612_v19, %v2286_v38  ;;  %v2288_v49 = vrot.slane %v2286_v38, 4  ;;  %v3189_v25 = vor.u32 %v7804_v26, %v7797_v18  ;;  %9360 = vst [vmem:[#allocation21_spill] sm:$0xff] %v7964_v50  ;;  %v2962_v38 = vld [vmem:[#allocation2 + $0x90] sm:$0xf] }
 0x216   : > { %v9361_v31 = vshll.u32 %v7820_v60, 16  ;;  %v2295_v61 = vrot.slane %v2293_v37, 4  ;;  %v3192_v4 = vshll.u32 %v7772_v13, 16  ;;  %v9362_v51 = vshrl.u32 %v7772_v13, 16 }
 0x217   : > { %v5740_v1 = vcombine.low %v2895_v55, %v2898_v0  ;;  %v2290_v19 = vsel %vm6736_vm5, %v2288_v49, %v2289_v28  ;;  %v2294_v18 = vsel %vm6736_vm5, %v5613_v58, %v2293_v37  ;;  %v3202_v26 = vshll.u32 %v7954_v44, 16 }
 0x218   : > { %v7968_v41 = vrot.slane %v9361_v31, 5  ;;  %v3198_v22 = vrot.slane %v9362_v51, 4  ;;  %v5692_v50 = vcombine.low %v2287_v6, %v2290_v19  ;;  %v2297_v60 = vsel %vm6736_vm5, %v2295_v61, %v2296_v8 }
 0x219   : > { %v3190_v31 = vrot.slane %v3189_v25, 4  ;;  %v3194_v56 = vrot.slane %v3192_v4, 5  ;;  %v4257_v55 = vsel %vm4254_vm15, %v5651_v27, %v7687_v53  ;;  %v7983_v0 = vrot.slane %v2574_v57, 4  ;;  %4016 = vrot.lane.b32.xlu1 %v5740_v1, %s6494_s25  ;;  %v7991_v53 = vpop.permute.xlu1 %4102  ;;  %v7993_v27 = vpop.permute.xlu0 %3924 }
 0x21a   : > { %v2577_v28 = vshll.u32 %v7883_v52, 16  ;;  %vm4335_vm1 = vcmask 392192   ;;  %3760 = vrot.lane.b32.xlu0 %v5692_v50, %s6490_s11  ;;  %v3204_v37 = vrot.slane %v3202_v26, 5  ;;  %v3231_v6 = vshrl.u32 %v2962_v38, 16  ;;  %9363 = vst [vmem:[#allocation22_spill] sm:$0xff] %v7991_v53 }
 0x21b   : > { %v3199_v58 = vor.u32 %v3198_v22, %v3194_v56  ;;  %v5693_v61 = vcombine.low %v2294_v18, %v2297_v60  ;;  %v3234_v8 = vshll.u32 %v2962_v38, 16  ;;  %v2604_v4 = vor.u32 %v7865_v33, %v7841_v5  ;;  %v8000_v50 = vld [vmem:[#allocation2 + $0x90] sm:$0xf]  ;;  %v8007_v33 = vld [vmem:[#allocation2 + $0x94] sm:$0xf] }
 0x21c   : > { %v2607_v49 = vshll.u32 %v7794_v46, 16  ;;  %v3195_v1 = vsel %vm6744_vm8, %v3190_v31, %v3194_v56  ;;  %v9364_v57 = vshrl.u32 %v7794_v46, 16  ;;  %v2617_v25 = vshll.u32 %v7910_v24, 16 }
 0x21d   : > { %v3200_v52 = vrot.slane %v3199_v58, 4  ;;  %v8002_v51 = vrot.slane %v2577_v28, 5  ;;  %v4304_v5 = vsel %vm486_vm0, %v4257_v55, %v7655_v35  ;;  %3762 = vrot.lane.b32.xlu1 %v5693_v61, %s6490_s11  ;;  %v2605_v19 = vrot.slane %v2604_v4, 4  ;;  %v8018_v28 = vld [vmem:[#allocation2 + $0x74] sm:$0x1] }
 0x21e   : > { %v2613_v22 = vrot.slane %v9364_v57, 4  ;;  %v2609_v18 = vrot.slane %v2607_v49, 5  ;;  %v2587_v56 = vshrl.u32 %v7885_v10, 16  ;;  %v8012_v46 = vsel %vm4335_vm1, %v4304_v5, %v7747_v29  ;;  %v8026_v49 = vld [vmem:[#allocation2 + $0x84] sm:$0xf]  ;;  %v8037_v57 = vpop.permute.xlu1 %3848 }
 0x21f   : > { %v3205_v24 = vsel %vm6744_vm8, %v3200_v52, %v3204_v37  ;;  %v5757_v35 = vcombine.low %v2962_v38, %v8007_v33  ;;  %v2619_v55 = vrot.slane %v2617_v25, 5  ;;  %v8020_v58 = vrot.slane %v3231_v6, 4  ;;  %v1739_v52 = vld [vmem:[#allocation2 + $0x78] sm:$0xf]  ;;  %9365 = vst [vmem:[#allocation23_spill] sm:$0xff] %v8037_v57 }
 0x220   : > { %v5771_v60 = vcombine.low %v3195_v1, %v3205_v24  ;;  %v2614_v31 = vor.u32 %v2613_v22, %v2609_v18  ;;  %v8022_v61 = vrot.slane %v3234_v8, 5  ;;  %v2646_v29 = vshrl.u32 %v8000_v50, 16  ;;  %v8032_v1 = vld [vmem:[#allocation2 + $0x94] sm:$0xf]  ;;  %v8039_v22 = vpop.permute.xlu0 %4100 }
 0x221   : > { %4114 = vrot.lane.b32.xlu1 %v5757_v35, %s6492_s23  ;;  %v2610_v38 = vsel %vm6744_vm8, %v2605_v19, %v2609_v18  ;;  %v3165_v6 = vor.u32 %v7968_v41, %v7932_v21  ;;  %v3168_v8 = vshll.u32 %v7822_v17, 16  ;;  %v2649_v25 = vshll.u32 %v8000_v50, 16 }
 0x222   : > { %4190 = vrot.lane.b32.xlu0 %v5771_v60, %s6495_s26  ;;  %v2615_v37 = vrot.slane %v2614_v31, 4  ;;  %v5710_v5 = vcombine.low %v8000_v50, %v8032_v1  ;;  %v9366_v19 = vshrl.u32 %v7822_v17, 16  ;;  %v3178_v24 = vshll.u32 %v8018_v28, 16 }
 0x223   : > { %v3207_v41 = vshrl.u32 %v8026_v49, 16  ;;  %v3166_v60 = vrot.slane %v3165_v6, 4  ;;  %v3170_v35 = vrot.slane %v3168_v8, 5  ;;  %v3210_v26 = vshll.u32 %v8026_v49, 16  ;;  %v8058_v8 = vld [vmem:[#allocation2 + $0x88] sm:$0xf] }
 0x224   : > { %v3174_v18 = vrot.slane %v9366_v19, 4  ;;  %v2620_v21 = vsel %vm6744_vm8, %v2615_v37, %v2619_v55  ;;  %v2011_v40 = vshrl.u32 %v1739_v52, 16  ;;  %v2014_v4 = vshll.u32 %v1739_v52, 16 }
 0x225   : > { %v5724_v31 = vcombine.low %v2610_v38, %v2620_v21  ;;  %3860 = vrot.lane.b32.xlu1 %v5710_v5, %s6493_s24  ;;  %v3180_v44 = vrot.slane %v3178_v24, 5  ;;  %v2020_v19 = vshll.u32 %v7948_v20, 16  ;;  %v2024_v13 = vshrl.u32 %v7948_v20, 16  ;;  %v8062_v24 = vpop.permute.xlu1 %4176  ;;  %v8064_v20 = vpop.permute.xlu0 %3670 }
 0x226   : > { %v3175_v50 = vor.u32 %v3174_v18, %v3170_v35  ;;  %v3171_v55 = vsel %vm6744_vm8, %v3166_v60, %v3170_v35  ;;  %v2013_v37 = vrot.slane %v2011_v40, 4  ;;  %v2016_v6 = vrot.slane %v2014_v4, 5 }
 0x227   : > { %3936 = vrot.lane.b32.xlu0 %v5724_v31, %s6496_s27  ;;  %v2030_v38 = vshll.u32 %v7937_v9, 16  ;;  %v2022_v21 = vrot.slane %v2020_v19, 5  ;;  %v2026_v5 = vrot.slane %v2024_v13, 4  ;;  %v2580_v18 = vor.u32 %v8002_v51, %v7983_v0 }
 0x228   : > { %v3176_v52 = vrot.slane %v3175_v50, 4  ;;  %v5756_v31 = vcombine.low %v8026_v49, %v8058_v8  ;;  %v2017_v60 = vor.u32 %v2016_v6, %v2013_v37  ;;  %v2583_v4 = vshll.u32 %v7885_v10, 16 }
 0x229   : > { %v2032_v40 = vrot.slane %v2030_v38, 5  ;;  %v2027_v35 = vor.u32 %v2026_v5, %v2022_v21  ;;  %v2581_v50 = vrot.slane %v2580_v18, 4  ;;  %v2589_v13 = vrot.slane %v2587_v56, 4  ;;  %v1737_v38 = vld [vmem:[#allocation2 + $0x6c] sm:$0xf]  ;;  %v8090_v5 = vpop.permute.xlu1 %3922  ;;  %v8092_v18 = vpop.permute.xlu0 %3846 }
 0x22a   : > { %v3181_v9 = vsel %vm6744_vm8, %v3176_v52, %v3180_v44  ;;  %v2018_v51 = vrot.slane %v2017_v60, 4  ;;  %v2585_v19 = vrot.slane %v2583_v4, 5  ;;  %v2593_v17 = vshll.u32 %v7907_v14, 16 }
 0x22b   : > { %4112 = vrot.lane.b32.xlu0 %v5756_v31, %s6492_s23  ;;  %v5770_v0 = vcombine.low %v3171_v55, %v3181_v9  ;;  %v8073_v57 = vrot.slane %v2646_v29, 4  ;;  %v8075_v49 = vrot.slane %v2649_v25, 5  ;;  %v2028_v10 = vrot.slane %v2027_v35, 4  ;;  %v8081_v55 = vld [vmem:[#allocation2 + $0x84] sm:$0xf] }
 0x22c   : > { %v2023_v44 = vsel %vm6744_vm8, %v2018_v51, %v2022_v21  ;;  %v2590_v56 = vor.u32 %v2589_v13, %v2585_v19  ;;  %v2595_v6 = vrot.slane %v2593_v17, 5  ;;  %v8083_v52 = vrot.slane %v3207_v41, 4  ;;  %v8094_v31 = vld [vmem:[#allocation2 + $0x1c] sm:$0xf]  ;;  %v8096_v17 = vld [vmem:[#allocation2 + $0x18] sm:$0xf] }
 0x22d   : > { %4188 = vrot.lane.b32.xlu1 %v5770_v0, %s6495_s26  ;;  %v8085_v14 = vrot.slane %v3210_v26, 5  ;;  %v2033_v25 = vsel %vm6744_vm8, %v2028_v10, %v2032_v40  ;;  %v2586_v26 = vsel %vm6744_vm8, %v2581_v50, %v2585_v19  ;;  %v4370_v40 = vsel %vm4368_vm2, %v8012_v46, %v7869_v34  ;;  %v2775_v35 = vld [vmem:[#allocation2 + $0x84] sm:$0xe]  ;;  %v8111_v19 = vld [vmem:[#allocation2 + $0x8c] sm:$0x1] }
 0x22e   : > { %v5677_v21 = vcombine.low %v2023_v44, %v2033_v25  ;;  %v2591_v60 = vrot.slane %v2590_v56, 4  ;;  %v1987_v9 = vshrl.u32 %v1737_v38, 16  ;;  %v1990_v51 = vshll.u32 %v1737_v38, 16  ;;  %v8113_v44 = vld [vmem:[#allocation2 + $0x88] sm:$0xf] }
 0x22f   : > { %v1996_v50 = vshll.u32 %v7943_v12, 16  ;;  %v2000_v46 = vshrl.u32 %v7943_v12, 16  ;;  %v2006_v56 = vshll.u32 %v7919_v3, 16  ;;  %v5709_v25 = vcombine.low %v8081_v55, %v8113_v44  ;;  %v8124_v12 = vpop.permute.xlu1 %3668  ;;  %v8126_v3 = vpop.permute.xlu0 %4006  ;;  %v2776_v0 = vld [vmem:[#allocation2 + $0x90] sm:$0xe] }
 0x230   : > { %3682 = vrot.lane.b32.xlu0 %v5677_v21, %s6491_s12  ;;  %v2596_v13 = vsel %vm6744_vm8, %v2591_v60, %v2595_v6  ;;  %v1989_v34 = vrot.slane %v1987_v9, 4  ;;  %v1992_v21 = vrot.slane %v1990_v51, 5  ;;  %v5629_v60 = vrot.slane %v2775_v35, 9  ;;  %v6437_v35 = vld [vmem:[#allocation2 + $0xc] sm:$0xf] }
 0x231   : > { %v5723_v10 = vcombine.low %v2586_v26, %v2596_v13  ;;  %v1998_v6 = vrot.slane %v1996_v50, 5  ;;  %v4403_v38 = vsel %vm4401_vm3, %v4370_v40, %v7712_v15  ;;  %v2002_v29 = vrot.slane %v2000_v46, 4  ;;  %v3375_v13 = vld [vmem:[#allocation2 + $0x24] sm:$0xe]  ;;  %v6436_v50 = vld [vmem:[#allocation2 + $0x10] sm:$0xf] }
 0x232   : > { %v2901_v26 = vrot.slane %v8113_v44, 5  ;;  %v2904_v9 = vrot.slane %v8111_v19, 5  ;;  %v1993_v51 = vor.u32 %v1992_v21, %v1989_v34  ;;  %v5652_v37 = vcombine.low %v6437_v35, %v6436_v50  ;;  %v8137_v21 = vld [vmem:[#allocation2 + $0x98] sm:$0x1]  ;;  %v8151_v35 = vld [vmem:[#allocation2 + $0x8c] sm:$0x1] }
 0x233   : > { %3934 = vrot.lane.b32.xlu1 %v5723_v10, %s6496_s27  ;;  %v2003_v10 = vor.u32 %v2002_v29, %v1998_v6  ;;  %v2008_v15 = vrot.slane %v2006_v56, 5  ;;  %v4436_v34 = vsel %vm4434_vm4, %v4403_v38, %v7676_v16 }
 0x234   : > { %3858 = vrot.lane.b32.xlu0 %v5709_v25, %s6493_s24  ;;  %v2902_v40 = vsel %vm6736_vm5, %v5629_v60, %v2901_v26  ;;  %v2903_v46 = vrot.slane %v2901_v26, 4  ;;  %v1994_v4 = vrot.slane %v1993_v51, 4  ;;  %v8133_v41 = vsel %vm4254_vm15, %v5652_v37, %v7895_v39  ;;  %v2165_v51 = vld [vmem:[#allocation2 + $0x84] sm:$0xe] }
 0x235   : > { %v5636_v25 = vrot.slane %v3375_v13, 9  ;;  %v2004_v50 = vrot.slane %v2003_v10, 4  ;;  %v4469_v56 = vsel %vm4467_vm6, %v4436_v34, %v7777_v45  ;;  %v9367_v60 = vrot.slane %v7126_v2, 5  ;;  %v8161_v2 = vld [vmem:[#allocation2 + $0x88] sm:$0xf]  ;;  %v8167_v34 = vpop.permute.xlu0 %3752 }
 0x236   : > { %v2905_v29 = vsel %vm6736_vm5, %v2903_v46, %v2904_v9  ;;  %v1999_v39 = vsel %vm6744_vm8, %v1994_v4, %v1998_v6  ;;  %4669 = vmatmul.mubr.bf16.vlgmr.msra.gmra.mrb[0].mxu1 %v4469_v56  ;;  %v5630_v13 = vrot.slane %v2776_v0, 9  ;;  %v2166_v9 = vld [vmem:[#allocation2 + $0x90] sm:$0xe]  ;;  %v9369_v10 = vrot.slane %v7336_v59, 5  ;;  %v8165_v0 = vpop.permute.xlu1 %4008  ;;  %9371 = vst [vmem:[#allocation25_spill] sm:$0xff] %v8167_v34 }
 0x237   : > { %v3449_v26 = vrot.slane %v9367_v60, 4  ;;  %v5741_v37 = vcombine.low %v2902_v40, %v2905_v29  ;;  %v9368_v16 = vmov %v9367_v60  ;;  %v2009_v45 = vsel %vm6744_vm8, %v2004_v50, %v2008_v15  ;;  %v8163_v40 = vld [vmem:[#allocation2 + $0x98] sm:$0x1]  ;;  %9370 = vst [vmem:[#allocation24_spill] sm:$0xff] %v8165_v0 }
 0x238   : > { %v3448_v38 = vsel %vm6736_vm5, %v5636_v25, %v9368_v16  ;;  %v2908_v4 = vrot.slane %v8032_v1, 5  ;;  %v2911_v6 = vrot.slane %v8137_v21, 5  ;;  %v5676_v25 = vcombine.low %v1999_v39, %v2009_v45  ;;  %v2984_v45 = vld [vmem:[#allocation2 + $0x98] sm:$0x1] }
 0x239   : > { %v3451_v46 = vsel %vm6736_vm5, %v3449_v26, %v9369_v10  ;;  %4018 = vrot.lane.b32.xlu0 %v5741_v37, %s6494_s25  ;;  %v5614_v59 = vrot.slane %v2165_v51, 9  ;;  %v2300_v50 = vrot.slane %v8161_v2, 5  ;;  %v2303_v60 = vrot.slane %v8151_v35, 5  ;;  %v8174_v26 = vld [vmem:[#allocation2 + $0x94] sm:$0xf] }
 0x23a   : > { %v5780_v15 = vcombine.low %v3448_v38, %v3451_v46  ;;  %v2909_v29 = vsel %vm6736_vm5, %v5630_v13, %v2908_v4  ;;  %v2910_v56 = vrot.slane %v2908_v4, 4  ;;  %v5615_v16 = vrot.slane %v2166_v9, 9  ;;  %3680 = vrot.lane.b32.xlu1 %v5676_v25, %s6491_s12  ;;  %v8193_v53 = vpop.permute.xlu1 %3754 }
 0x23b   : > { %v2301_v39 = vsel %vm6736_vm5, %v5614_v59, %v2300_v50  ;;  %v2302_v37 = vrot.slane %v2300_v50, 4  ;;  %v2307_v51 = vrot.slane %v8174_v26, 5  ;;  %v2310_v38 = vrot.slane %v8163_v40, 5 }
 0x23c   : > { %5805 = vmatprep.mubr.msk.bf16.mxu1 %vm4254_vm15, %v5780_v15  ;;  %v2912_v13 = vsel %vm6736_vm5, %v2910_v56, %v2911_v6  ;;  %v3237_v10 = vor.u32 %v8022_v61, %v8020_v58  ;;  %v3240_v9 = vshll.u32 %v8007_v33, 16  ;;  %v9372_v46 = vshrl.u32 %v8007_v33, 16  ;;  %v2966_v56 = vld [vmem:[#allocation2 + $0xa8] sm:$0xf]  ;;  %v8195_v58 = vpop.permute.xlu0 %4182 }
 0x23d   : > { %v5742_v25 = vcombine.low %v2909_v29, %v2912_v13  ;;  %v2304_v15 = vsel %vm6736_vm5, %v2302_v37, %v2303_v60  ;;  %v2308_v59 = vsel %vm6736_vm5, %v5615_v16, %v2307_v51  ;;  %v2309_v50 = vrot.slane %v2307_v51, 4 }
 0x23e   : > { %v3246_v4 = vrot.slane %v9372_v46, 4  ;;  %v5694_v0 = vcombine.low %v2301_v39, %v2304_v15  ;;  %v3238_v63 = vrot.slane %v3237_v10, 4  ;;  %v3242_v34 = vrot.slane %v3240_v9, 5 }
 0x23f   : > { %v3250_v6 = vshll.u32 %v2984_v45, 16  ;;  %v9373_v61 = vcombine.low %v8096_v17, %v8094_v31  ;;  %v9374_v60 = vshrl.u32 %v8081_v55, 16  ;;  %4020 = vrot.lane.b32.xlu1 %v5742_v25, %s6494_s25  ;;  %v2311_v39 = vsel %vm6736_vm5, %v2309_v50, %v2310_v38 }
 0x240   : > { %v9375_v37 = vshll.u32 %v8081_v55, 16  ;;  %v2635_v45 = vshrl.u32 %v8113_v44, 16  ;;  %3764 = vrot.lane.b32.xlu0 %v5694_v0, %s6490_s11  ;;  %v3247_v31 = vor.u32 %v3246_v4, %v3242_v34  ;;  %v4306_v13 = vsel %vm486_vm0, %v8133_v41, %v7749_v7 }
 0x241   : > { %v4263_v29 = vsel %vm4254_vm15, %v9373_v61, %v7859_v32  ;;  %v8205_v16 = vrot.slane %v9374_v60, 4  ;;  %v3252_v17 = vrot.slane %v3250_v6, 5  ;;  %v2359_v32 = vld [vmem:[#allocation2 + $0xa8] sm:$0xf]  ;;  %v5695_v10 = vcombine.low %v2308_v59, %v2311_v39  ;;  %v8234_v6 = vpop.permute.xlu1 %4106  ;;  %v8236_v61 = vpop.permute.xlu0 %3928  ;;  %v2983_v39 = vld [vmem:[#allocation2 + $0x8c] sm:$0x1] }
 0x242   : > { %v8212_v51 = vrot.slane %v9375_v37, 5  ;;  %v3279_v9 = vshrl.u32 %v2966_v56, 16  ;;  %v3282_v46 = vshll.u32 %v2966_v56, 16  ;;  %v3243_v38 = vsel %vm6744_vm8, %v3238_v63, %v3242_v34  ;;  %v8232_v34 = vld [vmem:[#allocation2 + $0xac] sm:$0xf] }
 0x243   : > { %v3248_v55 = vrot.slane %v3247_v31, 4  ;;  %v2652_v25 = vor.u32 %v8075_v49, %v8073_v57  ;;  %v2655_v15 = vshll.u32 %v8032_v1, 16  ;;  %3766 = vrot.lane.b32.xlu1 %v5695_v10, %s6490_s11  ;;  %v9376_v0 = vshrl.u32 %v8032_v1, 16 }
 0x244   : > { %v2665_v50 = vshll.u32 %v8137_v21, 16  ;;  %v2694_v7 = vshrl.u32 %v2359_v32, 16  ;;  %v2697_v41 = vshll.u32 %v2359_v32, 16  ;;  %v4308_v59 = vsel %vm486_vm0, %v4263_v29, %v7808_v47  ;;  %v8245_v29 = vld [vmem:[#allocation2 + $0x9c] sm:$0xf] }
 0x245   : > { %v2661_v4 = vrot.slane %v9376_v0, 4  ;;  %v3253_v63 = vsel %vm6744_vm8, %v3248_v55, %v3252_v17  ;;  %v2653_v57 = vrot.slane %v2652_v25, 4  ;;  %v2657_v49 = vrot.slane %v2655_v15, 5  ;;  %v8251_v55 = vld [vmem:[#allocation2 + $0xac] sm:$0xf] }
 0x246   : > { %v8240_v1 = vsel %vm4335_vm1, %v4308_v59, %v7871_v54  ;;  %v4339_v21 = vsel %vm4335_vm1, %v4306_v13, %v7710_v48  ;;  %v5773_v60 = vcombine.low %v3243_v38, %v3253_v63  ;;  %v5759_v47 = vcombine.low %v2966_v56, %v8232_v34 }
 0x247   : > { %v8247_v37 = vrot.slane %v3279_v9, 4  ;;  %v8249_v31 = vrot.slane %v3282_v46, 5  ;;  %v2662_v17 = vor.u32 %v2661_v4, %v2657_v49  ;;  %v2667_v10 = vrot.slane %v2665_v50, 5  ;;  %v1743_v9 = vld [vmem:[#allocation2 + $0x90] sm:$0xf] }
 0x248   : > { %4194 = vrot.lane.b32.xlu0 %v5773_v60, %s6495_s26  ;;  %4118 = vrot.lane.b32.xlu1 %v5759_v47, %s6492_s23  ;;  %v3292_v48 = vshrl.u32 %v8232_v34, 16  ;;  %v8256_v54 = vrot.slane %v2694_v7, 4  ;;  %v8258_v56 = vrot.slane %v2697_v41, 5  ;;  %v5712_v13 = vcombine.low %v2359_v32, %v8251_v55  ;;  %v8274_v60 = vpop.permute.xlu0 %4104 }
 0x249   : > { %v2658_v46 = vsel %vm6744_vm8, %v2653_v57, %v2657_v49  ;;  %v2663_v38 = vrot.slane %v2662_v17, 4  ;;  %v3213_v25 = vor.u32 %v8085_v14, %v8083_v52  ;;  %v3216_v15 = vshll.u32 %v8058_v8, 16  ;;  %v8272_v49 = vpop.permute.xlu1 %3852 }
 0x24a   : > { %v2707_v0 = vshrl.u32 %v8251_v55, 16  ;;  %v3255_v4 = vshrl.u32 %v8245_v29, 16  ;;  %v9377_v50 = vshrl.u32 %v8058_v8, 16  ;;  %v3226_v41 = vshll.u32 %v2983_v39, 16 }
 0x24b   : > { %v2668_v32 = vsel %vm6744_vm8, %v2663_v38, %v2667_v10  ;;  %v3214_v59 = vrot.slane %v3213_v25, 4  ;;  %v3218_v63 = vrot.slane %v3216_v15, 5  ;;  %v2059_v57 = vshrl.u32 %v1743_v9, 16 }
 0x24c   : > { %v3222_v7 = vrot.slane %v9377_v50, 4  ;;  %v5726_v52 = vcombine.low %v2658_v46, %v2668_v32  ;;  %3864 = vrot.lane.b32.xlu1 %v5712_v13, %s6493_s24  ;;  %v3258_v14 = vshll.u32 %v8245_v29, 16  ;;  %v2062_v47 = vshll.u32 %v1743_v9, 16  ;;  %v8284_v13 = vld [vmem:[#allocation2 + $0xa0] sm:$0xf] }
 0x24d   : > { %v2068_v8 = vshll.u32 %v8174_v26, 16  ;;  %v3228_v39 = vrot.slane %v3226_v41, 5  ;;  %v2061_v50 = vrot.slane %v2059_v57, 4  ;;  %v2072_v10 = vshrl.u32 %v8174_v26, 16 }
 0x24e   : > { %v3223_v17 = vor.u32 %v3222_v7, %v3218_v63  ;;  %3940 = vrot.lane.b32.xlu0 %v5726_v52, %s6496_s27  ;;  %v2064_v38 = vrot.slane %v2062_v47, 5  ;;  %v2078_v15 = vshll.u32 %v8163_v40, 16  ;;  %v4372_v46 = vsel %vm4368_vm2, %v4339_v21, %v7810_v43  ;;  %v3376_v47 = vld [vmem:[#allocation2 + $0x30] sm:$0xe] }
 0x24f   : > { %v2070_v25 = vrot.slane %v2068_v8, 5  ;;  %v3219_v9 = vsel %vm6744_vm8, %v3214_v59, %v3218_v63  ;;  %v2074_v7 = vrot.slane %v2072_v10, 4  ;;  %v4405_v41 = vsel %vm4401_vm3, %v4372_v46, %v7775_v36  ;;  %v8300_v36 = vpop.permute.xlu1 %4180  ;;  %v8302_v8 = vpop.permute.xlu0 %3674 }
 0x250   : > { %v3224_v32 = vrot.slane %v3223_v17, 4  ;;  %v5758_v26 = vcombine.low %v8245_v29, %v8284_v13  ;;  %v2065_v57 = vor.u32 %v2064_v38, %v2061_v50  ;;  %v4438_v40 = vsel %vm4434_vm4, %v4405_v41, %v7838_v23  ;;  %v6438_v41 = vld [vmem:[#allocation2 + $0x34] sm:$0xf] }
 0x251   : > { %v2628_v43 = vor.u32 %v8212_v51, %v8205_v16  ;;  %v2075_v52 = vor.u32 %v2074_v7, %v2070_v25  ;;  %v2080_v59 = vrot.slane %v2078_v15, 5  ;;  %v4472_v63 = vsel %vm4467_vm6, %v4438_v40, %v8062_v24 }
 0x252   : > { %v3229_v21 = vsel %vm6744_vm8, %v3224_v32, %v3228_v39  ;;  %4116 = vrot.lane.b32.xlu0 %v5758_v26, %s6492_s23  ;;  %v3268_v23 = vshrl.u32 %v8284_v13, 16  ;;  %v2066_v50 = vrot.slane %v2065_v57, 4  ;;  %4677 = vmatmul.mubr.bf16.gmra.mrb[4].mxu1 %v4472_v63  ;;  %v2631_v16 = vshll.u32 %v8113_v44, 16  ;;  %v6439_v26 = vld [vmem:[#allocation2 + $0x30] sm:$0xf] }
 0x253   : > { %v5772_v17 = vcombine.low %v3219_v9, %v3229_v21  ;;  %v2076_v51 = vrot.slane %v2075_v52, 4  ;;  %v2629_v39 = vrot.slane %v2628_v43, 4  ;;  %v2637_v10 = vrot.slane %v2635_v45, 4  ;;  %v1741_v45 = vld [vmem:[#allocation2 + $0x84] sm:$0xf] }
 0x254   : > { %v2641_v24 = vshll.u32 %v8111_v19, 16  ;;  %v2071_v38 = vsel %vm6744_vm8, %v2066_v50, %v2070_v25  ;;  %v2633_v15 = vrot.slane %v2631_v16, 5  ;;  %v5637_v46 = vrot.slane %v3376_v47, 9  ;;  %v8328_v63 = vld [vmem:[#allocation2 + $0x9c] sm:$0xf]  ;;  %v8340_v50 = vpop.permute.xlu0 %3850 }
 0x255   : > { %4192 = vrot.lane.b32.xlu1 %v5772_v17, %s6495_s26  ;;  %v9378_v9 = vrot.slane %v7112_v11, 5  ;;  %v2081_v7 = vsel %vm6744_vm8, %v2076_v51, %v2080_v59  ;;  %v5655_v57 = vcombine.low %v6439_v26, %v6438_v41  ;;  %v4374_v19 = vsel %vm4368_vm2, %v8240_v1, %v8090_v5  ;;  %v8338_v17 = vpop.permute.xlu1 %3926  ;;  %v9381_v51 = vld [vmem:[#allocation16_spill] sm:$0xff]  ;;  %v8428_v26 = vld [vmem:[#allocation2 + $0xb0] sm:$0x1] }
 0x256   : > { %v2643_v44 = vrot.slane %v2641_v24, 5  ;;  %v5679_v40 = vcombine.low %v2071_v38, %v2081_v7  ;;  %v2638_v43 = vor.u32 %v2637_v10, %v2633_v15  ;;  %v9380_v52 = vrot.slane %v7278_v62, 5  ;;  %v8358_v7 = vld [vmem:[#allocation2 + $0xa4] sm:$0x1] }
 0x257   : > { %v3456_v32 = vrot.slane %v9378_v9, 4  ;;  %v9379_v25 = vmov %v9378_v9  ;;  %v8332_v47 = vrot.slane %v3255_v4, 4  ;;  %v8334_v5 = vrot.slane %v3258_v14, 5  ;;  %v8347_v4 = vld [vmem:[#allocation2 + $0xa0] sm:$0xf] }
 0x258   : > { %v3455_v21 = vsel %vm6736_vm5, %v5637_v46, %v9379_v25  ;;  %v4269_v1 = vsel %vm4254_vm15, %v5655_v57, %v8064_v20  ;;  %3686 = vrot.lane.b32.xlu0 %v5679_v40, %s6491_s12  ;;  %v2634_v62 = vsel %vm6744_vm8, %v2629_v39, %v2633_v15  ;;  %v2639_v16 = vrot.slane %v2638_v43, 4  ;;  %v2777_v46 = vld [vmem:[#allocation2 + $0x9c] sm:$0xe]  ;;  %v2778_v25 = vld [vmem:[#allocation2 + $0xa8] sm:$0xe] }
 0x259   : > { %v3458_v59 = vsel %vm6736_vm5, %v3456_v32, %v9380_v52  ;;  %v4407_v29 = vsel %vm4401_vm3, %v4374_v19, %v9381_v51  ;;  %v2035_v14 = vshrl.u32 %v1741_v45, 16  ;;  %v2670_v20 = vshrl.u32 %v8328_v63, 16 }
 0x25a   : > { %v5781_v11 = vcombine.low %v3455_v21, %v3458_v59  ;;  %v2673_v10 = vshll.u32 %v8328_v63, 16  ;;  %v5711_v24 = vcombine.low %v8328_v63, %v8347_v4  ;;  %v2038_v38 = vshll.u32 %v1741_v45, 16 }
 0x25b   : > { %v2644_v39 = vsel %vm6744_vm8, %v2639_v16, %v2643_v44  ;;  %v2037_v15 = vrot.slane %v2035_v14, 4  ;;  %v2044_v9 = vshll.u32 %v8161_v2, 16  ;;  %v2048_v32 = vshrl.u32 %v8161_v2, 16  ;;  %v9382_v2 = vld [vmem:[#allocation20_spill] sm:$0xff] }
 0x25c   : > { %5806 = vmatprep.mubr.msk.bf16.mxu1 %vm4254_vm15, %v5781_v11  ;;  %v5725_v41 = vcombine.low %v2634_v62, %v2644_v39  ;;  %v2040_v57 = vrot.slane %v2038_v38, 5  ;;  %v2054_v19 = vshll.u32 %v8151_v35, 16  ;;  %3862 = vrot.lane.b32.xlu0 %v5711_v24, %s6493_s24  ;;  %v5631_v43 = vrot.slane %v2777_v46, 9  ;;  %v8372_v35 = vpop.permute.xlu1 %3672  ;;  %v8374_v62 = vpop.permute.xlu0 %4010  ;;  %v8378_v38 = vld [vmem:[#allocation2 + $0xb0] sm:$0x1] }
 0x25d   : > { %v2046_v45 = vrot.slane %v2044_v9, 5  ;;  %v2050_v40 = vrot.slane %v2048_v32, 4  ;;  %v2915_v44 = vrot.slane %v8347_v4, 5  ;;  %v8365_v21 = vrot.slane %v2670_v20, 4  ;;  %v3377_v20 = vld [vmem:[#allocation2 + $0x3c] sm:$0xe] }
 0x25e   : > { %3938 = vrot.lane.b32.xlu1 %v5725_v41, %s6496_s27  ;;  %v8369_v52 = vsel %vm486_vm0, %v4269_v1, %v9382_v2  ;;  %v2041_v59 = vor.u32 %v2040_v57, %v2037_v15  ;;  %v2918_v11 = vrot.slane %v8358_v7, 5  ;;  %v2056_v51 = vrot.slane %v2054_v19, 5  ;;  %v6440_v39 = vld [vmem:[#allocation2 + $0x28] sm:$0xf]  ;;  %v6441_v1 = vld [vmem:[#allocation2 + $0x24] sm:$0xf] }
 0x25f   : > { %v2051_v16 = vor.u32 %v2050_v40, %v2046_v45  ;;  %v2916_v14 = vsel %vm6736_vm5, %v5631_v43, %v2915_v44  ;;  %v2917_v24 = vrot.slane %v2915_v44, 4  ;;  %v5654_v9 = vcombine.low %v6441_v1, %v6440_v39  ;;  %v9383_v15 = vld [vmem:[#allocation14_spill] sm:$0xff]  ;;  %v9384_v19 = vld [vmem:[#allocation21_spill] sm:$0xff]  ;;  %v2167_v44 = vld [vmem:[#allocation2 + $0x9c] sm:$0xe] }
 0x260   : > { %v2042_v46 = vrot.slane %v2041_v59, 4  ;;  %v4440_v32 = vsel %vm4434_vm4, %v4407_v29, %v9383_v15  ;;  %v5632_v41 = vrot.slane %v2778_v25, 9  ;;  %v2922_v43 = vrot.slane %v8251_v55, 5  ;;  %v1764_v29 = vld [vmem:[#allocation2 + $0xa4] sm:$0x1] }
 0x261   : > { %v2052_v57 = vrot.slane %v2051_v16, 4  ;;  %v2919_v40 = vsel %vm6736_vm5, %v2917_v24, %v2918_v11  ;;  %v4475_v2 = vsel %vm4467_vm6, %v4440_v32, %v9384_v19  ;;  %v2925_v39 = vrot.slane %v8378_v38, 5  ;;  %v9385_v24 = vld [vmem:[#allocation5_spill] sm:$0xff] }
 0x262   : > { %v2047_v59 = vsel %vm6744_vm8, %v2042_v46, %v2046_v45  ;;  %v5743_v33 = vcombine.low %v2916_v14, %v2919_v40  ;;  %4685 = vmatmul.mubr.bf16.gmra.mrb[8].mxu1 %v4475_v2  ;;  %v5638_v1 = vrot.slane %v3377_v20, 9  ;;  %v4266_v11 = vsel %vm4254_vm15, %v5654_v9, %v8124_v12  ;;  %v8403_v46 = vld [vmem:[#allocation2 + $0xa0] sm:$0xf]  ;;  %v8405_v12 = vpop.permute.xlu1 %4012  ;;  %v8407_v9 = vpop.permute.xlu0 %3756 }
 0x263   : > { %v2057_v25 = vsel %vm6744_vm8, %v2052_v57, %v2056_v51  ;;  %v2924_v16 = vrot.slane %v2922_v43, 4  ;;  %v9386_v15 = vrot.slane %v9385_v24, 5  ;;  %v2923_v45 = vsel %vm6736_vm5, %v5632_v41, %v2922_v43  ;;  %v2168_v57 = vld [vmem:[#allocation2 + $0xa8] sm:$0xe] }
 0x264   : > { %v5678_v19 = vcombine.low %v2047_v59, %v2057_v25  ;;  %4022 = vrot.lane.b32.xlu0 %v5743_v33, %s6494_s25  ;;  %v5616_v51 = vrot.slane %v2167_v44, 9  ;;  %v9388_v33 = vld [vmem:[#allocation8_spill] sm:$0xff]  ;;  %v2314_v43 = vrot.slane %v8403_v46, 5  ;;  %v2317_v59 = vrot.slane %v1764_v29, 5  ;;  %v9390_v25 = vld [vmem:[#allocation18_spill] sm:$0xff] }
 0x265   : > { %v3463_v32 = vrot.slane %v9386_v15, 4  ;;  %v9387_v14 = vmov %v9386_v15  ;;  %v2926_v40 = vsel %vm6736_vm5, %v2924_v16, %v2925_v39  ;;  %v9389_v2 = vrot.slane %v9388_v33, 5  ;;  %v8423_v16 = vld [vmem:[#allocation2 + $0xac] sm:$0xf] }
 0x266   : > { %v3462_v20 = vsel %vm6736_vm5, %v5638_v1, %v9387_v14  ;;  %v1765_v1 = vld [vmem:[#allocation2 + $0xb0] sm:$0x1]  ;;  %v8418_v44 = vrot.slane %v2673_v10, 5  ;;  %3684 = vrot.lane.b32.xlu1 %v5678_v19, %s6491_s12  ;;  %v4310_v24 = vsel %vm486_vm0, %v4266_v11, %v9390_v25  ;;  %v2102_v39 = vshll.u32 %v1764_v29, 16  ;;  %v2970_v19 = vld [vmem:[#allocation2 + $0xc0] sm:$0xf]  ;;  %v8444_v25 = vpop.permute.xlu0 %4186 }
 0x267   : > { %v3465_v41 = vsel %vm6736_vm5, %v3463_v32, %v9389_v2  ;;  %v2315_v32 = vsel %vm6736_vm5, %v5616_v51, %v2314_v43  ;;  %v2316_v14 = vrot.slane %v2314_v43, 4  ;;  %v5617_v33 = vrot.slane %v2168_v57, 9 }
 0x268   : > { %v5782_v15 = vcombine.low %v3462_v20, %v3465_v41  ;;  %v2321_v2 = vrot.slane %v8423_v16, 5  ;;  %v5744_v63 = vcombine.low %v2923_v45, %v2926_v40  ;;  %v2324_v10 = vrot.slane %v1765_v1, 5 }
 0x269   : > { %v3285_v11 = vor.u32 %v8249_v31, %v8247_v37  ;;  %v3288_v29 = vshll.u32 %v8232_v34, 16  ;;  %v2318_v20 = vsel %vm6736_vm5, %v2316_v14, %v2317_v59  ;;  %v3294_v41 = vrot.slane %v3292_v48, 4  ;;  %v8442_v31 = vpop.permute.xlu1 %3758  ;;  %v8448_v14 = vld [vmem:[#allocation2 + $0xc4] sm:$0xf] }
 0x26a   : > { %5807 = vmatprep.mubr.msk.bf16.mxu1 %vm4254_vm15, %v5782_v15  ;;  %v2322_v51 = vsel %vm6736_vm5, %v5617_v33, %v2321_v2  ;;  %v2323_v57 = vrot.slane %v2321_v2, 4  ;;  %4024 = vrot.lane.b32.xlu1 %v5744_v63, %s6494_s25  ;;  %v5696_v45 = vcombine.low %v2315_v32, %v2318_v20  ;;  %v3298_v37 = vshll.u32 %v8428_v26, 16 }
 0x26b   : > { %v3286_v40 = vrot.slane %v3285_v11, 4  ;;  %v3290_v43 = vrot.slane %v3288_v29, 5  ;;  %v2126_v15 = vshll.u32 %v1765_v1, 16  ;;  %v3327_v33 = vshrl.u32 %v2970_v19, 16  ;;  %v9391_v11 = vld [vmem:[#allocation15_spill] sm:$0xff] }
 0x26c   : > { %v2325_v59 = vsel %vm6736_vm5, %v2323_v57, %v2324_v10  ;;  %v3330_v34 = vshll.u32 %v2970_v19, 16  ;;  %v8453_v48 = vsel %vm4335_vm1, %v8369_v52, %v8092_v18  ;;  %3768 = vrot.lane.b32.xlu0 %v5696_v45, %s6490_s11  ;;  %v3300_v63 = vrot.slane %v3298_v37, 5  ;;  %v8474_v37 = vld [vmem:[#allocation2 + $0xa4] sm:$0x1] }
 0x26d   : > { %v5697_v32 = vcombine.low %v2322_v51, %v2325_v59  ;;  %v3295_v2 = vor.u32 %v3294_v41, %v3290_v43  ;;  %v8458_v1 = vsel %vm4335_vm1, %v4310_v24, %v9391_v11  ;;  %v8460_v29 = vrot.slane %v2102_v39, 5  ;;  %9392 = vst [vmem:[#allocation16_spill] sm:$0xff] %v8474_v37  ;;  %v8493_v11 = vld [vmem:[#allocation2 + $0xb8] sm:$0xf] }
 0x26e   : > { %v3329_v10 = vrot.slane %v3327_v33, 4  ;;  %v3332_v20 = vrot.slane %v3330_v34, 5  ;;  %v3291_v57 = vsel %vm6744_vm8, %v3286_v40, %v3290_v43  ;;  %v3336_v52 = vshll.u32 %v8448_v14, 16 }
 0x26f   : > { %3770 = vrot.lane.b32.xlu1 %v5697_v32, %s6490_s11  ;;  %v3296_v18 = vrot.slane %v3295_v2, 4  ;;  %v2700_v51 = vor.u32 %v8258_v56, %v8256_v54  ;;  %v8468_v41 = vrot.slane %v2126_v15, 5  ;;  %v3340_v24 = vshrl.u32 %v8448_v14, 16  ;;  %v8480_v54 = vpop.permute.xlu1 %4110  ;;  %v8482_v56 = vpop.permute.xlu0 %3932 }
 0x270   : > { %v2703_v39 = vshll.u32 %v8251_v55, 16  ;;  %v2709_v45 = vrot.slane %v2707_v0, 4  ;;  %v3333_v43 = vor.u32 %v3332_v20, %v3329_v10  ;;  %v5761_v59 = vcombine.low %v2970_v19, %v8448_v14  ;;  %9393 = vst [vmem:[#allocation20_spill] sm:$0xff] %v8480_v54  ;;  %v2968_v0 = vld [vmem:[#allocation2 + $0xb4] sm:$0xf] }
 0x271   : > { %v3301_v40 = vsel %vm6744_vm8, %v3296_v18, %v3300_v63  ;;  %v2713_v33 = vshll.u32 %v8378_v38, 16  ;;  %v2701_v34 = vrot.slane %v2700_v51, 4  ;;  %v3261_v55 = vor.u32 %v8334_v5, %v8332_v47 }
 0x272   : > { %v5775_v15 = vcombine.low %v3291_v57, %v3301_v40  ;;  %v2705_v32 = vrot.slane %v2703_v39, 5  ;;  %v8487_v2 = vrot.slane %v3336_v52, 5  ;;  %v3264_v63 = vshll.u32 %v8284_v13, 16 }
 0x273   : > { %4122 = vrot.lane.b32.xlu1 %v5761_v59, %s6492_s23  ;;  %v3270_v38 = vrot.slane %v3268_v23, 4  ;;  %v3274_v19 = vshll.u32 %v8474_v37, 16  ;;  %v8496_v10 = vrot.slane %v3340_v24, 4  ;;  %v2715_v47 = vrot.slane %v2713_v33, 5  ;;  %v8506_v33 = vpop.permute.xlu1 %3856 }
 0x274   : > { %4198 = vrot.lane.b32.xlu0 %v5775_v15, %s6495_s26  ;;  %v2710_v20 = vor.u32 %v2709_v45, %v2705_v32  ;;  %v3262_v5 = vrot.slane %v3261_v55, 4  ;;  %v8498_v57 = vrot.slane %v3333_v43, 4  ;;  %v3266_v18 = vrot.slane %v3264_v63, 5  ;;  %v8504_v45 = vld [vmem:[#allocation2 + $0xa8] sm:$0xf]  ;;  %9395 = vst [vmem:[#allocation21_spill] sm:$0xff] %v8506_v33  ;;  %v8508_v43 = vpop.permute.xlu0 %4108 }
 0x275   : > { %v3303_v52 = vshrl.u32 %v2968_v0, 16  ;;  %v3306_v51 = vshll.u32 %v2968_v0, 16  ;;  %v2706_v39 = vsel %vm6744_vm8, %v2701_v34, %v2705_v32  ;;  %v3276_v40 = vrot.slane %v3274_v19, 5  ;;  %9394 = vst [vmem:[#allocation14_spill] sm:$0xff] %v8504_v45  ;;  %9396 = vst [vmem:[#allocation5_spill] sm:$0xff] %v8508_v43 }
 0x276   : > { %v2711_v23 = vrot.slane %v2710_v20, 4  ;;  %v3312_v59 = vshll.u32 %v8493_v11, 16  ;;  %v3271_v54 = vor.u32 %v3270_v38, %v3266_v18  ;;  %v3316_v24 = vshrl.u32 %v8493_v11, 16 }
 0x277   : > { %v3305_v37 = vrot.slane %v3303_v52, 4  ;;  %v3308_v15 = vrot.slane %v3306_v51, 5  ;;  %v3267_v34 = vsel %vm6744_vm8, %v3262_v5, %v3266_v18  ;;  %v5760_v32 = vcombine.low %v2968_v0, %v8493_v11 }
 0x278   : > { %v2716_v55 = vsel %vm6744_vm8, %v2711_v23, %v2715_v47  ;;  %v8515_v63 = vrot.slane %v3312_v59, 5  ;;  %v3272_v19 = vrot.slane %v3271_v54, 4  ;;  %v2676_v52 = vor.u32 %v8418_v44, %v8365_v21 }
 0x279   : > { %v5728_v38 = vcombine.low %v2706_v39, %v2716_v55  ;;  %v3309_v20 = vor.u32 %v3308_v15, %v3305_v37  ;;  %v2679_v51 = vshll.u32 %v8347_v4, 16  ;;  %v9397_v33 = vshrl.u32 %v8347_v4, 16 }
 0x27a   : > { %v2689_v47 = vshll.u32 %v8358_v7, 16  ;;  %v2107_v23 = vshrl.u32 %v8504_v45, 16  ;;  %v3277_v0 = vsel %vm6744_vm8, %v3272_v19, %v3276_v40  ;;  %v8527_v5 = vrot.slane %v3316_v24, 4  ;;  %v8537_v40 = vld [vmem:[#allocation2 + $0x9c] sm:$0xf]  ;;  %v8539_v24 = vpop.permute.xlu1 %4184  ;;  %v9398_v19 = vld [vmem:[#allocation17_spill] sm:$0xff] }
 0x27b   : > { %v2685_v43 = vrot.slane %v9397_v33, 4  ;;  %3944 = vrot.lane.b32.xlu0 %v5728_v38, %s6496_s27  ;;  %v2677_v37 = vrot.slane %v2676_v52, 4  ;;  %v2110_v54 = vshll.u32 %v8504_v45, 16  ;;  %v5774_v21 = vcombine.low %v3267_v34, %v3277_v0  ;;  %v8541_v33 = vpop.permute.xlu0 %3678  ;;  %v6442_v0 = vld [vmem:[#allocation2 + $0x4c] sm:$0xf] }
 0x27c   : > { %v8530_v44 = vrot.slane %v3309_v20, 4  ;;  %v2681_v18 = vrot.slane %v2679_v51, 5  ;;  %v2109_v4 = vrot.slane %v2107_v23, 4  ;;  %v2116_v7 = vshll.u32 %v8423_v16, 16 }
 0x27d   : > { %v2112_v39 = vrot.slane %v2110_v54, 5  ;;  %v2120_v59 = vshrl.u32 %v8423_v16, 16  ;;  %v4376_v15 = vsel %vm4368_vm2, %v8458_v1, %v7993_v27  ;;  %4196 = vrot.lane.b32.xlu1 %v5774_v21, %s6495_s26  ;;  %v2691_v38 = vrot.slane %v2689_v47, 5  ;;  %v6443_v54 = vld [vmem:[#allocation2 + $0x48] sm:$0xf] }
 0x27e   : > { %v2682_v55 = vsel %vm6744_vm8, %v2677_v37, %v2681_v18  ;;  %v2686_v34 = vor.u32 %v2685_v43, %v2681_v18  ;;  %v4409_v16 = vsel %vm4401_vm3, %v4376_v15, %v9398_v19  ;;  %v2118_v27 = vrot.slane %v2116_v7, 5 }
 0x27f   : > { %4120 = vrot.lane.b32.xlu0 %v5760_v32, %s6492_s23  ;;  %v2113_v20 = vor.u32 %v2112_v39, %v2109_v4  ;;  %v2122_v1 = vrot.slane %v2120_v59, 4  ;;  %v4442_v52 = vsel %vm4434_vm4, %v4409_v16, %v8039_v22  ;;  %v5657_v37 = vcombine.low %v6443_v54, %v6442_v0  ;;  %v3378_v4 = vld [vmem:[#allocation2 + $0x48] sm:$0xe]  ;;  %v2361_v59 = vld [vmem:[#allocation2 + $0xb4] sm:$0xf] }
 0x280   : > { %v2687_v51 = vrot.slane %v2686_v34, 4  ;;  %v4478_v23 = vsel %vm4467_vm6, %v4442_v52, %v8300_v36  ;;  %v2083_v43 = vshrl.u32 %v8537_v40, 16  ;;  %v2086_v32 = vshll.u32 %v8537_v40, 16  ;;  %v8576_v54 = vld [vmem:[#allocation2 + $0xb8] sm:$0xf] }
 0x281   : > { %v2114_v47 = vrot.slane %v2113_v20, 4  ;;  %v2123_v21 = vor.u32 %v2122_v1, %v2118_v27  ;;  %4693 = vmatmul.mubr.bf16.gmra.mrb[12].mxu1 %v4478_v23  ;;  %v2092_v18 = vshll.u32 %v8403_v46, 16  ;;  %v4275_v39 = vsel %vm4254_vm15, %v5657_v37, %v8302_v8  ;;  %v8563_v20 = vpop.permute.xlu1 %3930  ;;  %v8565_v1 = vpop.permute.xlu0 %3854 }
 0x282   : > { %v2692_v22 = vsel %vm6744_vm8, %v2687_v51, %v2691_v38  ;;  %v2085_v36 = vrot.slane %v2083_v43, 4  ;;  %v2096_v7 = vshrl.u32 %v8403_v46, 16  ;;  %v2088_v16 = vrot.slane %v2086_v32, 5  ;;  %v9399_v51 = vld [vmem:[#allocation4_spill] sm:$0xff] }
 0x283   : > { %v5727_v15 = vcombine.low %v2682_v55, %v2692_v22  ;;  %v2119_v34 = vsel %vm6744_vm8, %v2114_v47, %v2118_v27  ;;  %v2124_v19 = vrot.slane %v2123_v21, 4  ;;  %v2094_v52 = vrot.slane %v2092_v18, 5  ;;  %v9402_v18 = vld [vmem:[#allocation6_spill] sm:$0xff]  ;;  %v2363_v22 = vld [vmem:[#allocation2 + $0xc0] sm:$0xf] }
 0x284   : > { %v2098_v23 = vrot.slane %v2096_v7, 4  ;;  %v5639_v38 = vrot.slane %v3378_v4, 9  ;;  %v9400_v0 = vrot.slane %v9399_v51, 5  ;;  %v2089_v55 = vor.u32 %v2088_v16, %v2085_v36 }
 0x285   : > { %3942 = vrot.lane.b32.xlu1 %v5727_v15, %s6496_s27  ;;  %v2129_v46 = vsel %vm6744_vm8, %v2124_v19, %v8468_v41  ;;  %v4378_v27 = vsel %vm4368_vm2, %v8453_v48, %v8338_v17  ;;  %v2718_v37 = vshrl.u32 %v2361_v59, 16  ;;  %v9403_v4 = vrot.slane %v9402_v18, 5  ;;  %v2779_v15 = vld [vmem:[#allocation2 + $0xb4] sm:$0xe] }
 0x286   : > { %v3470_v8 = vrot.slane %v9400_v0, 4  ;;  %v5681_v43 = vcombine.low %v2119_v34, %v2129_v46  ;;  %v2099_v47 = vor.u32 %v2098_v23, %v2094_v52  ;;  %v9401_v21 = vmov %v9400_v0  ;;  %v8602_v46 = vld [vmem:[#allocation2 + $0xbc] sm:$0x1] }
 0x287   : > { %v3469_v32 = vsel %vm6736_vm5, %v5639_v38, %v9401_v21  ;;  %v2090_v36 = vrot.slane %v2089_v55, 4  ;;  %v4411_v17 = vsel %vm4401_vm3, %v4378_v27, %v8126_v3  ;;  %v2721_v48 = vshll.u32 %v2361_v59, 16  ;;  %v8593_v38 = vld [vmem:[#allocation2 + $0xc4] sm:$0xf]  ;;  %v8604_v55 = vpop.permute.xlu1 %3676  ;;  %v6445_v21 = vld [vmem:[#allocation2 + $0x3c] sm:$0xf] }
 0x288   : > { %v3472_v41 = vsel %vm6736_vm5, %v3470_v8, %v9403_v4  ;;  %3690 = vrot.lane.b32.xlu0 %v5681_v43, %s6491_s12  ;;  %v2100_v34 = vrot.slane %v2099_v47, 4  ;;  %v8589_v19 = vrot.slane %v2718_v37, 4  ;;  %v5713_v16 = vcombine.low %v2361_v59, %v8576_v54  ;;  %v8606_v59 = vpop.permute.xlu0 %4014  ;;  %v8617_v4 = vld [vmem:[#allocation2 + $0xbc] sm:$0x1] }
 0x289   : > { %v5783_v7 = vcombine.low %v3469_v32, %v3472_v41  ;;  %v2095_v51 = vsel %vm6744_vm8, %v2090_v36, %v2094_v52  ;;  %v8598_v0 = vrot.slane %v2721_v48, 5  ;;  %v4316_v3 = vsel %vm486_vm0, %v4275_v39, %v8193_v53  ;;  %v6444_v39 = vld [vmem:[#allocation2 + $0x40] sm:$0xf]  ;;  %v9404_v36 = vld [vmem:[#allocation22_spill] sm:$0xff] }
 0x28a   : > { %v2742_v8 = vshrl.u32 %v2363_v22, 16  ;;  %v2105_v27 = vsel %vm6744_vm8, %v2100_v34, %v8460_v29  ;;  %v8613_v52 = vsel %vm4335_vm1, %v4316_v3, %v8340_v50  ;;  %v2745_v37 = vshll.u32 %v2363_v22, 16 }
 0x28b   : > { %5808 = vmatprep.mubr.msk.bf16.mxu1 %vm4254_vm15, %v5783_v7  ;;  %v5714_v43 = vcombine.low %v2363_v22, %v8593_v38  ;;  %v5680_v47 = vcombine.low %v2095_v51, %v2105_v27  ;;  %v5656_v32 = vcombine.low %v6445_v21, %v6444_v39  ;;  %v5633_v18 = vrot.slane %v2779_v15, 9  ;;  %v3379_v7 = vld [vmem:[#allocation2 + $0x54] sm:$0xe]  ;;  %v8635_v3 = vpop.permute.xlu1 %4016  ;;  %v9406_v21 = vld [vmem:[#allocation9_spill] sm:$0xff] }
 0x28c   : > { %3866 = vrot.lane.b32.xlu0 %v5713_v16, %s6493_s24  ;;  %v8620_v41 = vrot.slane %v2742_v8, 4  ;;  %v2929_v29 = vrot.slane %v8576_v54, 5  ;;  %v2932_v50 = vrot.slane %v8602_v46, 5  ;;  %v4444_v22 = vsel %vm4434_vm4, %v4411_v17, %v9404_v36  ;;  %v2169_v51 = vld [vmem:[#allocation2 + $0xb4] sm:$0xe] }
 0x28d   : > { %3688 = vrot.lane.b32.xlu1 %v5680_v47, %s6491_s12  ;;  %v8627_v48 = vrot.slane %v2745_v37, 5  ;;  %v4272_v15 = vsel %vm4254_vm15, %v5656_v32, %v8372_v35  ;;  %v4481_v34 = vsel %vm4467_vm6, %v4444_v22, %v8195_v58  ;;  %v3319_v16 = vor.u32 %v8527_v5, %v8515_v63  ;;  %v1766_v37 = vld [vmem:[#allocation2 + $0xbc] sm:$0x1]  ;;  %v9405_v58 = vld [vmem:[#allocation25_spill] sm:$0xff] }
 0x28e   : > { %v2930_v17 = vsel %vm6736_vm5, %v5633_v18, %v2929_v29  ;;  %v2931_v8 = vrot.slane %v2929_v29, 4  ;;  %4701 = vmatmul.mubr.bf16.gmra.mrb[16].mxu1 %v4481_v34  ;;  %v3315_v27 = vsel %vm6744_vm8, %v8530_v44, %v8515_v63  ;;  %v3322_v35 = vshll.u32 %v8617_v4, 16  ;;  %v8650_v18 = vld [vmem:[#allocation2 + $0xb8] sm:$0xf]  ;;  %v8652_v29 = vpop.permute.xlu0 %3760 }
 0x28f   : > { %v8646_v47 = vsel %vm486_vm0, %v4272_v15, %v9405_v58  ;;  %v3320_v5 = vrot.slane %v3319_v16, 4  ;;  %v5640_v39 = vrot.slane %v3379_v7, 9  ;;  %v9407_v32 = vrot.slane %v9406_v21, 5  ;;  %v9409_v58 = vld [vmem:[#allocation12_spill] sm:$0xff] }
 0x290   : > { %v2933_v22 = vsel %vm6736_vm5, %v2931_v8, %v2932_v50  ;;  %v3324_v63 = vrot.slane %v3322_v35, 5  ;;  %v5618_v44 = vrot.slane %v2169_v51, 9  ;;  %v2328_v34 = vrot.slane %v8650_v18, 5  ;;  %v8672_v35 = vpop.permute.xlu1 %3762 }
 0x291   : > { %v3477_v36 = vrot.slane %v9407_v32, 4  ;;  %3868 = vrot.lane.b32.xlu1 %v5714_v43, %s6493_s24  ;;  %v5745_v15 = vcombine.low %v2930_v17, %v2933_v22  ;;  %v9408_v16 = vmov %v9407_v32  ;;  %v9410_v32 = vrot.slane %v9409_v58, 5  ;;  %v8670_v17 = vld [vmem:[#allocation2 + $0xc8] sm:$0x1] }
 0x292   : > { %v3476_v7 = vsel %vm6736_vm5, %v5640_v39, %v9408_v16  ;;  %v2331_v23 = vrot.slane %v1766_v37, 5  ;;  %v3325_v50 = vsel %vm6744_vm8, %v3320_v5, %v3324_v63  ;;  %v2329_v8 = vsel %vm6736_vm5, %v5618_v44, %v2328_v34 }
 0x293   : > { %v3479_v53 = vsel %vm6736_vm5, %v3477_v36, %v9410_v32  ;;  %v2330_v43 = vrot.slane %v2328_v34, 4  ;;  %4026 = vrot.lane.b32.xlu0 %v5745_v15, %s6494_s25  ;;  %v5776_v39 = vcombine.low %v3315_v27, %v3325_v50  ;;  %v2724_v21 = vor.u32 %v8598_v0, %v8589_v19 }
 0x294   : > { %v5784_v51 = vcombine.low %v3476_v7, %v3479_v53  ;;  %v2727_v36 = vshll.u32 %v8576_v54, 16  ;;  %v9411_v22 = vshrl.u32 %v8576_v54, 16  ;;  %v8680_v53 = vld [vmem:[#allocation2 + $0xb4] sm:$0xf]  ;;  %v2737_v44 = vshll.u32 %v8602_v46, 16  ;;  %v8694_v16 = vpop.permute.xlu0 %4190 }
 0x295   : > { %v2332_v63 = vsel %vm6736_vm5, %v2330_v43, %v2331_v23  ;;  %v3339_v27 = vsel %vm6744_vm8, %v8498_v57, %v8487_v2  ;;  %v3343_v19 = vor.u32 %v8496_v10, %v8487_v2  ;;  %4200 = vrot.lane.b32.xlu1 %v5776_v39, %s6495_s26  ;;  %v2725_v0 = vrot.slane %v2724_v21, 4  ;;  %v8703_v39 = vpop.permute.xlu1 %4114 }
 0x296   : > { %v2733_v5 = vrot.slane %v9411_v22, 4  ;;  %5809 = vmatprep.mubr.msk.bf16.mxu1 %vm4254_vm15, %v5784_v51  ;;  %v5698_v54 = vcombine.low %v2329_v8, %v2332_v63  ;;  %v2729_v34 = vrot.slane %v2727_v36, 5  ;;  %v3346_v15 = vshll.u32 %v8670_v17, 16  ;;  %v2380_v63 = vld [vmem:[#allocation2 + $0xc8] sm:$0x1] }
 0x297   : > { %v2739_v23 = vrot.slane %v2737_v44, 5  ;;  %v3344_v7 = vrot.slane %v3343_v19, 4  ;;  %v2131_v46 = vshrl.u32 %v8680_v53, 16  ;;  %v2134_v58 = vshll.u32 %v8680_v53, 16 }
 0x298   : > { %3772 = vrot.lane.b32.xlu0 %v5698_v54, %s6490_s11  ;;  %v2730_v2 = vsel %vm6744_vm8, %v2725_v0, %v2729_v34  ;;  %v2734_v10 = vor.u32 %v2733_v5, %v2729_v34  ;;  %v3348_v57 = vrot.slane %v3346_v15, 5  ;;  %v2140_v32 = vshll.u32 %v8650_v18, 16  ;;  %v2780_v34 = vld [vmem:[#allocation2 + $0xc0] sm:$0xe]  ;;  %s347_s11 = sand.u32 1, %s6479_s13   ;;  %s5925_s13 = sshll.u32 (%p6577_p4), %s6565_s16, 4 }
 0x299   : > { %v2133_v50 = vrot.slane %v2131_v46, 4  ;;  %v2136_v51 = vrot.slane %v2134_v58, 5  ;;  %v2144_v8 = vshrl.u32 %v8650_v18, 16  ;;  %v2150_v43 = vshll.u32 %v1766_v37, 16  ;;  %v8709_v15 = vpop.permute.xlu0 %3936 }
 0x29a   : > { %v2735_v21 = vrot.slane %v2734_v10, 4  ;;  %v3349_v36 = vsel %vm6744_vm8, %v3344_v7, %v3348_v57  ;;  %v2142_v22 = vrot.slane %v2140_v32, 5  ;;  %v2748_v44 = vor.u32 %v8627_v48, %v8620_v41  ;;  %v8716_v57 = vld [vmem:[#allocation2 + $0xcc] sm:$0xf] }
 0x29b   : > { %v5777_v5 = vcombine.low %v3339_v27, %v3349_v36  ;;  %v2137_v19 = vor.u32 %v2136_v51, %v2133_v50  ;;  %v2146_v54 = vrot.slane %v2144_v8, 4  ;;  %v2152_v0 = vrot.slane %v2150_v43, 5 }
 0x29c   : > { %v2740_v37 = vsel %vm6744_vm8, %v2735_v21, %v2739_v23  ;;  %v2749_v46 = vrot.slane %v2748_v44, 4  ;;  %v2751_v58 = vshll.u32 %v8593_v38, 16  ;;  %v9412_v7 = vshrl.u32 %v8593_v38, 16  ;;  %v8720_v23 = vld [vmem:[#allocation2 + $0xd0] sm:$0xf] }
 0x29d   : > { %v5729_v32 = vcombine.low %v2730_v2, %v2740_v37  ;;  %4202 = vrot.lane.b32.xlu0 %v5777_v5, %s6495_s26  ;;  %v2138_v41 = vrot.slane %v2137_v19, 4  ;;  %v2147_v48 = vor.u32 %v2146_v54, %v2142_v22  ;;  %v2761_v27 = vshll.u32 %v2380_v63, 16  ;;  %v9413_v21 = vld [vmem:[#allocation23_spill] sm:$0xff]  ;;  %v8729_v19 = vpop.permute.xlu1 %3860 }
 0x29e   : > { %v2757_v10 = vrot.slane %v9412_v7, 4  ;;  %v2753_v50 = vrot.slane %v2751_v58, 5  ;;  %v5634_v51 = vrot.slane %v2780_v34, 9  ;;  %v2936_v8 = vrot.slane %v8593_v38, 5 }
 0x29f   : > { %v2939_v43 = vrot.slane %v2380_v63, 5  ;;  %v4347_v36 = vsel %vm4335_vm1, %v8646_v47, %v9413_v21  ;;  %3946 = vrot.lane.b32.xlu1 %v5729_v32, %s6496_s27  ;;  %v2143_v2 = vsel %vm6744_vm8, %v2138_v41, %v2142_v22  ;;  %v2148_v44 = vrot.slane %v2147_v48, 4  ;;  %v8737_v22 = vld [vmem:[#allocation2 + $0xd4] sm:$0x1]  ;;  %v8739_v32 = vpop.permute.xlu0 %4112 }
 0x2a0   : > { %v3351_v5 = vshrl.u32 %v8716_v57, 16  ;;  %v2758_v54 = vor.u32 %v2757_v10, %v2753_v50  ;;  %v2763_v34 = vrot.slane %v2761_v27, 5  ;;  %v2937_v38 = vsel %vm6736_vm5, %v5634_v51, %v2936_v8 }
 0x2a1   : > { %v2938_v63 = vrot.slane %v2936_v8, 4  ;;  %v2153_v37 = vsel %vm6744_vm8, %v2148_v44, %v2152_v0  ;;  %v3354_v58 = vshll.u32 %v8716_v57, 16  ;;  %v3364_v7 = vshrl.u32 %v8720_v23, 16  ;;  %v3380_v44 = vld [vmem:[#allocation2 + $0x60] sm:$0xe] }
 0x2a2   : > { %v3353_v47 = vrot.slane %v3351_v5, 4  ;;  %v5682_v41 = vcombine.low %v2143_v2, %v2153_v37  ;;  %v2754_v10 = vsel %vm6744_vm8, %v2749_v46, %v2753_v50  ;;  %v2759_v48 = vrot.slane %v2758_v54, 4  ;;  %v9414_v37 = vld [vmem:[#allocation24_spill] sm:$0xff] }
 0x2a3   : > { %v2940_v27 = vsel %vm6736_vm5, %v2938_v63, %v2939_v43  ;;  %v3356_v51 = vrot.slane %v3354_v58, 5  ;;  %v5762_v0 = vcombine.low %v8716_v57, %v8720_v23  ;;  %v3360_v8 = vshll.u32 %v8720_v23, 16  ;;  %v3381_v58 = vld [vmem:[#allocation2 + $0x6c] sm:$0xe] }
 0x2a4   : > { %v3366_v21 = vrot.slane %v3364_v7, 4  ;;  %3692 = vrot.lane.b32.xlu1 %v5682_v41, %s6491_s12  ;;  %v2764_v2 = vsel %vm6744_vm8, %v2759_v48, %v2763_v34  ;;  %v5746_v5 = vcombine.low %v2937_v38, %v2940_v27  ;;  %v3370_v46 = vshll.u32 %v8737_v22, 16  ;;  %v8756_v7 = vpop.permute.xlu1 %4188  ;;  %v6446_v34 = vld [vmem:[#allocation2 + $0x64] sm:$0xf]  ;;  %v6447_v38 = vld [vmem:[#allocation2 + $0x60] sm:$0xf] }
 0x2a5   : > { %v4380_v50 = vsel %vm4368_vm2, %v4347_v36, %v8236_v61  ;;  %v5730_v43 = vcombine.low %v2754_v10, %v2764_v2  ;;  %v3357_v54 = vor.u32 %v3356_v51, %v3353_v47  ;;  %v3362_v63 = vrot.slane %v3360_v8, 5  ;;  %v9415_v10 = vld [vmem:[#allocation7_spill] sm:$0xff]  ;;  %v8765_v2 = vpop.permute.xlu0 %3682  ;;  %s5468_s12 = sshll.u32 %s347_s11, 5 }
 0x2a6   : > { %v4413_v57 = vsel %vm4401_vm3, %v4380_v50, %v9414_v37  ;;  %v3372_v45 = vrot.slane %v3370_v46, 5  ;;  %v5659_v48 = vcombine.low %v6447_v38, %v6446_v34  ;;  %v5641_v27 = vrot.slane %v3380_v44, 9 }
 0x2a7   : > { %v4446_v41 = vsel %vm4434_vm4, %v4413_v57, %v8274_v60  ;;  %3948 = vrot.lane.b32.xlu0 %v5730_v43, %s6496_s27  ;;  %v3358_v61 = vrot.slane %v3357_v54, 4  ;;  %v3367_v36 = vor.u32 %v3366_v21, %v3362_v63  ;;  %v9416_v51 = vrot.slane %v9415_v10, 5  ;;  %v9418_v54 = vld [vmem:[#allocation10_spill] sm:$0xff]  ;;  %v3382_v57 = vld [vmem:[#allocation2 + $0x78] sm:$0xe] }
 0x2a8   : > { %v4484_v47 = vsel %vm4467_vm6, %v4446_v41, %v8539_v24  ;;  %4028 = vrot.lane.b32.xlu1 %v5746_v5, %s6494_s25  ;;  %v4281_v60 = vsel %vm4254_vm15, %v5659_v48, %v8541_v33  ;;  %v4382_v24 = vsel %vm4368_vm2, %v8613_v52, %v8563_v20  ;;  %v5642_v21 = vrot.slane %v3381_v58, 9  ;;  %v6448_v41 = vld [vmem:[#allocation2 + $0x88] sm:$0xf]  ;;  %v6449_v48 = vld [vmem:[#allocation2 + $0x58] sm:$0xf] }
 0x2a9   : > { %v3484_v8 = vrot.slane %v9416_v51, 4  ;;  %4709 = vmatmul.mubr.bf16.gmra.mrb[20].mxu1 %v4484_v47  ;;  %v9417_v44 = vmov %v9416_v51  ;;  %v3363_v50 = vsel %vm6744_vm8, %v3358_v61, %v3362_v63  ;;  %v3368_v43 = vrot.slane %v3367_v36, 4  ;;  %v9420_v61 = vld [vmem:[#allocation13_spill] sm:$0xff]  ;;  %v3935_v51 = vpop.permute.xlu1 %3934 }
 0x2aa   : > { %v3483_v46 = vsel %vm6736_vm5, %v5641_v27, %v9417_v44  ;;  %v9419_v5 = vrot.slane %v9418_v54, 5  ;;  %v4415_v33 = vsel %vm4401_vm3, %v4382_v24, %v8374_v62  ;;  %v3503_v34 = vrot.slane %v6448_v41, 5  ;;  %v6450_v27 = vld [vmem:[#allocation2 + $0x54] sm:$0xf] }
 0x2ab   : > { %v5658_v20 = vcombine.low %v6450_v27, %v6449_v48  ;;  %v4448_v52 = vsel %vm4434_vm4, %v4415_v33, %v8234_v6  ;;  %4124 = vrot.lane.b32.xlu0 %v5762_v0, %s6492_s23  ;;  %v3373_v63 = vsel %vm6744_vm8, %v3368_v43, %v3372_v45  ;;  %v4320_v58 = vsel %vm486_vm0, %v4281_v60, %v8442_v31  ;;  %v3383_v43 = vld [vmem:[#allocation2 + $0x84] sm:$0xe]  ;;  %v6451_v54 = vld [vmem:[#allocation2 + $0x94] sm:$0xf]  ;;  %v6453_v48 = vld [vmem:[#allocation2 + $0x98] sm:$0x1] }
 0x2ac   : > { %v3486_v37 = vsel %vm6736_vm5, %v3484_v8, %v9419_v5  ;;  %v9421_v62 = vrot.slane %v9420_v61, 5  ;;  %v5778_v8 = vcombine.low %v3363_v50, %v3373_v63  ;;  %v4353_v6 = vsel %vm4335_vm1, %v4320_v58, %v8565_v1  ;;  %v8813_v50 = vpop.permute.xlu0 %3858  ;;  %v9427_v41 = vld [vmem:[#allocation19_spill] sm:$0xff]  ;;  %s349_s23 = scalar_lea.vmem [#allocation3], %s5468_s12 }
 0x2ad   : > { %v5785_v38 = vcombine.low %v3483_v46, %v3486_v37  ;;  %v4278_v42 = vsel %vm4254_vm15, %v5658_v20, %v8604_v55  ;;  %v5643_v45 = vrot.slane %v3382_v57, 9  ;;  %v4487_v0 = vsel %vm4467_vm6, %v4448_v52, %v8444_v25  ;;  %v9424_v46 = vld [vmem:[#allocation11_spill] sm:$0xff]  ;;  %v6452_v37 = vld [vmem:[#allocation2 + $0x8c] sm:$0x1] }
 0x2ae   : > { %v3490_v36 = vsel %vm6736_vm5, %v5642_v21, %v9421_v62  ;;  %v9422_v47 = vmov %v9421_v62  ;;  %v4318_v31 = vsel %vm486_vm0, %v4278_v42, %v8407_v9  ;;  %v9423_v60 = vrot.slane %v8018_v28, 5  ;;  %4204 = vrot.lane.b32.xlu1 %v5778_v8, %s6495_s26  ;;  %v6454_v20 = vld [vmem:[#allocation2 + $0xac] sm:$0xf]  ;;  %v3384_v61 = vld [vmem:[#allocation2 + $0x90] sm:$0xe]  ;;  %s5389_s26 = scalar_lea.vmem (%p6577_p4), %s9308_s10, %s5925_s13 }
 0x2af   : > { %v3491_v10 = vrot.slane %v9422_v47, 4  ;;  %5810 = vmatprep.mubr.msk.bf16.mxu1 %vm4254_vm15, %v5785_v38  ;;  %v9425_v24 = vrot.slane %v9424_v46, 5  ;;  %v4351_v1 = vsel %vm4335_vm1, %v4318_v31, %v8272_v49  ;;  %v4386_v28 = vsel %vm4368_vm2, %v4353_v6, %v3935_v51  ;;  %v9429_v6 = vld [vmem:[#allocation16_spill] sm:$0xff]  ;;  %v6455_v31 = vld [vmem:[#allocation2 + $0x70] sm:$0xf] }
 0x2b0   : > { %v3510_v5 = vrot.slane %v6451_v54, 5  ;;  %v3506_v33 = vrot.slane %v6452_v37, 5  ;;  %v4384_v57 = vsel %vm4368_vm2, %v4351_v1, %v8482_v56  ;;  %v9428_v38 = vrot.slane %v9427_v41, 5  ;;  %v3387_v41 = vld [vmem:[#allocation2 + $0xb4] sm:$0xe] }
 0x2b1   : > { %v3493_v44 = vsel %vm6736_vm5, %v3491_v10, %v9423_v60  ;;  %v3498_v21 = vrot.slane %v9425_v24, 4  ;;  %v9426_v9 = vmov %v9425_v24  ;;  %v3513_v27 = vrot.slane %v6453_v48, 5  ;;  %4717 = vmatmul.mubr.bf16.gmra.mrb[24].mxu1 %v4487_v0  ;;  %v6456_v0 = vld [vmem:[#allocation2 + $0x6c] sm:$0xf]  ;;  %v9430_v24 = vld [vmem:[#allocation5_spill] sm:$0xff] }
 0x2b2   : > { %v5786_v55 = vcombine.low %v3490_v36, %v3493_v44  ;;  %v3497_v25 = vsel %vm6736_vm5, %v5643_v45, %v9426_v9  ;;  %v3524_v52 = vrot.slane %v6454_v20, 5  ;;  %v3517_v63 = vrot.slane %v8284_v13, 5  ;;  %v3681_v36 = vpop.permute.xlu1 %3680  ;;  %v3385_v45 = vld [vmem:[#allocation2 + $0x9c] sm:$0xe]  ;;  %v8839_v44 = vpop.permute.xlu0 %4018 }
 0x2b3   : > { %v3500_v49 = vsel %vm6736_vm5, %v3498_v21, %v9428_v38  ;;  %v4417_v62 = vsel %vm4401_vm3, %v4384_v57, %v8405_v12  ;;  %v4419_v56 = vsel %vm4401_vm3, %v4386_v28, %v8606_v59  ;;  %v5644_v47 = vrot.slane %v3383_v43, 9  ;;  %v9431_v21 = vld [vmem:[#allocation20_spill] sm:$0xff] }
 0x2b4   : > { %v5787_v58 = vcombine.low %v3497_v25, %v3500_v49  ;;  %5811 = vmatprep.mubr.msk.bf16.mxu1 %vm4254_vm15, %v5786_v55  ;;  %v3505_v10 = vrot.slane %v3503_v34, 4  ;;  %v3527_v51 = vrot.slane %v8428_v26, 5  ;;  %v3538_v8 = vrot.slane %v8448_v14, 5  ;;  %v3386_v26 = vld [vmem:[#allocation2 + $0xa8] sm:$0xe] }
 0x2b5   : > { %v3520_v13 = vrot.slane %v9429_v6, 5  ;;  %v3531_v42 = vrot.slane %v8493_v11, 5  ;;  %v5660_v60 = vcombine.low %v6456_v0, %v6455_v31  ;;  %v3504_v12 = vsel %vm6736_vm5, %v5644_v47, %v3503_v34 }
 0x2b6   : > { %v3507_v59 = vsel %vm6736_vm5, %v3505_v10, %v3506_v33  ;;  %v5645_v46 = vrot.slane %v3384_v61, 9  ;;  %v4450_v14 = vsel %vm4434_vm4, %v4417_v62, %v9430_v24  ;;  %v4452_v11 = vsel %vm4434_vm4, %v4419_v56, %v9431_v21  ;;  %v8851_v25 = vpop.permute.xlu1 %4020  ;;  %v3389_v61 = vld [vmem:[#allocation2 + $0xcc] sm:$0xe]  ;;  %v3765_v56 = vpop.permute.xlu0 %3764  ;;  %v9432_v24 = vld [vmem:[#allocation21_spill] sm:$0xff] }
 0x2b7   : > { %v5788_v1 = vcombine.low %v3504_v12, %v3507_v59  ;;  %v3512_v55 = vrot.slane %v3510_v5, 4  ;;  %v4490_v9 = vsel %vm4467_vm6, %v4450_v14, %v8756_v7  ;;  %v5646_v28 = vrot.slane %v3385_v45, 9 }
 0x2b8   : > { %v3511_v34 = vsel %vm6736_vm5, %v5645_v46, %v3510_v5  ;;  %v3519_v43 = vrot.slane %v3517_v63, 4  ;;  %v4284_v54 = vsel %vm4254_vm15, %v5660_v60, %v3681_v36  ;;  %v5647_v33 = vrot.slane %v3386_v26, 9  ;;  %v3388_v5 = vld [vmem:[#allocation2 + $0xc0] sm:$0xe] }
 0x2b9   : > { %v3514_v37 = vsel %vm6736_vm5, %v3512_v55, %v3513_v27  ;;  %v3526_v57 = vrot.slane %v3524_v52, 4  ;;  %v8860_v49 = vsel %vm6736_vm5, %v5646_v28, %v3517_v63  ;;  %4725 = vmatmul.mubr.bf16.gmra.mrb[28].mxu1 %v4490_v9  ;;  %v4493_v48 = vsel %vm4467_vm6, %v4452_v11, %v8694_v16 }
 0x2ba   : > { %v5789_v38 = vcombine.low %v3511_v34, %v3514_v37  ;;  %v8864_v7 = vsel %vm6736_vm5, %v3519_v43, %v3520_v13  ;;  %v8872_v20 = vsel %vm6736_vm5, %v5647_v33, %v3524_v52  ;;  %5812 = vmatprep.mubr.msk.bf16.mxu1 %vm4254_vm15, %v5787_v58  ;;  %v4322_v62 = vsel %vm486_vm0, %v4284_v54, %v8652_v29  ;;  %v8881_v36 = vpop.permute.xlu1 %3766  ;;  %v4195_v46 = vpop.permute.xlu0 %4194  ;;  %v6457_v54 = vld [vmem:[#allocation2 + $0x7c] sm:$0xf]  ;;  %v6458_v37 = vld [vmem:[#allocation2 + $0x78] sm:$0xf] }
 0x2bb   : > { %v5790_v27 = vcombine.low %v8860_v49, %v8864_v7  ;;  %v8876_v63 = vsel %vm6736_vm5, %v3526_v57, %v3527_v51  ;;  %v5648_v47 = vrot.slane %v3387_v41, 9  ;;  %v3533_v10 = vrot.slane %v3531_v42, 4 }
 0x2bc   : > { %v5791_v16 = vcombine.low %v8872_v20, %v8876_v63  ;;  %v3534_v52 = vrot.slane %v8617_v4, 5  ;;  %v5649_v6 = vrot.slane %v3388_v5, 9  ;;  %v3540_v13 = vrot.slane %v3538_v8, 4  ;;  %v6463_v20 = vld [vmem:[#allocation2 + $0xa0] sm:$0xf] }
 0x2bd   : > { %v3541_v51 = vrot.slane %v8670_v17, 5  ;;  %v8889_v58 = vsel %vm6736_vm5, %v5648_v47, %v3531_v42  ;;  %v5666_v29 = vcombine.low %v8680_v53, %v8650_v18  ;;  %v5650_v45 = vrot.slane %v3389_v61, 9  ;;  %v6459_v61 = vld [vmem:[#allocation2 + $0x88] sm:$0xf] }
 0x2be   : > { %v3545_v31 = vrot.slane %v8720_v23, 5  ;;  %v8896_v0 = vsel %vm6736_vm5, %v3533_v10, %v3534_v52  ;;  %v8900_v4 = vsel %vm6736_vm5, %v5649_v6, %v3538_v8  ;;  %v3548_v42 = vrot.slane %v8737_v22, 5  ;;  %v8907_v60 = vpop.permute.xlu1 %4118 }
 0x2bf   : > { %v8904_v17 = vsel %vm6736_vm5, %v3540_v13, %v3541_v51  ;;  %v5792_v12 = vcombine.low %v8889_v58, %v8896_v0  ;;  %v4355_v22 = vsel %vm4335_vm1, %v4322_v62, %v9432_v24  ;;  %v5664_v63 = vcombine.low %v8537_v40, %v6463_v20 }
 0x2c0   : > { %v5793_v23 = vcombine.low %v8900_v4, %v8904_v17  ;;  %v8915_v59 = vsel %vm6736_vm5, %v5650_v45, %v3545_v31  ;;  %v3547_v8 = vrot.slane %v3545_v31, 4  ;;  %v4388_v11 = vsel %vm4368_vm2, %v4355_v22, %v8709_v15  ;;  %v3941_v55 = vpop.permute.xlu0 %3940 }
 0x2c1   : > { %4733 = vmatmul.mubr.bf16.gmra.mrb[32].mxu1 %v4493_v48  ;;  %v4421_v30 = vsel %vm4401_vm3, %v4388_v11, %v8635_v3 }
 0x2c2   : > { %v8919_v26 = vsel %vm6736_vm5, %v3547_v8, %v3548_v42  ;;  %5813 = vmatprep.mubr.msk.bf16.mxu1 %vm4254_vm15, %v5788_v1  ;;  %v8926_v21 = vpop.permute.xlu1 %3864  ;;  %v4454_v34 = vsel %vm4434_vm4, %v4421_v30, %v8739_v32  ;;  %v5661_v1 = vcombine.low %v6458_v37, %v6457_v54  ;;  %v6461_v8 = vld [vmem:[#allocation2 + $0x94] sm:$0xf] }
 0x2c3   : > { %v5794_v14 = vcombine.low %v8915_v59, %v8919_v26 }
 0x2c4   : > { %v4117_v43 = vpop.permute.xlu0 %4116  ;;  %v4287_v15 = vsel %vm4254_vm15, %v5661_v1, %v8765_v2 }
 0x2c5   : > { %v4324_v33 = vsel %vm486_vm0, %v4287_v15, %v8672_v35 }
 0x2c6   : > { %v4357_v57 = vsel %vm4335_vm1, %v4324_v33, %v8813_v50  ;;  %v6460_v50 = vld [vmem:[#allocation2 + $0x84] sm:$0xf] }
 0x2c7   : > { %v4193_v9 = vpop.permute.xlu1 %4192  ;;  %v5662_v62 = vcombine.low %v6460_v50, %v6459_v61 }
 0x2c8   : > { %v4496_v28 = vsel %vm4467_vm6, %v4454_v34, %v4193_v9 }
 0x2c9   : > { %4741 = vmatmul.mubr.bf16.gmra.mrb[36].mxu1 %v4496_v28 }
 0x2ca   : > { %5814 = vmatprep.mubr.msk.bf16.mxu1 %vm4254_vm15, %v5789_v38  ;;  %v3687_v3 = vpop.permute.xlu0 %3686 }
 0x2ce   : > { %v3863_v5 = vpop.permute.xlu0 %3862 }
 0x2d0   : > { %v3939_v32 = vpop.permute.xlu1 %3938 }
 0x2d1   : > { %v4390_v41 = vsel %vm4368_vm2, %v4357_v57, %v3939_v32  ;;  %v9433_v57 = vld [vmem:[#allocation14_spill] sm:$0xff] }
 0x2d2   : > { %v4423_v49 = vsel %vm4401_vm3, %v4390_v41, %v8839_v44 }
 0x2d3   : > { %v4456_v7 = vsel %vm4434_vm4, %v4423_v49, %v8703_v39 }
 0x2d4   : > { %v4499_v38 = vsel %vm4467_vm6, %v4456_v7, %v4195_v46  ;;  %v6462_v46 = vld [vmem:[#allocation2 + $0x90] sm:$0xf] }
 0x2d5   : > { %4749 = vmatmul.mubr.bf16.gmra.mrb[40].mxu1 %v4499_v38  ;;  %v5663_v24 = vcombine.low %v6462_v46, %v6461_v8  ;;  %v9020_v8 = vld [vmem:[%s9304_s6] ss:$0 sm:$0xff] }
 0x2d6   : > { %5815 = vmatprep.mubr.msk.bf16.mxu1 %vm4254_vm15, %v5790_v27  ;;  %v4023_v2 = vpop.permute.xlu0 %4022 }
 0x2d7   : > { %v4293_v22 = vsel %vm4254_vm15, %v5663_v24, %v3687_v3  ;;  %v6464_v3 = vld [vmem:[#allocation2 + $0xac] sm:$0xf] }
 0x2d8   : > { %v3685_v35 = vpop.permute.xlu1 %3684  ;;  %v5665_v32 = vcombine.low %v9433_v57, %v6464_v3 }
 0x2d9   : > { %v4290_v47 = vsel %vm4254_vm15, %v5662_v62, %v3685_v35 }
 0x2da   : > { %v4326_v44 = vsel %vm486_vm0, %v4290_v47, %v3765_v56 }
 0x2db   : > { %v4359_v39 = vsel %vm4335_vm1, %v4326_v44, %v8729_v19 }
 0x2dc   : > { %v4025_v48 = vpop.permute.xlu1 %4024  ;;  %v4392_v51 = vsel %vm4368_vm2, %v4359_v39, %v3941_v55 }
 0x2dd   : > { %v4425_v27 = vsel %vm4401_vm3, %v4392_v51, %v8851_v25  ;;  %v4328_v25 = vsel %vm486_vm0, %v4293_v22, %v8881_v36 }
 0x2de   : > { %v3769_v10 = vpop.permute.xlu0 %3768  ;;  %v4458_v42 = vsel %vm4434_vm4, %v4425_v27, %v4117_v43  ;;  %v4361_v11 = vsel %vm4335_vm1, %v4328_v25, %v3863_v5 }
 0x2e1   : > { %v3771_v52 = vpop.permute.xlu1 %3770 }
 0x2e5   : > { %v4123_v13 = vpop.permute.xlu1 %4122 }
 0x2e6   : > { %v4199_v6 = vpop.permute.xlu0 %4198 }
 0x2ed   : > { %v3945_v45 = vpop.permute.xlu0 %3944 }
 0x2ef   : > { %v4197_v31 = vpop.permute.xlu1 %4196 }
 0x2f0   : > { %v4502_v56 = vsel %vm4467_vm6, %v4458_v42, %v4197_v31 }
 0x2f1   : > { %4757 = vmatmul.mubr.bf16.gmra.mrb[44].mxu1 %v4502_v56  ;;  %v4121_v19 = vpop.permute.xlu0 %4120 }
 0x2f2   : > { %5816 = vmatprep.mubr.msk.bf16.mxu1 %vm4254_vm15, %v5791_v16 }
 0x2f7   : > { %v3943_v55 = vpop.permute.xlu1 %3942 }
 0x2f8   : > { %v4394_v30 = vsel %vm4368_vm2, %v4361_v11, %v3943_v55 }
 0x2f9   : > { %v4427_v9 = vsel %vm4401_vm3, %v4394_v30, %v4023_v2 }
 0x2fa   : > { %v3691_v34 = vpop.permute.xlu0 %3690  ;;  %v4460_v28 = vsel %vm4434_vm4, %v4427_v9, %v8907_v60 }
 0x2fb   : > { %v4505_v43 = vsel %vm4467_vm6, %v4460_v28, %v4199_v6  ;;  %v4299_v41 = vsel %vm4254_vm15, %v5665_v32, %v3691_v34 }
 0x2fc   : > { %4765 = vmatmul.mubr.bf16.gmra.mrb[48].mxu1 %v4505_v43  ;;  %v4332_v38 = vsel %vm486_vm0, %v4299_v41, %v3771_v52 }
 0x2fd   : > { %5817 = vmatprep.mubr.msk.bf16.mxu1 %vm4254_vm15, %v5792_v12 }
 0x2fe   : > { %v3867_v16 = vpop.permute.xlu0 %3866 }
 0x2ff   : > { %v3689_v36 = vpop.permute.xlu1 %3688  ;;  %v4365_v35 = vsel %vm4335_vm1, %v4332_v38, %v3867_v16 }
 0x300   : > { %v4296_v54 = vsel %vm4254_vm15, %v5664_v63, %v3689_v36 }
 0x301   : > { %v4330_v37 = vsel %vm486_vm0, %v4296_v54, %v3769_v10 }
 0x302   : > { %v4363_v60 = vsel %vm4335_vm1, %v4330_v37, %v8926_v21 }
 0x303   : > { %v3869_v1 = vpop.permute.xlu1 %3868  ;;  %v4396_v15 = vsel %vm4368_vm2, %v4363_v60, %v3945_v45  ;;  %v9013_v45 = vld [vmem:[%s9303_s5] ss:$0 sm:$0xff] }
 0x304   : > { %v4429_v33 = vsel %vm4401_vm3, %v4396_v15, %v4025_v48 }
 0x305   : > { %v4027_v58 = vpop.permute.xlu0 %4026  ;;  %v4462_v12 = vsel %vm4434_vm4, %v4429_v33, %v4121_v19 }
 0x307   : > { %v4201_v0 = vpop.permute.xlu1 %4200 }
 0x308   : > { %v4508_v40 = vsel %vm4467_vm6, %v4462_v12, %v4201_v0 }
 0x309   : > { %4773 = vmatmul.mubr.bf16.gmra.mrb[52].mxu1 %v4508_v40  ;;  %v4670_v49 = vpop.f32.mrb[0].mxu1 }
 0x30a   : > { %5818 = vmatprep.mubr.msk.bf16.mxu1 %vm4254_vm15, %v5793_v23  ;;  %v3773_v21 = vpop.permute.xlu0 %3772  ;;  %v4672_v7 = vpop.f32.mrb[1].mxu1  ;;  %v4804_v42 = vmul.f32 %v9013_v45, %v4670_v49 }
 0x30b   : > { %v4673_v5 = vpop.f32.mrb[2].mxu1 }
 0x30c   : > { %v4675_v48 = vpop.f32.mrb[3].mxu1  ;;  %v4805_v31 = vmul.f32 %v9013_v45, %v4673_v5  ;;  %v4843_v24 = vadd.f32 %v9020_v8, %v4804_v42 }
 0x30e   : > { %v4844_v46 = vadd.f32 %v9020_v8, %v4805_v31  ;;  %v5822_v55 = vmul.f32 -1.442695, %v4843_v24 }
 0x30f   : > { %v4203_v50 = vpop.permute.xlu0 %4202 }
 0x310   : > { %v5823_v19 = vmul.f32 -1.442695, %v4844_v46 }
 0x311   : > { %v3947_v2 = vpop.permute.xlu1 %3946 }
 0x312   : > { %v4398_v61 = vsel %vm4368_vm2, %v4365_v35, %v3947_v2  ;;  %6300 = vpow2.f32 %v5823_v19 }
 0x313   : > { %v4431_v62 = vsel %vm4401_vm3, %v4398_v61, %v4027_v58  ;;  %6302 = vpow2.f32 %v5822_v55 }
 0x314   : > { %v4464_v4 = vsel %vm4434_vm4, %v4431_v62, %v4123_v13 }
 0x315   : > { %v4511_v17 = vsel %vm4467_vm6, %v4464_v4, %v4203_v50 }
 0x316   : > { %v3693_v23 = vpop.permute.xlu1 %3692  ;;  %4781 = vmatmul.mubr.bf16.gmra.mrb[56].mxu1 %v4511_v17 }
 0x317   : > { %v4302_v47 = vsel %vm4254_vm15, %v5666_v29, %v3693_v23  ;;  %5819 = vmatprep.mubr.msk.bf16.mxu1 %vm4254_vm15, %v5794_v14 }
 0x318   : > { %v4334_v10 = vsel %vm486_vm0, %v4302_v47, %v3773_v21 }
 0x319   : > { %v3949_v44 = vpop.permute.xlu0 %3948  ;;  %v4367_v52 = vsel %vm4335_vm1, %v4334_v10, %v3869_v1 }
 0x31a   : > { %v4400_v39 = vsel %vm4368_vm2, %v4367_v52, %v3949_v44  ;;  %v4029_v6 = vpop.permute.xlu1 %4028 }
 0x31b   : > { %v4433_v13 = vsel %vm4401_vm3, %v4400_v39, %v4029_v6 }
 0x31c   : > { %v6301_v30 = vpop.eup %6300 }
 0x31d   : > { %v4125_v51 = vpop.permute.xlu0 %4124  ;;  %v6303_v9 = vpop.eup %6302  ;;  %v4972_v34 = vadd.f32 1.0, %v6301_v30 }
 0x31e   : > { %v4466_v18 = vsel %vm4434_vm4, %v4433_v13, %v4125_v51  ;;  %v4971_v43 = vadd.f32 1.0, %v6303_v9 }
 0x31f   : > { %6304 = vrcp.f32 %v4972_v34 }
 0x320   : > { %v4205_v53 = vpop.permute.xlu1 %4204  ;;  %6306 = vrcp.f32 %v4971_v43 }
 0x321   : > { %v4514_v29 = vsel %vm4467_vm6, %v4466_v18, %v4205_v53 }
 0x322   : > { %4789 = vmatmul.mubr.bf16.gmra.mrb[60].mxu1 %v4514_v29 }
 0x325   : > { %v4678_v59 = vpop.f32.mrb[4].mxu1 }
 0x326   : > { %v4680_v26 = vpop.f32.mrb[5].mxu1  ;;  %v4806_v20 = vmul.f32 %v9013_v45, %v4678_v59 }
 0x327   : > { %v4681_v14 = vpop.f32.mrb[6].mxu1 }
 0x328   : > { %v4683_v27 = vpop.f32.mrb[7].mxu1  ;;  %v4807_v28 = vmul.f32 %v9013_v45, %v4681_v14  ;;  %v9030_v36 = vadd.f32 %v9020_v8, %v4806_v20 }
 0x329   : > { %v6305_v33 = vpop.eup %6304 }
 0x32a   : > { %v9027_v63 = vadd.f32 %v9020_v8, %v4807_v28  ;;  %v5824_v54 = vmul.f32 -1.442695, %v9030_v36  ;;  %v6307_v12 = vpop.eup %6306  ;;  %v5068_v40 = vmul.f32 %v6305_v33, %v4844_v46 }
 0x32b   : > { %v5067_v57 = vmul.f32 %v6307_v12, %v4843_v24 }
 0x32c   : > { %v5825_v16 = vmul.f32 -1.442695, %v9027_v63  ;;  %v5100_v21 = vmul.f32 25.475084, %v5068_v40 }
 0x32d   : > { %v5099_v7 = vmul.f32 25.475084, %v5067_v57 }
 0x32e   : > { %6308 = vpow2.f32 %v5825_v16  ;;  %v6039_v61 = vround.rtne.f32 %v5100_v21 }
 0x32f   : > { %6310 = vpow2.f32 %v5824_v54  ;;  %v6038_v23 = vround.rtne.f32 %v5099_v7 }
 0x330   : > { %v9054_v6 = vclamps-f32 %v6039_v61, 127.0 }
 0x331   : > { %v9062_v18 = vclamps-f32 %v6038_v23, 127.0 }
 0x333   : > { %v5227_v26 = vpack.c.bf16 %v9054_v6, %v9062_v18 }
 0x335   : > { %v4686_v56 = vpop.f32.mrb[8].mxu1 }
 0x336   : > { %v4688_v22 = vpop.f32.mrb[9].mxu1  ;;  %v4808_v0 = vmul.f32 %v9013_v45, %v4686_v56 }
 0x337   : > { %v4689_v25 = vpop.f32.mrb[10].mxu1 }
 0x338   : > { %v4691_v11 = vpop.f32.mrb[11].mxu1  ;;  %v4809_v1 = vmul.f32 %v9013_v45, %v4689_v25  ;;  %v9040_v32 = vadd.f32 %v9020_v8, %v4808_v0  ;;  %v6309_v49 = vpop.eup %6308 }
 0x339   : > { %v6311_v48 = vpop.eup %6310  ;;  %v4974_v62 = vadd.f32 1.0, %v6309_v49 }
 0x33a   : > { %v9037_v3 = vadd.f32 %v9020_v8, %v4809_v1  ;;  %v5826_v38 = vmul.f32 -1.442695, %v9040_v32  ;;  %v4973_v52 = vadd.f32 1.0, %v6311_v48 }
 0x33c   : > { %v5827_v41 = vmul.f32 -1.442695, %v9037_v3 }
 0x33e   : > { %6312 = vpow2.f32 %v5827_v41 }
 0x33f   : > { %6314 = vpow2.f32 %v5826_v38 }
 0x340   : > { %6316 = vrcp.f32 %v4974_v62 }
 0x341   : > { %6318 = vrcp.f32 %v4973_v52 }
 0x348   : > { %v6313_v27 = vpop.eup %6312 }
 0x349   : > { %v6315_v31 = vpop.eup %6314  ;;  %v4976_v42 = vadd.f32 1.0, %v6313_v27 }
 0x34a   : > { %v6317_v46 = vpop.eup %6316  ;;  %v4975_v24 = vadd.f32 1.0, %v6315_v31 }
 0x34b   : > { %v6319_v56 = vpop.eup %6318  ;;  %v5070_v22 = vmul.f32 %v6317_v46, %v9027_v63 }
 0x34c   : > { %v5069_v25 = vmul.f32 %v6319_v56, %v9030_v36 }
 0x34d   : > { %v5102_v30 = vmul.f32 25.475084, %v5070_v22 }
 0x34e   : > { %v5101_v28 = vmul.f32 25.475084, %v5069_v25 }
 0x350   : > { %v6040_v0 = vround.rtne.f32 %v5101_v28 }
 0x352   : > { %v9085_v7 = vclamps-f32 %v6040_v0, 127.0 }
 0x354   : > { %v4694_v37 = vpop.f32.mrb[12].mxu1 }
 0x355   : > { %v4696_v60 = vpop.f32.mrb[13].mxu1  ;;  %v4810_v5 = vmul.f32 %v9013_v45, %v4694_v37 }
 0x356   : > { %v4697_v15 = vpop.f32.mrb[14].mxu1  ;;  %v6041_v60 = vround.rtne.f32 %v5102_v30 }
 0x357   : > { %v4699_v58 = vpop.f32.mrb[15].mxu1  ;;  %v4811_v35 = vmul.f32 %v9013_v45, %v4697_v15  ;;  %v9048_v47 = vadd.f32 %v9020_v8, %v4810_v5 }
 0x358   : > { %v9081_v21 = vclamps-f32 %v6041_v60, 127.0 }
 0x359   : > { %v9052_v39 = vadd.f32 %v9020_v8, %v4811_v35  ;;  %v5828_v53 = vmul.f32 -1.442695, %v9048_v47 }
 0x35b   : > { %v5829_v29 = vmul.f32 -1.442695, %v9052_v39  ;;  %6320 = vpow2.f32 %v5828_v53 }
 0x35d   : > { %6322 = vpow2.f32 %v5829_v29 }
 0x361   : > { %v4702_v2 = vpop.f32.mrb[16].mxu1 }
 0x362   : > { %v4704_v50 = vpop.f32.mrb[17].mxu1  ;;  %v4812_v4 = vmul.f32 %v9013_v45, %v4702_v2 }
 0x363   : > { %v4705_v17 = vpop.f32.mrb[18].mxu1  ;;  %v5228_v50 = vpack.c.bf16 %v9081_v21, %v9085_v7 }
 0x364   : > { %v4813_v10 = vmul.f32 %v9013_v45, %v4705_v17  ;;  %v4707_v44 = vpop.f32.mrb[19].mxu1  ;;  %v9060_v51 = vadd.f32 %v9020_v8, %v4812_v4 }
 0x365   : > { %v6321_v19 = vpop.eup %6320 }
 0x366   : > { %v9057_v13 = vadd.f32 %v9020_v8, %v4813_v10  ;;  %v5830_v14 = vmul.f32 -1.442695, %v9060_v51  ;;  %v4977_v34 = vadd.f32 1.0, %v6321_v19 }
 0x367   : > { %v6323_v11 = vpop.eup %6322 }
 0x368   : > { %v5831_v59 = vmul.f32 -1.442695, %v9057_v13  ;;  %v4978_v43 = vadd.f32 1.0, %v6323_v11 }
 0x36a   : > { %6324 = vpow2.f32 %v5831_v59 }
 0x36b   : > { %6326 = vpow2.f32 %v5830_v14 }
 0x36c   : > { %6328 = vrcp.f32 %v4976_v42 }
 0x36d   : > { %6330 = vrcp.f32 %v4975_v24 }
 0x36e   : > { %6332 = vrcp.f32 %v4977_v34 }
 0x36f   : > { %6334 = vrcp.f32 %v4978_v43 }
 0x374   : > { %v6325_v55 = vpop.eup %6324 }
 0x375   : > { %v6327_v9 = vpop.eup %6326  ;;  %v4980_v16 = vadd.f32 1.0, %v6325_v55 }
 0x376   : > { %v4979_v1 = vadd.f32 1.0, %v6327_v9  ;;  %v6329_v63 = vpop.eup %6328 }
 0x377   : > { %v6331_v12 = vpop.eup %6330  ;;  %6336 = vrcp.f32 %v4980_v16  ;;  %v5072_v41 = vmul.f32 %v6329_v63, %v9037_v3 }
 0x378   : > { %6338 = vrcp.f32 %v4979_v1  ;;  %v5071_v38 = vmul.f32 %v6331_v12, %v9040_v32  ;;  %v6333_v23 = vpop.eup %6332 }
 0x379   : > { %v5104_v48 = vmul.f32 25.475084, %v5072_v41  ;;  %v6335_v44 = vpop.eup %6334  ;;  %v5073_v55 = vmul.f32 %v6333_v23, %v9048_v47 }
 0x37a   : > { %v5103_v17 = vmul.f32 25.475084, %v5071_v38  ;;  %v5074_v42 = vmul.f32 %v6335_v44, %v9052_v39 }
 0x37b   : > { %v6043_v52 = vround.rtne.f32 %v5104_v48 }
 0x37c   : > { %v4710_v20 = vpop.f32.mrb[20].mxu1  ;;  %v6042_v14 = vround.rtne.f32 %v5103_v17 }
 0x37d   : > { %v4814_v54 = vmul.f32 %v9013_v45, %v4710_v20  ;;  %v4712_v37 = vpop.f32.mrb[21].mxu1  ;;  %v9102_v56 = vclamps-f32 %v6043_v52, 127.0  ;;  %v5106_v20 = vmul.f32 25.475084, %v5074_v42 }
 0x37e   : > { %v4713_v15 = vpop.f32.mrb[22].mxu1  ;;  %v9110_v39 = vclamps-f32 %v6042_v14, 127.0  ;;  %v5105_v37 = vmul.f32 25.475084, %v5073_v55 }
 0x37f   : > { %v9074_v33 = vadd.f32 %v9020_v8, %v4814_v54  ;;  %v4815_v36 = vmul.f32 %v9013_v45, %v4713_v15  ;;  %v4715_v58 = vpop.f32.mrb[23].mxu1  ;;  %v6045_v63 = vround.rtne.f32 %v5106_v20 }
 0x380   : > { %v5229_v47 = vpack.c.bf16 %v9102_v56, %v9110_v39 }
 0x381   : > { %v5832_v40 = vmul.f32 -1.442695, %v9074_v33  ;;  %v9079_v57 = vadd.f32 %v9020_v8, %v4815_v36  ;;  %v6337_v53 = vpop.eup %6336 }
 0x382   : > { %v6339_v59 = vpop.eup %6338  ;;  %v5076_v22 = vmul.f32 %v6337_v53, %v9057_v13 }
 0x383   : > { %6340 = vpow2.f32 %v5832_v40  ;;  %v5833_v49 = vmul.f32 -1.442695, %v9079_v57  ;;  %v5075_v28 = vmul.f32 %v6339_v59, %v9060_v51 }
 0x384   : > { %v4718_v5 = vpop.f32.mrb[24].mxu1  ;;  %v5108_v54 = vmul.f32 25.475084, %v5076_v22 }
 0x385   : > { %6342 = vpow2.f32 %v5833_v49  ;;  %v4816_v35 = vmul.f32 %v9013_v45, %v4718_v5  ;;  %v4720_v2 = vpop.f32.mrb[25].mxu1  ;;  %v5107_v1 = vmul.f32 25.475084, %v5075_v28  ;;  %v6044_v49 = vround.rtne.f32 %v5105_v37 }
 0x386   : > { %v4721_v61 = vpop.f32.mrb[26].mxu1  ;;  %v6047_v0 = vround.rtne.f32 %v5108_v54 }
 0x387   : > { %v9092_v3 = vadd.f32 %v9020_v8, %v4816_v35  ;;  %v4817_v62 = vmul.f32 %v9013_v45, %v4721_v61  ;;  %v4723_v4 = vpop.f32.mrb[27].mxu1  ;;  %v6046_v2 = vround.rtne.f32 %v5107_v1  ;;  %v9125_v61 = vclamps-f32 %v6045_v63, 127.0 }
 0x388   : > { %v9131_v23 = vclamps-f32 %v6047_v0, 127.0 }
 0x389   : > { %v5834_v32 = vmul.f32 -1.442695, %v9092_v3  ;;  %v9097_v10 = vadd.f32 %v9020_v8, %v4817_v62 }
 0x38b   : > { %6344 = vpow2.f32 %v5834_v32  ;;  %v5835_v29 = vmul.f32 -1.442695, %v9097_v10  ;;  %v9133_v32 = vclamps-f32 %v6044_v49, 127.0 }
 0x38c   : > { %v4726_v27 = vpop.f32.mrb[28].mxu1 }
 0x38d   : > { %v6341_v31 = vpop.eup %6340  ;;  %6346 = vpow2.f32 %v5835_v29  ;;  %v4818_v46 = vmul.f32 %v9013_v45, %v4726_v27  ;;  %v4728_v24 = vpop.f32.mrb[29].mxu1  ;;  %v9137_v29 = vclamps-f32 %v6046_v2, 127.0  ;;  %v5344_v2 = vld [vmem:[%s9306_s8] sm:$0xff] }
 0x38e   : > { %v4981_v19 = vadd.f32 1.0, %v6341_v31  ;;  %v4729_v25 = vpop.f32.mrb[30].mxu1  ;;  %v5230_v31 = vpack.c.bf16 %v9125_v61, %v9133_v32  ;;  %5348 = vperm.xlu0 %6102, %v5344_v2  }
 0x38f   : > { %v6343_v11 = vpop.eup %6342  ;;  %v9107_v30 = vadd.f32 %v9020_v8, %v4818_v46  ;;  %v4819_v9 = vmul.f32 %v9013_v45, %v4729_v25  ;;  %v4731_v34 = vpop.f32.mrb[31].mxu1  ;;  %v5231_v46 = vpack.c.bf16 %v9131_v23, %v9137_v29 }
 0x390   : > { %6348 = vrcp.f32 %v4981_v19  ;;  %v4982_v43 = vadd.f32 1.0, %v6343_v11 }
 0x391   : > { %v5836_v13 = vmul.f32 -1.442695, %v9107_v30  ;;  %v9115_v16 = vadd.f32 %v9020_v8, %v4819_v9 }
 0x392   : > { %6350 = vrcp.f32 %v4982_v43 }
 0x393   : > { %6352 = vpow2.f32 %v5836_v13  ;;  %v5837_v60 = vmul.f32 -1.442695, %v9115_v16  ;;  %v9152_v13 = vld [vmem:[%s9305_s7] sm:$0xff]  }
 0x394   : > { %v4734_v15 = vpop.f32.mrb[32].mxu1  ;;  %5960 = vmatprep.mubr.msk.bf16.mxu0 %vm486_vm0, %v9152_v13 }
 0x395   : > { %v6345_v51 = vpop.eup %6344  ;;  %6354 = vpow2.f32 %v5837_v60  ;;  %v4820_v36 = vmul.f32 %v9013_v45, %v4734_v15  ;;  %v4736_v58 = vpop.f32.mrb[33].mxu1 }
 0x396   : > { %v4983_v12 = vadd.f32 1.0, %v6345_v51  ;;  %v4737_v40 = vpop.f32.mrb[34].mxu1 }
 0x397   : > { %v6347_v41 = vpop.eup %6346  ;;  %v9122_v38 = vadd.f32 %v9020_v8, %v4820_v36  ;;  %v4821_v5 = vmul.f32 %v9013_v45, %v4737_v40  ;;  %v4739_v35 = vpop.f32.mrb[35].mxu1 }
 0x398   : > { %6356 = vrcp.f32 %v4983_v12  ;;  %v4984_v48 = vadd.f32 1.0, %v6347_v41 }
 0x399   : > { %v5838_v62 = vmul.f32 -1.442695, %v9122_v38  ;;  %v9129_v4 = vadd.f32 %v9020_v8, %v4821_v5 }
 0x39a   : > { %v6349_v17 = vpop.eup %6348  ;;  %6358 = vrcp.f32 %v4984_v48 }
 0x39b   : > { %v5077_v44 = vmul.f32 %v6349_v17, %v9074_v33  ;;  %6360 = vpow2.f32 %v5838_v62  ;;  %v5839_v52 = vmul.f32 -1.442695, %v9129_v4 }
 0x39c   : > { %v6351_v53 = vpop.eup %6350  ;;  %v4742_v19 = vpop.f32.mrb[36].mxu1 }
 0x39d   : > { %v6353_v59 = vpop.eup %6352  ;;  %v5109_v14 = vmul.f32 25.475084, %v5077_v44  ;;  %v5078_v27 = vmul.f32 %v6351_v53, %v9079_v57  ;;  %6362 = vpow2.f32 %v5839_v52  ;;  %v4822_v11 = vmul.f32 %v9013_v45, %v4742_v19  ;;  %v4744_v55 = vpop.f32.mrb[37].mxu1  ;;  %v5361_v53 = vld [vmem:[%s9307_s9 + $0x8] sm:$0xff] }
 0x39e   : > { %v4985_v42 = vadd.f32 1.0, %v6353_v59  ;;  %v4745_v34 = vpop.f32.mrb[38].mxu1  ;;  %v5360_v59 = vld [vmem:[%s9307_s9] sm:$0xff]  ;;  %5369 = vperm.xlu0 %6102, %v5361_v53  }
 0x39f   : > { %v6355_v24 = vpop.eup %6354  ;;  %v6048_v33 = vround.rtne.f32 %v5109_v14  ;;  %v5110_v22 = vmul.f32 25.475084, %v5078_v27  ;;  %v9146_v28 = vadd.f32 %v9020_v8, %v4822_v11  ;;  %v4823_v43 = vmul.f32 %v9013_v45, %v4745_v34  ;;  %v4747_v20 = vpop.f32.mrb[39].mxu1 }
 0x3a0   : > { %6364 = vrcp.f32 %v4985_v42  ;;  %v4986_v25 = vadd.f32 1.0, %v6355_v24 }
 0x3a1   : > { %v6049_v9 = vround.rtne.f32 %v5110_v22  ;;  %v9154_v54 = vclamps-f32 %v6048_v33, 127.0  ;;  %v5840_v15 = vmul.f32 -1.442695, %v9146_v28  ;;  %v9161_v51 = vadd.f32 %v9020_v8, %v4823_v43 }
 0x3a2   : > { %v6357_v57 = vpop.eup %6356  ;;  %6366 = vrcp.f32 %v4986_v25 }
 0x3a3   : > { %v9156_v37 = vclamps-f32 %v6049_v9, 127.0  ;;  %v5079_v60 = vmul.f32 %v6357_v57, %v9092_v3  ;;  %6368 = vpow2.f32 %v5840_v15  ;;  %v5841_v3 = vmul.f32 -1.442695, %v9161_v51 }
 0x3a4   : > { %v6359_v1 = vpop.eup %6358 }
 0x3a5   : > { %v6361_v63 = vpop.eup %6360  ;;  %v5111_v36 = vmul.f32 25.475084, %v5079_v60  ;;  %v5080_v58 = vmul.f32 %v6359_v1, %v9097_v10  ;;  %v5232_v0 = vpack.c.bf16 %v9156_v37, %v9154_v54  ;;  %v5345_v10 = vld [vmem:[%s9306_s8 + $0x8] sm:$0xff] }
 0x3a6   : > { %v4987_v12 = vadd.f32 1.0, %v6361_v63  ;;  %5353 = vperm.xlu1 %6103, %v5345_v10  }
 0x3a7   : > { %v6363_v40 = vpop.eup %6362  ;;  %v6050_v41 = vround.rtne.f32 %v5111_v36  ;;  %v5112_v49 = vmul.f32 25.475084, %v5080_v58 }
 0x3a8   : > { %6370 = vrcp.f32 %v4987_v12  ;;  %v4988_v5 = vadd.f32 1.0, %v6363_v40  ;;  %v4750_v52 = vpop.f32.mrb[40].mxu1 }
 0x3a9   : > { %v6051_v35 = vround.rtne.f32 %v5112_v49  ;;  %6372 = vpow2.f32 %v5841_v3  ;;  %v9175_v62 = vclamps-f32 %v6050_v41, 127.0  ;;  %v4824_v27 = vmul.f32 %v9013_v45, %v4750_v52  ;;  %v4752_v42 = vpop.f32.mrb[41].mxu1 }
 0x3aa   : > { %v6365_v48 = vpop.eup %6364  ;;  %6374 = vrcp.f32 %v4988_v5  ;;  %v4753_v22 = vpop.f32.mrb[42].mxu1  ;;  %5364 = vperm.xlu1 %6103, %v5360_v59  }
 0x3ab   : > { %v9177_v17 = vclamps-f32 %v6051_v35, 127.0  ;;  %v5081_v44 = vmul.f32 %v6365_v48, %v9107_v30  ;;  %v4863_v19 = vadd.f32 %v9020_v8, %v4824_v27  ;;  %v4825_v25 = vmul.f32 %v9013_v45, %v4753_v22  ;;  %v4755_v11 = vpop.f32.mrb[43].mxu1 }
 0x3ac   : > { %v6367_v14 = vpop.eup %6366 }
 0x3ad   : > { %v5113_v24 = vmul.f32 25.475084, %v5081_v44  ;;  %v5082_v33 = vmul.f32 %v6367_v14, %v9115_v16  ;;  %v5233_v30 = vpack.c.bf16 %v9177_v17, %v9175_v62  ;;  %v6369_v34 = vpop.eup %6368  ;;  %v5842_v57 = vmul.f32 -1.442695, %v4863_v19 }
 0x3ae   : > { %v4864_v43 = vadd.f32 %v9020_v8, %v4825_v25  ;;  %v4989_v60 = vadd.f32 1.0, %v6369_v34 }
 0x3af   : > { %v6052_v55 = vround.rtne.f32 %v5113_v24  ;;  %v5114_v9 = vmul.f32 25.475084, %v5082_v33  ;;  %6376 = vpow2.f32 %v5842_v57  ;;  %v5272_v54 = vsel %vm486_vm0, %v5233_v30, 0 }
 0x3b0   : > { %v5843_v1 = vmul.f32 -1.442695, %v4864_v43  ;;  %6378 = vrcp.f32 %v4989_v60 }
 0x3b1   : > { %v6053_v20 = vround.rtne.f32 %v5114_v9  ;;  %v9193_v63 = vclamps-f32 %v6052_v55, 127.0 }
 0x3b2   : > { %v6371_v16 = vpop.eup %6370  ;;  %6380 = vpow2.f32 %v5843_v1 }
 0x3b3   : > { %v6373_v15 = vpop.eup %6372  ;;  %v9195_v36 = vclamps-f32 %v6053_v20, 127.0  ;;  %v5083_v58 = vmul.f32 %v6371_v16, %v9122_v38 }
 0x3b4   : > { %v6375_v12 = vpop.eup %6374  ;;  %v4990_v3 = vadd.f32 1.0, %v6373_v15  ;;  %v5257_v15 = vsel %vm486_vm0, %v5228_v50, 0 }
 0x3b5   : > { %v5115_v40 = vmul.f32 25.475084, %v5083_v58  ;;  %v5084_v41 = vmul.f32 %v6375_v12, %v9129_v4  ;;  %v5234_v49 = vpack.c.bf16 %v9195_v36, %v9193_v63  ;;  %v5254_v4 = vsel %vm486_vm0, %v5227_v26, 0 }
 0x3b6   : > { %6382 = vrcp.f32 %v4990_v3 }
 0x3b7   : > { %v6054_v5 = vround.rtne.f32 %v5115_v40  ;;  %v5116_v35 = vmul.f32 25.475084, %v5084_v41 }
 0x3b9   : > { %v6055_v2 = vround.rtne.f32 %v5116_v35  ;;  %v5870_v10 = vclamps-f32 %v6054_v5, 127.0  ;;  %v6377_v44 = vpop.eup %6376 }
 0x3ba   : > { %v6379_v52 = vpop.eup %6378  ;;  %v4991_v53 = vadd.f32 1.0, %v6377_v44 }
 0x3bb   : > { %v5871_v48 = vclamps-f32 %v6055_v2, 127.0  ;;  %v5085_v14 = vmul.f32 %v6379_v52, %v9146_v28 }
 0x3bc   : > { %v6381_v59 = vpop.eup %6380  ;;  %6384 = vrcp.f32 %v4991_v53 }
 0x3bd   : > { %v5235_v38 = vpack.c.bf16 %v5871_v48, %v5870_v10  ;;  %v4992_v27 = vadd.f32 1.0, %v6381_v59  ;;  %v5117_v24 = vmul.f32 25.475084, %v5085_v14  ;;  %v5260_v14 = vsel %vm486_vm0, %v5229_v47, 0 }
 0x3bf   : > { %5998 = vmatprep.subr.msk.bf16.mxu0 %vm486_vm0, %v5235_v38  ;;  %6386 = vrcp.f32 %v4992_v27  ;;  %v6056_v22 = vround.rtne.f32 %v5117_v24 }
 0x3c0   : > { %v6383_v42 = vpop.eup %6382  ;;  %5945 = vmatpush3.bf16.xpose.msra.mxu0 %v5254_v4 }
 0x3c1   : > { %v5086_v33 = vmul.f32 %v6383_v42, %v9161_v51  ;;  %v5872_v55 = vclamps-f32 %v6056_v22, 127.0 }
 0x3c3   : > { %v5118_v25 = vmul.f32 25.475084, %v5086_v33 }
 0x3c4   : > { %v4758_v9 = vpop.f32.mrb[44].mxu1 }
 0x3c5   : > { %v6057_v11 = vround.rtne.f32 %v5118_v25  ;;  %v4826_v34 = vmul.f32 %v9013_v45, %v4758_v9  ;;  %v4760_v57 = vpop.f32.mrb[45].mxu1 }
 0x3c6   : > { %v6385_v20 = vpop.eup %6384  ;;  %v4761_v60 = vpop.f32.mrb[46].mxu1 }
 0x3c7   : > { %v5873_v28 = vclamps-f32 %v6057_v11, 127.0  ;;  %v5087_v18 = vmul.f32 %v6385_v20, %v4863_v19  ;;  %v4865_v26 = vadd.f32 %v9020_v8, %v4826_v34  ;;  %v4827_v16 = vmul.f32 %v9013_v45, %v4761_v60  ;;  %v4763_v1 = vpop.f32.mrb[47].mxu1 }
 0x3c9   : > { %v5236_v6 = vpack.c.bf16 %v5873_v28, %v5872_v55  ;;  %v6387_v51 = vpop.eup %6386  ;;  %v5119_v58 = vmul.f32 25.475084, %v5087_v18  ;;  %v5844_v3 = vmul.f32 -1.442695, %v4865_v26  ;;  %v4866_v40 = vadd.f32 %v9020_v8, %v4827_v16 }
 0x3ca   : > { %v5088_v12 = vmul.f32 %v6387_v51, %v4864_v43 }
 0x3cb   : > { %5999 = vmatprep.subr.msk.bf16.mxu0 %vm486_vm0, %v5236_v6  ;;  %v6058_v19 = vround.rtne.f32 %v5119_v58  ;;  %6388 = vpow2.f32 %v5844_v3  ;;  %v5845_v5 = vmul.f32 -1.442695, %v4866_v40 }
 0x3cc   : > { %5947 = vmatpush3.bf16.xpose.msra.mxu0 %v5257_v15  ;;  %v5120_v41 = vmul.f32 25.475084, %v5088_v12 }
 0x3cd   : > { %6390 = vpow2.f32 %v5845_v5  ;;  %v5874_v10 = vclamps-f32 %v6058_v19, 127.0 }
 0x3ce   : > { %v6059_v35 = vround.rtne.f32 %v5120_v41 }
 0x3cf   : > { %v4766_v2 = vpop.f32.mrb[48].mxu1 }
 0x3d0   : > { %v5875_v48 = vclamps-f32 %v6059_v35, 127.0  ;;  %v4828_v44 = vmul.f32 %v9013_v45, %v4766_v2  ;;  %v4768_v21 = vpop.f32.mrb[49].mxu1 }
 0x3d1   : > { %v4769_v7 = vpop.f32.mrb[50].mxu1 }
 0x3d2   : > { %v4867_v50 = vadd.f32 %v9020_v8, %v4828_v44  ;;  %v4829_v43 = vmul.f32 %v9013_v45, %v4769_v7  ;;  %v4771_v52 = vpop.f32.mrb[51].mxu1  ;;  %v5237_v53 = vpack.c.bf16 %v5875_v48, %v5874_v10 }
 0x3d4   : > { %v5846_v38 = vmul.f32 -1.442695, %v4867_v50  ;;  %v4868_v59 = vadd.f32 %v9020_v8, %v4829_v43  ;;  %6000 = vmatprep.subr.msk.bf16.mxu0 %vm486_vm0, %v5237_v53 }
 0x3d5   : > { %5949 = vmatpush3.bf16.xpose.msra.mxu0 %v5260_v14  ;;  %v6389_v27 = vpop.eup %6388 }
 0x3d6   : > { %6392 = vpow2.f32 %v5846_v38  ;;  %v5847_v4 = vmul.f32 -1.442695, %v4868_v59  ;;  %v4993_v42 = vadd.f32 1.0, %v6389_v27 }
 0x3d7   : > { %v6391_v24 = vpop.eup %6390 }
 0x3d8   : > { %6394 = vpow2.f32 %v5847_v4  ;;  %v4994_v33 = vadd.f32 1.0, %v6391_v24 }
 0x3d9   : > { %6396 = vrcp.f32 %v4993_v42 }
 0x3da   : > { %6398 = vrcp.f32 %v4994_v33  ;;  %v5263_v33 = vsel %vm486_vm0, %v5230_v31, 0 }
 0x3dc   : > { %v4774_v22 = vpop.f32.mrb[52].mxu1 }
 0x3dd   : > { %v4830_v25 = vmul.f32 %v9013_v45, %v4774_v22  ;;  %v4776_v11 = vpop.f32.mrb[53].mxu1 }
 0x3de   : > { %v4777_v55 = vpop.f32.mrb[54].mxu1 }
 0x3df   : > { %v9228_v28 = vadd.f32 %v9020_v8, %v4830_v25  ;;  %v4831_v56 = vmul.f32 %v9013_v45, %v4777_v55  ;;  %v4779_v39 = vpop.f32.mrb[55].mxu1 }
 0x3e0   : > { %v6393_v47 = vpop.eup %6392 }
 0x3e1   : > { %v4995_v9 = vadd.f32 1.0, %v6393_v47  ;;  %v5848_v34 = vmul.f32 -1.442695, %v9228_v28  ;;  %v9233_v57 = vadd.f32 %v9020_v8, %v4831_v56 }
 0x3e2   : > { %v6395_v20 = vpop.eup %6394 }
 0x3e3   : > { %v6397_v60 = vpop.eup %6396  ;;  %6400 = vrcp.f32 %v4995_v9  ;;  %v4996_v6 = vadd.f32 1.0, %v6395_v20  ;;  %v5849_v18 = vmul.f32 -1.442695, %v9233_v57 }
 0x3e4   : > { %v5089_v16 = vmul.f32 %v6397_v60, %v4865_v26  ;;  %6402 = vpow2.f32 %v5848_v34  ;;  %v6399_v1 = vpop.eup %6398 }
 0x3e5   : > { %6404 = vrcp.f32 %v4996_v6  ;;  %v5090_v15 = vmul.f32 %v6399_v1, %v4866_v40 }
 0x3e6   : > { %v5121_v51 = vmul.f32 25.475084, %v5089_v16  ;;  %6406 = vpow2.f32 %v5849_v18  ;;  %v5266_v16 = vsel %vm486_vm0, %v5231_v46, 0 }
 0x3e7   : > { %v5122_v12 = vmul.f32 25.475084, %v5090_v15 }
 0x3e8   : > { %v6060_v58 = vround.rtne.f32 %v5121_v51 }
 0x3e9   : > { %v4782_v3 = vpop.f32.mrb[56].mxu1  ;;  %v6061_v5 = vround.rtne.f32 %v5122_v12 }
 0x3ea   : > { %v4832_v19 = vmul.f32 %v9013_v45, %v4782_v3  ;;  %v4784_v41 = vpop.f32.mrb[57].mxu1  ;;  %v5876_v48 = vclamps-f32 %v6060_v58, 127.0 }
 0x3eb   : > { %v4785_v35 = vpop.f32.mrb[58].mxu1  ;;  %v5877_v44 = vclamps-f32 %v6061_v5, 127.0 }
 0x3ec   : > { %v9238_v2 = vadd.f32 %v9020_v8, %v4832_v19  ;;  %v4833_v10 = vmul.f32 %v9013_v45, %v4785_v35  ;;  %v4787_v26 = vpop.f32.mrb[59].mxu1 }
 0x3ed   : > { %v6401_v21 = vpop.eup %6400  ;;  %v5238_v53 = vpack.c.bf16 %v5877_v44, %v5876_v48 }
 0x3ee   : > { %v5850_v40 = vmul.f32 -1.442695, %v9238_v2  ;;  %v9243_v7 = vadd.f32 %v9020_v8, %v4833_v10  ;;  %v6403_v43 = vpop.eup %6402  ;;  %v5091_v52 = vmul.f32 %v6401_v21, %v4867_v50 }
 0x3ef   : > { %v6405_v38 = vpop.eup %6404  ;;  %v4997_v14 = vadd.f32 1.0, %v6403_v43  ;;  %6001 = vmatprep.subr.msk.bf16.mxu0 %vm486_vm0, %v5238_v53 }
 0x3f0   : > { %6408 = vpow2.f32 %v5850_v40  ;;  %v5851_v27 = vmul.f32 -1.442695, %v9243_v7  ;;  %v6407_v4 = vpop.eup %6406  ;;  %v5123_v42 = vmul.f32 25.475084, %v5091_v52  ;;  %v5092_v24 = vmul.f32 %v6405_v38, %v4868_v59  ;;  %5951 = vmatpush3.bf16.xpose.msra.mxu0 %v5263_v33 }
 0x3f1   : > { %6410 = vrcp.f32 %v4997_v14  ;;  %v4998_v22 = vadd.f32 1.0, %v6407_v4 }
 0x3f2   : > { %v6062_v50 = vround.rtne.f32 %v5123_v42  ;;  %v5124_v25 = vmul.f32 25.475084, %v5092_v24  ;;  %6412 = vpow2.f32 %v5851_v27 }
 0x3f3   : > { %6414 = vrcp.f32 %v4998_v22 }
 0x3f4   : > { %v6063_v11 = vround.rtne.f32 %v5124_v25  ;;  %v5878_v59 = vclamps-f32 %v6062_v50, 127.0 }
 0x3f5   : > { %v4790_v55 = vpop.f32.mrb[60].mxu1 }
 0x3f6   : > { %v4834_v56 = vmul.f32 %v9013_v45, %v4790_v55  ;;  %v4792_v39 = vpop.f32.mrb[61].mxu1  ;;  %v5879_v47 = vclamps-f32 %v6063_v11, 127.0  ;;  %v5275_v55 = vsel %vm486_vm0, %v5234_v49, 0 }
 0x3f7   : > { %v4793_v9 = vpop.f32.mrb[62].mxu1 }
 0x3f8   : > { %v4873_v34 = vadd.f32 %v9020_v8, %v4834_v56  ;;  %v4835_v61 = vmul.f32 %v9013_v45, %v4793_v9  ;;  %v4795_v32 = vpop.f32.mrb[63].mxu1  ;;  %v5239_v31 = vpack.c.bf16 %v5879_v47, %v5878_v59 }
 0x3fa   : > { %v6409_v20 = vpop.eup %6408  ;;  %v5852_v60 = vmul.f32 -1.442695, %v4873_v34  ;;  %v4874_v6 = vadd.f32 %v9020_v8, %v4835_v61  ;;  %6002 = vmatprep.subr.msk.bf16.mxu0 %vm486_vm0, %v5239_v31 }
 0x3fb   : > { %v4999_v18 = vadd.f32 1.0, %v6409_v20  ;;  %v6411_v1 = vpop.eup %6410  ;;  %5953 = vmatpush3.bf16.xpose.msra.mxu0 %v5266_v16 }
 0x3fc   : > { %6416 = vpow2.f32 %v5852_v60  ;;  %v5853_v51 = vmul.f32 -1.442695, %v4874_v6  ;;  %v6413_v15 = vpop.eup %6412  ;;  %v5093_v45 = vmul.f32 %v6411_v1, %v9228_v28 }
 0x3fd   : > { %6418 = vrcp.f32 %v4999_v18  ;;  %v6415_v58 = vpop.eup %6414  ;;  %v5000_v12 = vadd.f32 1.0, %v6413_v15 }
 0x3fe   : > { %6420 = vpow2.f32 %v5853_v51  ;;  %v5125_v8 = vmul.f32 25.475084, %v5093_v45  ;;  %v5094_v3 = vmul.f32 %v6415_v58, %v9233_v57  ;;  %v5269_v57 = vsel %vm486_vm0, %v5232_v0, 0 }
 0x3ff   : > { %6422 = vrcp.f32 %v5000_v12 }
 0x400   : > { %v6064_v19 = vround.rtne.f32 %v5125_v8  ;;  %v5126_v41 = vmul.f32 25.475084, %v5094_v3 }
 0x402   : > { %v6065_v23 = vround.rtne.f32 %v5126_v41  ;;  %v5880_v29 = vclamps-f32 %v6064_v19, 127.0 }
 0x404   : > { %v5881_v46 = vclamps-f32 %v6065_v23, 127.0 }
 0x406   : > { %v6417_v5 = vpop.eup %6416  ;;  %v5240_v26 = vpack.c.bf16 %v5881_v46, %v5880_v29 }
 0x407   : > { %v6419_v35 = vpop.eup %6418  ;;  %v5001_v10 = vadd.f32 1.0, %v6417_v5 }
 0x408   : > { %v6421_v48 = vpop.eup %6420  ;;  %v5095_v28 = vmul.f32 %v6419_v35, %v9238_v2  ;;  %6003 = vmatprep.subr.msk.bf16.mxu0 %vm486_vm0, %v5240_v26 }
 0x409   : > { %6424 = vrcp.f32 %v5001_v10  ;;  %v5002_v44 = vadd.f32 1.0, %v6421_v48  ;;  %v6423_v21 = vpop.eup %6422  ;;  %5955 = vmatpush3.bf16.xpose.msra.mxu0 %v5269_v57 }
 0x40a   : > { %v5127_v40 = vmul.f32 25.475084, %v5095_v28  ;;  %v5096_v43 = vmul.f32 %v6423_v21, %v9243_v7 }
 0x40b   : > { %6426 = vrcp.f32 %v5002_v44 }
 0x40c   : > { %v6066_v52 = vround.rtne.f32 %v5127_v40  ;;  %v5128_v53 = vmul.f32 25.475084, %v5096_v43 }
 0x40d   : > { %v5349_v17 = vpop.permute.xlu0 %5348 }
 0x40e   : > { %v6067_v38 = vround.rtne.f32 %v5128_v53  ;;  %v5882_v14 = vclamps-f32 %v6066_v52, 127.0 }
 0x410   : > { %v5883_v2 = vclamps-f32 %v6067_v38, 127.0 }
 0x412   : > { %v5241_v4 = vpack.c.bf16 %v5883_v2, %v5882_v14 }
 0x413   : > { %v6425_v27 = vpop.eup %6424 }
 0x414   : > { %v5097_v42 = vmul.f32 %v6425_v27, %v4873_v34  ;;  %6004 = vmatprep.subr.msk.bf16.mxu0 %vm486_vm0, %v5241_v4 }
 0x415   : > { %v6427_v24 = vpop.eup %6426  ;;  %5957 = vmatpush3.bf16.xpose.msra.mxu0 %v5272_v54 }
 0x416   : > { %v5129_v37 = vmul.f32 25.475084, %v5097_v42  ;;  %v5098_v0 = vmul.f32 %v6427_v24, %v4874_v6 }
 0x418   : > { %v6068_v7 = vround.rtne.f32 %v5129_v37  ;;  %v5130_v33 = vmul.f32 25.475084, %v5098_v0 }
 0x41a   : > { %v6069_v22 = vround.rtne.f32 %v5130_v33  ;;  %v5884_v50 = vclamps-f32 %v6068_v7, 127.0 }
 0x41c   : > { %v5885_v25 = vclamps-f32 %v6069_v22, 127.0 }
 0x41d   : > { %v5370_v63 = vpop.permute.xlu0 %5369 }
 0x41e   : > { %v5242_v11 = vpack.c.bf16 %v5885_v25, %v5884_v50 }
 0x420   : > { %6005 = vmatprep.subr.msk.bf16.mxu0 %vm486_vm0, %v5242_v11 }
 0x421   : > { %5959 = vmatpush3.bf16.xpose.msra.mxu0 %v5275_v55 }
 0x425   : > { %v5354_v62 = vpop.permute.xlu1 %5353 }
 0x428   : > { %5961 = vmatmul.mubr.msk.bf16.vlgmr.msra.gmra.mrb[32].mxu0 %vm486_vm0, %v9152_v13 }
 0x429   : > { %v5365_v56 = vpop.permute.xlu1 %5364 }
 0x4fb   : > { %v5335_v30 = vpop.f32.mrb[32].mxu0 }
 0x4fc   : > { %v5356_v39 = vmul.f32 %v5349_v17, %v5335_v30  ;;  %v5337_v59 = vpop.f32.mrb[33].mxu0 }
 0x4fd   : > { %v5357_v47 = vmul.f32 %v5349_v17, %v5337_v59  ;;  %v5339_v9 = vpop.f32.mrb[34].mxu0  ;;  %5386 = sbr.rel (!%p6577_p4) target bundleno = 1292 (0x50c), region = 64 }
 0x4fe   : > { %v5358_v34 = vmul.f32 %v5354_v62, %v5339_v9  ;;  %v5372_v61 = vadd.f32 %v5365_v56, %v5356_v39  ;;  %v5341_v32 = vpop.f32.mrb[35].mxu0 }
 0x4ff   : > { %v5373_v36 = vadd.f32 %v5365_v56, %v5357_v47  ;;  %v5359_v49 = vmul.f32 %v5354_v62, %v5341_v32 }
 0x500   : > { %v5374_v31 = vadd.f32 %v5370_v63, %v5358_v34  ;;  %5376 = vst [vmem:[%s349_s23] sm:$0xff] %v5372_v61 }
 0x501   : > { %5377 = vst [vmem:[%s349_s23 + $0x8] sm:$0xff] %v5373_v36  ;;  %v5375_v13 = vadd.f32 %v5370_v63, %v5359_v49 }
 0x502   : > { %5378 = vst [vmem:[%s349_s23 + $0x10] sm:$0xff] %v5374_v31 }
 0x503   : > { %5379 = vst [vmem:[%s349_s23 + $0x18] sm:$0xff] %v5375_v13 }
 0x507   : > { %v5402_v20 = vld [vmem:[%s349_s23] sm:$0xff] }
 0x508   : > { %v5404_v60 = vld [vmem:[%s349_s23 + $0x8] sm:$0xff]  ;;  %5403 = vst [vmem:[%s5389_s26] sm:$0xff] %v5402_v20 }
 0x509   : > { %v5406_v6 = vld [vmem:[%s349_s23 + $0x10] sm:$0xff]  ;;  %5405 = vst [vmem:[%s5389_s26 + $0x8] sm:$0xff] %v5404_v60 }
 0x50a   : > { %v5408_v18 = vld [vmem:[%s349_s23 + $0x18] sm:$0xff]  ;;  %5407 = vst [vmem:[%s5389_s26 + $0x20] sm:$0xff] %v5406_v6 }
 0x50b   : > { %5409 = vst [vmem:[%s5389_s26 + $0x28] sm:$0xff] %v5408_v18 }
 0x50c PF: > { %p17_p8 = scmp.ge.s32.totalorder %s6567_s17, 4   ;;  %s9434_s13 = smov %s6483_s14 }
 0x50d   : > { %s9435_s14 = smov %s6575_s20  ;;  %s9436_s15 = smov %s6567_s17 }
 0x50e   :  { %19 = sbr.rel (!%p17_p8) target bundleno = 2 (0x2), region = 115 }

</bundles_post_ra>
